<compile_context>
chip_gen: v7x
topology: tpu7x:2x2x1
jax: 0.10.0
libtpu: 0.0.40
codegen_flags: <defaults>
</compile_context>

<pallas_src>
import functools
import math

import jax
import jax.numpy as jnp
import numpy as np
from jax.experimental import pallas as pl
from jax.experimental.pallas import tpu as pltpu


def _tpconv_kernel(ea_ref, sh_ref, src_ref, dst_ref, node128_ref, node_ref,
                   w1_ref, b1_ref, w2_ref, b2_ref,
                   rs_ref, pm_ref, onec_ref, resid_ref, g_ref, be_ref,
                   out_ref, *, n_nodes, c_out):
    e = pl.program_id(0)

    # init resident accumulator: sums in lanes[:c_out], edge counts in lane c_out
    @pl.when(e == 0)
    def _():
        out_ref[...] = jnp.zeros_like(out_ref)

    ea = ea_ref[...]                      # [TE, F]  f32
    sh = sh_ref[...]                      # [TE, S]  f32
    src = src_ref[...]                    # [1, TE]  int32 (-1 on padded edges)
    dst = dst_ref[...]                    # [TE, 1]  int32 (-1 on padded edges)
    te = ea.shape[0]
    n_pad = node128_ref.shape[0]

    # ---- fc: Linear -> ReLU -> Dropout(p=0, no-op) -> Linear (f32, tiny K) --
    h = jnp.dot(ea, w1_ref[...], preferred_element_type=jnp.float32) + b1_ref[...]
    h = jnp.maximum(h, 0.0)
    w = jnp.dot(h, w2_ref[...], preferred_element_type=jnp.float32) + b2_ref[...]  # [TE, W]

    # ---- gather node128[edge_dst]: bf16 one-hot matmul, lane-dense result ---
    # TODO(synk): for large N replace with a scalar-prefetched DMA gather.
    nid_lane = jax.lax.broadcasted_iota(jnp.int32, (te, n_pad), 1)   # node id along lanes
    dst_oh = (nid_lane == dst).astype(jnp.bfloat16)                  # [TE, N_pad] exact 0/1
    x128 = jnp.dot(dst_oh, node128_ref[...],
                   preferred_element_type=jnp.float32)               # [TE, W]

    # ---- lane-dense FullyConnectedTensorProduct (all-scalar irreps) ---------
    sh128 = jnp.dot(sh, rs_ref[...], preferred_element_type=jnp.float32)  # [TE, W]
    prod = x128 * sh128 * w                                          # full-width VPU
    # pool over (i,j) (1/sqrt(C*S) folded into pm) and add the count lane
    tpc = jnp.dot(prod.astype(jnp.bfloat16), pm_ref[...],
                  preferred_element_type=jnp.float32) + onec_ref[...]      # [TE, W]

    # ---- scatter-accumulate over edge_src: sums + counts in one matmul ------
    # (fixed: node-id iota runs along dim 0 of the [N_pad, TE] one-hot)
    nid_node = jax.lax.broadcasted_iota(jnp.int32, (n_pad, te), 0)
    src_oh = (nid_node == src).astype(jnp.bfloat16)                  # [N_pad, TE] exact 0/1
    out_ref[...] += jnp.dot(src_oh, tpc.astype(jnp.bfloat16),
                            preferred_element_type=jnp.float32)

    # ---- finalize on last edge block: mean, residual, batch norm ------------
    @pl.when(e == pl.num_programs(0) - 1)
    def _():
        acc = out_ref[...]                                           # [N_pad, W]
        counts = acc[:, c_out:c_out + 1]
        inv = pl.reciprocal(jnp.maximum(counts, 1.0), approx=True)   # scatter 'mean'
        out = acc * inv
        # residual: out += F.pad(node_attr, (0, O - C))
        out = out + jnp.dot(node_ref[...], resid_ref[...],
                            preferred_element_type=jnp.float32)
        # e3nn BatchNorm (scalar irreps) with batch statistics (biased var).
        # Stats run over all W lanes; gamma/beta are zero beyond lane O so the
        # extra lanes never reach the sliced output.
        # TODO(synk): running-stats update of e3nn BatchNorm is stateful; not modeled.
        w_lanes = acc.shape[1]
        rmask = (jax.lax.broadcasted_iota(jnp.int32, (n_pad, w_lanes), 0)
                 < n_nodes).astype(jnp.float32)
        inv_n = 1.0 / n_nodes
        mu = jnp.sum(out * rmask, axis=0, keepdims=True) * inv_n
        xc = out - mu
        var = jnp.sum(xc * xc * rmask, axis=0, keepdims=True) * inv_n
        out_ref[...] = xc * jax.lax.rsqrt(var + 1e-5) * g_ref[...] + be_ref[...]


def tensor_product_conv(node_attr, edge_index, edge_attr, edge_sh, params,
                        c_out, *, edge_tile=512):
    """forward(node_attr, edge_index, edge_attr, edge_sh), out_nodes=None, reduce='mean'."""
    node_attr = jnp.asarray(node_attr, jnp.float32)
    edge_attr = jnp.asarray(edge_attr, jnp.float32)
    edge_sh = jnp.asarray(edge_sh, jnp.float32)
    w1, b1, w2, b2, gamma, beta = [jnp.asarray(p, jnp.float32) for p in params]

    N, C = node_attr.shape
    E, F_e = edge_attr.shape
    S = edge_sh.shape[1]
    O = c_out
    H = w1.shape[1]
    W = C * S * O                       # tp.weight_numel (= 128 here -> lane dense)
    assert w2.shape[1] == W and W > O
    assert O >= C, "residual pad assumes C_out >= C_in"

    n_pad = ((N + 7) // 8) * 8
    e_pad = pl.cdiv(E, edge_tile) * edge_tile

    # pad graph (padded edges use index -1 -> zero one-hot row/col -> no effect)
    node_p = jnp.zeros((n_pad, C), jnp.float32).at[:N].set(node_attr)
    ea_p = jnp.zeros((e_pad, F_e), jnp.float32).at[:E].set(edge_attr)
    sh_p = jnp.zeros((e_pad, S), jnp.float32).at[:E].set(edge_sh)
    src_p = jnp.full((1, e_pad), -1, jnp.int32).at[0, :E].set(
        jnp.asarray(edge_index[0], jnp.int32))
    dst_p = jnp.full((e_pad, 1), -1, jnp.int32).at[:E, 0].set(
        jnp.asarray(edge_index[1], jnp.int32))

    # host-precomputed constant projection matrices (resident in VMEM)
    rx = np.zeros((C, W), np.float32)
    rs = np.zeros((S, W), np.float32)
    pm = np.zeros((W, W), np.float32)
    norm = 1.0 / math.sqrt(C * S)       # 0.25 -> exact in bf16
    for i in range(C):
        for j in range(S):
            base = (i * S + j) * O
            rx[i, base:base + O] = 1.0
            rs[j, base:base + O] = 1.0
            for k in range(O):
                pm[base + k, k] = norm
    onec = np.zeros((1, W), np.float32)
    onec[0, O] = 1.0                    # count lane
    resid = np.zeros((C, W), np.float32)
    for i in range(C):
        resid[i, i] = 1.0               # == F.pad(node_attr, (0, O - C))
    g128 = np.zeros((1, W), np.float32)
    g128[0, :O] = np.asarray(gamma)
    b128 = np.zeros((1, W), np.float32)
    b128[0, :O] = np.asarray(beta)

    # hoisted x-expansion: node128[n, (i*S+j)*O+k] = node_attr[n, i]
    node128 = jnp.dot(node_p, jnp.asarray(rx)).astype(jnp.bfloat16)
    pm_bf16 = jnp.asarray(pm, jnp.bfloat16)

    res = lambda shape: pl.BlockSpec(shape, lambda e: (0, 0))  # resident blocks
    kernel = functools.partial(_tpconv_kernel, n_nodes=N, c_out=O)

    n_steps = e_pad // edge_tile
    flops = int(e_pad) * int(2 * F_e * H + 2 * H * W + 2 * n_pad * W
                             + 2 * S * W + 3 * W + 2 * W * W + 2 * n_pad * W)
    bytes_accessed = int(
        ea_p.size * 4 + sh_p.size * 4 + src_p.size * 4 + dst_p.size * 4
        + node128.size * 2 + node_p.size * 4
        + (w1.size + b1.size + w2.size + b2.size) * 4
        + (rs.size + onec.size + resid.size + g128.size + b128.size) * 4
        + pm.size * 2 + n_pad * W * 4)
    cost = pl.CostEstimate(flops=flops, transcendentals=2 * n_pad * W,
                           bytes_accessed=bytes_accessed)

    out = pl.pallas_call(
        kernel,
        out_shape=jax.ShapeDtypeStruct((n_pad, W), jnp.float32),
        grid_spec=pltpu.PrefetchScalarGridSpec(
            num_scalar_prefetch=0,
            grid=(n_steps,),
            in_specs=[
                pl.BlockSpec((edge_tile, F_e), lambda e: (e, 0)),  # edge_attr tile
                pl.BlockSpec((edge_tile, S), lambda e: (e, 0)),    # edge_sh tile
                pl.BlockSpec((1, edge_tile), lambda e: (0, e)),    # edge_src tile
                pl.BlockSpec((edge_tile, 1), lambda e: (e, 0)),    # edge_dst tile
                res((n_pad, W)),                                   # node128 (bf16)
                res((n_pad, C)),                                   # node_attr (residual)
                res((F_e, H)), res((1, H)), res((H, W)), res((1, W)),   # fc params
                res((S, W)), res((W, W)), res((1, W)),                  # Rs, P, count lane
                res((C, W)), res((1, W)), res((1, W)),                  # resid, gamma, beta
            ],
            out_specs=pl.BlockSpec((n_pad, W), lambda e: (0, 0)),  # resident accumulator
        ),
        compiler_params=pltpu.CompilerParams(
            # output accumulates over the edge axis -> must be "arbitrary"
            dimension_semantics=("arbitrary",)),
        cost_estimate=cost,
    )(ea_p, sh_p, src_p, dst_p, node128, node_p,
      w1, b1.reshape(1, -1), w2, b2.reshape(1, -1),
      jnp.asarray(rs), pm_bf16, jnp.asarray(onec),
      jnp.asarray(resid), jnp.asarray(g128), jnp.asarray(b128))
    return out[:N, :O]


def reference(node_attr, edge_index, edge_attr, edge_sh, params, c_out):
    """Pure-JAX f32 reference with identical math (sanity check)."""
    src, dst = edge_index
    w1, b1, w2, b2, gamma, beta = params
    E = edge_attr.shape[0]
    N, C = node_attr.shape
    S = edge_sh.shape[1]
    O = c_out
    h = jnp.maximum(edge_attr @ w1 + b1, 0.0)
    w = (h @ w2 + b2).reshape(E, C, S, O)
    x = node_attr[dst]
    tp = jnp.einsum('ecso,ec,es->eo', w, x, edge_sh) / math.sqrt(C * S)
    sums = jax.ops.segment_sum(tp, src, num_segments=N)
    counts = jax.ops.segment_sum(jnp.ones((E,), jnp.float32), src, num_segments=N)
    out = sums / jnp.maximum(counts, 1.0)[:, None]
    out = out + jnp.pad(node_attr, ((0, 0), (0, O - C)))
    mu = out.mean(0, keepdims=True)
    xc = out - mu
    var = (xc * xc).mean(0, keepdims=True)
    return xc / jnp.sqrt(var + 1e-5) * gamma + beta


if __name__ == "__main__":
    # Small shapes consistent with the module; E chosen so the default
    # edge_tile=512 exercises the multi-tile accumulation path (grid=2).
    N, E = 64, 600
    C_IN, S_SH, C_OUT = 4, 4, 8
    F_EDGE, HIDDEN = 16, 16
    WEIGHT_NUMEL = C_IN * S_SH * C_OUT  # tp.weight_numel = 128

    key = jax.random.PRNGKey(0)
    keys = jax.random.split(key, 10)

    node_attr = jax.random.normal(keys[0], (N, C_IN), jnp.float32)
    edge_attr = jax.random.normal(keys[1], (E, F_EDGE), jnp.float32)
    edge_sh   = jax.random.normal(keys[2], (E, S_SH), jnp.float32)
    edge_src  = jax.random.randint(keys[3], (E,), 0, N, jnp.int32)
    edge_dst  = jax.random.randint(keys[4], (E,), 0, N, jnp.int32)
    edge_index = jnp.stack([edge_src, edge_dst], axis=0)            # [2, E]

    # Deterministic parameter init (synthetic; shapes match the module __init__).
    w1 = jax.random.normal(keys[5], (F_EDGE, HIDDEN), jnp.float32) / math.sqrt(F_EDGE)
    b1 = jax.random.normal(keys[6], (HIDDEN,), jnp.float32) * 0.01
    w2 = jax.random.normal(keys[7], (HIDDEN, WEIGHT_NUMEL), jnp.float32) / math.sqrt(HIDDEN)
    b2 = jax.random.normal(keys[8], (WEIGHT_NUMEL,), jnp.float32) * 0.01
    gamma = jnp.ones((C_OUT,), jnp.float32)     # e3nn BatchNorm affine init
    beta  = jnp.zeros((C_OUT,), jnp.float32)
    params = (w1, b1, w2, b2, gamma, beta)

    out = tensor_product_conv(node_attr, edge_index, edge_attr, edge_sh, params, C_OUT)
    out = jax.block_until_ready(out)

    ref = jax.block_until_ready(
        reference(node_attr, edge_index, edge_attr, edge_sh, params, C_OUT))

    assert out.shape == (N, C_OUT)
    # bf16 MXU operands (gather/scatter one-hots, node expansion, pooled product)
    # with f32 accumulation -> slightly looser tolerance than pure f32.
    max_err = float(jnp.max(jnp.abs(out - ref)))
    assert jnp.allclose(out, ref, atol=2e-2, rtol=2e-2), ("max_abs_err", max_err)
    print("KERNEL_OK")
</pallas_src>

<mosaic_0001>
module attributes {stable_mosaic.version = 11 : i64} {
  func.func @_tpconv_kernel(%arg0: i32, %arg1: memref<512x16xf32, #tpu.memory_space<vmem>>, %arg2: memref<512x4xf32, #tpu.memory_space<vmem>>, %arg3: memref<1x512xi32, #tpu.memory_space<vmem>>, %arg4: memref<512x1xi32, #tpu.memory_space<vmem>>, %arg5: memref<64x128xbf16, #tpu.memory_space<vmem>>, %arg6: memref<64x4xf32, #tpu.memory_space<vmem>>, %arg7: memref<16x16xf32, #tpu.memory_space<vmem>>, %arg8: memref<1x16xf32, #tpu.memory_space<vmem>>, %arg9: memref<16x128xf32, #tpu.memory_space<vmem>>, %arg10: memref<1x128xf32, #tpu.memory_space<vmem>>, %arg11: memref<4x128xf32, #tpu.memory_space<vmem>>, %arg12: memref<128x128xbf16, #tpu.memory_space<vmem>>, %arg13: memref<1x128xf32, #tpu.memory_space<vmem>>, %arg14: memref<4x128xf32, #tpu.memory_space<vmem>>, %arg15: memref<1x128xf32, #tpu.memory_space<vmem>>, %arg16: memref<1x128xf32, #tpu.memory_space<vmem>>, %arg17: memref<64x128xf32, #tpu.memory_space<vmem>>) attributes {dimension_semantics = [#tpu.dimension_semantics<arbitrary>], iteration_bounds = array<i64: 2>, scalar_prefetch = 0 : i64, scratch_operands = 0 : i64, tpu.core_type = #tpu.core_type<tc>, window_params = [{transform_indices = @transform_0, window_bounds = array<i64: 512, 16>}, {transform_indices = @transform_1, window_bounds = array<i64: 512, 4>}, {transform_indices = @transform_2, window_bounds = array<i64: 1, 512>}, {transform_indices = @transform_3, window_bounds = array<i64: 512, 1>}, {pipeline_mode = #tpu.pipeline_mode<synchronous>, transform_indices = @transform_4, window_bounds = array<i64: 64, 128>}, {pipeline_mode = #tpu.pipeline_mode<synchronous>, transform_indices = @transform_5, window_bounds = array<i64: 64, 4>}, {pipeline_mode = #tpu.pipeline_mode<synchronous>, transform_indices = @transform_6, window_bounds = array<i64: 16, 16>}, {pipeline_mode = #tpu.pipeline_mode<synchronous>, transform_indices = @transform_7, window_bounds = array<i64: 1, 16>}, {pipeline_mode = #tpu.pipeline_mode<synchronous>, transform_indices = @transform_8, window_bounds = array<i64: 16, 128>}, {pipeline_mode = #tpu.pipeline_mode<synchronous>, transform_indices = @transform_9, window_bounds = array<i64: 1, 128>}, {pipeline_mode = #tpu.pipeline_mode<synchronous>, transform_indices = @transform_10, window_bounds = array<i64: 4, 128>}, {pipeline_mode = #tpu.pipeline_mode<synchronous>, transform_indices = @transform_11, window_bounds = array<i64: 128, 128>}, {pipeline_mode = #tpu.pipeline_mode<synchronous>, transform_indices = @transform_12, window_bounds = array<i64: 1, 128>}, {pipeline_mode = #tpu.pipeline_mode<synchronous>, transform_indices = @transform_13, window_bounds = array<i64: 4, 128>}, {pipeline_mode = #tpu.pipeline_mode<synchronous>, transform_indices = @transform_14, window_bounds = array<i64: 1, 128>}, {pipeline_mode = #tpu.pipeline_mode<synchronous>, transform_indices = @transform_15, window_bounds = array<i64: 1, 128>}, {pipeline_mode = #tpu.pipeline_mode<synchronous>, transform_indices = @transform_16, window_bounds = array<i64: 64, 128>}]} {
    %c0_i32 = arith.constant 0 : i32
    %0 = arith.cmpi eq, %arg0, %c0_i32 : i32
    %1 = arith.extui %0 : i1 to i32
    %c0_i32_0 = arith.constant 0 : i32
    %2 = arith.cmpi ne, %1, %c0_i32_0 : i32
    scf.if %2 {
      %cst_35 = arith.constant 0.000000e+00 : f32
      %51 = vector.broadcast %cst_35 : f32 to vector<64x128xf32>
      %c0_36 = arith.constant 0 : index
      %c0_37 = arith.constant 0 : index
      %52 = vector.load %arg17[%c0_36, %c0_37] : memref<64x128xf32, #tpu.memory_space<vmem>>, vector<64x128xf32>
      tpu.vector_store %arg17[%c0_36, %c0_37], %51 {strides = array<i32>} : memref<64x128xf32, #tpu.memory_space<vmem>>, vector<64x128xf32>,
    } else {
    }
    %c0 = arith.constant 0 : index
    %c0_1 = arith.constant 0 : index
    %3 = vector.load %arg1[%c0, %c0_1] : memref<512x16xf32, #tpu.memory_space<vmem>>, vector<512x16xf32>
    %c0_2 = arith.constant 0 : index
    %c0_3 = arith.constant 0 : index
    %4 = vector.load %arg2[%c0_2, %c0_3] : memref<512x4xf32, #tpu.memory_space<vmem>>, vector<512x4xf32>
    %c0_4 = arith.constant 0 : index
    %c0_5 = arith.constant 0 : index
    %5 = vector.load %arg3[%c0_4, %c0_5] : memref<1x512xi32, #tpu.memory_space<vmem>>, vector<1x512xi32>
    %c0_6 = arith.constant 0 : index
    %c0_7 = arith.constant 0 : index
    %6 = vector.load %arg4[%c0_6, %c0_7] : memref<512x1xi32, #tpu.memory_space<vmem>>, vector<512x1xi32>
    %c0_8 = arith.constant 0 : index
    %c0_9 = arith.constant 0 : index
    %7 = vector.load %arg7[%c0_8, %c0_9] : memref<16x16xf32, #tpu.memory_space<vmem>>, vector<16x16xf32>
    %cst = arith.constant dense<0.000000e+00> : vector<512x16xf32>
    %8 = tpu.matmul %3, %7, %cst {dimension_numbers = #tpu.dot_dimension_numbers<[1], [0], [0], [1], [0, 0, 1, 1], [], []>} : vector<512x16xf32>, vector<16x16xf32>, vector<512x16xf32> -> vector<512x16xf32>
    %c0_10 = arith.constant 0 : index
    %c0_11 = arith.constant 0 : index
    %9 = vector.load %arg8[%c0_10, %c0_11] : memref<1x16xf32, #tpu.memory_space<vmem>>, vector<1x16xf32>
    %10 = vector.broadcast %9 : vector<1x16xf32> to vector<512x16xf32>
    %11 = arith.addf %8, %10 : vector<512x16xf32>
    %cst_12 = arith.constant 0.000000e+00 : f32
    %12 = vector.broadcast %cst_12 : f32 to vector<512x16xf32>
    %13 = arith.maximumf %11, %12 : vector<512x16xf32>
    %c0_13 = arith.constant 0 : index
    %c0_14 = arith.constant 0 : index
    %14 = vector.load %arg9[%c0_13, %c0_14] : memref<16x128xf32, #tpu.memory_space<vmem>>, vector<16x128xf32>
    %cst_15 = arith.constant dense<0.000000e+00> : vector<512x128xf32>
    %15 = tpu.matmul %13, %14, %cst_15 {dimension_numbers = #tpu.dot_dimension_numbers<[1], [0], [0], [1], [0, 0, 1, 1], [], []>} : vector<512x16xf32>, vector<16x128xf32>, vector<512x128xf32> -> vector<512x128xf32>
    %c0_16 = arith.constant 0 : index
    %c0_17 = arith.constant 0 : index
    %16 = vector.load %arg10[%c0_16, %c0_17] : memref<1x128xf32, #tpu.memory_space<vmem>>, vector<1x128xf32>
    %17 = vector.broadcast %16 : vector<1x128xf32> to vector<512x128xf32>
    %18 = arith.addf %15, %17 : vector<512x128xf32>
    %19 = tpu.iota {dimensions = array<i32: 1>} : vector<512x64xi32>
    %20 = vector.broadcast %6 : vector<512x1xi32> to vector<512x64xi32>
    %21 = arith.cmpi eq, %19, %20 : vector<512x64xi32>
    %22 = arith.extui %21 : vector<512x64xi1> to vector<512x64xi32>
    %23 = arith.sitofp %22 : vector<512x64xi32> to vector<512x64xf32>
    %24 = arith.truncf %23 : vector<512x64xf32> to vector<512x64xbf16>
    %c0_18 = arith.constant 0 : index
    %c0_19 = arith.constant 0 : index
    %25 = vector.load %arg5[%c0_18, %c0_19] : memref<64x128xbf16, #tpu.memory_space<vmem>>, vector<64x128xbf16>
    %cst_20 = arith.constant dense<0.000000e+00> : vector<512x128xf32>
    %26 = tpu.matmul %24, %25, %cst_20 {dimension_numbers = #tpu.dot_dimension_numbers<[1], [0], [0], [1], [0, 0, 1, 1], [], []>} : vector<512x64xbf16>, vector<64x128xbf16>, vector<512x128xf32> -> vector<512x128xf32>
    %c0_21 = arith.constant 0 : index
    %c0_22 = arith.constant 0 : index
    %27 = vector.load %arg11[%c0_21, %c0_22] : memref<4x128xf32, #tpu.memory_space<vmem>>, vector<4x128xf32>
    %cst_23 = arith.constant dense<0.000000e+00> : vector<512x128xf32>
    %28 = tpu.matmul %4, %27, %cst_23 {dimension_numbers = #tpu.dot_dimension_numbers<[1], [0], [0], [1], [0, 0, 1, 1], [], []>} : vector<512x4xf32>, vector<4x128xf32>, vector<512x128xf32> -> vector<512x128xf32>
    %29 = arith.mulf %26, %28 : vector<512x128xf32>
    %30 = arith.mulf %29, %18 : vector<512x128xf32>
    %31 = arith.truncf %30 : vector<512x128xf32> to vector<512x128xbf16>
    %c0_24 = arith.constant 0 : index
    %c0_25 = arith.constant 0 : index
    %32 = vector.load %arg12[%c0_24, %c0_25] : memref<128x128xbf16, #tpu.memory_space<vmem>>, vector<128x128xbf16>
    %cst_26 = arith.constant dense<0.000000e+00> : vector<512x128xf32>
    %33 = tpu.matmul %31, %32, %cst_26 {dimension_numbers = #tpu.dot_dimension_numbers<[1], [0], [0], [1], [0, 0, 1, 1], [], []>} : vector<512x128xbf16>, vector<128x128xbf16>, vector<512x128xf32> -> vector<512x128xf32>
    %c0_27 = arith.constant 0 : index
    %c0_28 = arith.constant 0 : index
    %34 = vector.load %arg13[%c0_27, %c0_28] : memref<1x128xf32, #tpu.memory_space<vmem>>, vector<1x128xf32>
    %35 = vector.broadcast %34 : vector<1x128xf32> to vector<512x128xf32>
    %36 = arith.addf %33, %35 : vector<512x128xf32>
    %37 = tpu.iota {dimensions = array<i32: 0>} : vector<64x512xi32>
    %38 = vector.broadcast %5 : vector<1x512xi32> to vector<64x512xi32>
    %39 = arith.cmpi eq, %37, %38 : vector<64x512xi32>
    %40 = arith.extui %39 : vector<64x512xi1> to vector<64x512xi32>
    %41 = arith.sitofp %40 : vector<64x512xi32> to vector<64x512xf32>
    %42 = arith.truncf %41 : vector<64x512xf32> to vector<64x512xbf16>
    %c0_29 = arith.constant 0 : index
    %c0_30 = arith.constant 0 : index
    %43 = vector.load %arg17[%c0_29, %c0_30] : memref<64x128xf32, #tpu.memory_space<vmem>>, vector<64x128xf32>
    %44 = arith.truncf %36 : vector<512x128xf32> to vector<512x128xbf16>
    %cst_31 = arith.constant dense<0.000000e+00> : vector<64x128xf32>
    %45 = tpu.matmul %42, %44, %cst_31 {dimension_numbers = #tpu.dot_dimension_numbers<[1], [0], [0], [1], [0, 0, 1, 1], [], []>} : vector<64x512xbf16>, vector<512x128xbf16>, vector<64x128xf32> -> vector<64x128xf32>
    %46 = arith.addf %43, %45 : vector<64x128xf32>
    %c0_32 = arith.constant 0 : index
    %c0_33 = arith.constant 0 : index
    %47 = vector.load %arg17[%c0_32, %c0_33] : memref<64x128xf32, #tpu.memory_space<vmem>>, vector<64x128xf32>
    tpu.vector_store %arg17[%c0_32, %c0_33], %46 {strides = array<i32>} : memref<64x128xf32, #tpu.memory_space<vmem>>, vector<64x128xf32>,
    %c1_i32 = arith.constant 1 : i32
    %48 = arith.cmpi eq, %arg0, %c1_i32 : i32
    %49 = arith.extui %48 : i1 to i32
    %c0_i32_34 = arith.constant 0 : i32
    %50 = arith.cmpi ne, %49, %c0_i32_34 : i32
    scf.if %50 {
      %c0_35 = arith.constant 0 : index
      %c0_36 = arith.constant 0 : index
      %51 = vector.load %arg17[%c0_35, %c0_36] : memref<64x128xf32, #tpu.memory_space<vmem>>, vector<64x128xf32>
      %52 = vector.extract_strided_slice %51 {offsets = [0, 8], sizes = [64, 1], strides = [1, 1]} : vector<64x128xf32> to vector<64x1xf32>
      %cst_37 = arith.constant 1.000000e+00 : f32
      %53 = vector.broadcast %cst_37 : f32 to vector<64x1xf32>
      %54 = arith.maximumf %52, %53 : vector<64x1xf32>
      %55 = tpu.reciprocal %54 {approx = true} : vector<64x1xf32> -> vector<64x1xf32>
      %56 = vector.broadcast %55 : vector<64x1xf32> to vector<64x128xf32>
      %57 = arith.mulf %51, %56 : vector<64x128xf32>
      %c0_38 = arith.constant 0 : index
      %c0_39 = arith.constant 0 : index
      %58 = vector.load %arg6[%c0_38, %c0_39] : memref<64x4xf32, #tpu.memory_space<vmem>>, vector<64x4xf32>
      %c0_40 = arith.constant 0 : index
      %c0_41 = arith.constant 0 : index
      %59 = vector.load %arg14[%c0_40, %c0_41] : memref<4x128xf32, #tpu.memory_space<vmem>>, vector<4x128xf32>
      %cst_42 = arith.constant dense<0.000000e+00> : vector<64x128xf32>
      %60 = tpu.matmul %58, %59, %cst_42 {dimension_numbers = #tpu.dot_dimension_numbers<[1], [0], [0], [1], [0, 0, 1, 1], [], []>} : vector<64x4xf32>, vector<4x128xf32>, vector<64x128xf32> -> vector<64x128xf32>
      %61 = arith.addf %57, %60 : vector<64x128xf32>
      %62 = tpu.iota {dimensions = array<i32: 0>} : vector<64x128xi32>
      %c64_i32 = arith.constant 64 : i32
      %63 = vector.broadcast %c64_i32 : i32 to vector<64x128xi32>
      %64 = arith.cmpi slt, %62, %63 : vector<64x128xi32>
      %65 = arith.extui %64 : vector<64x128xi1> to vector<64x128xi32>
      %66 = arith.sitofp %65 : vector<64x128xi32> to vector<64x128xf32>
      %67 = arith.mulf %61, %66 : vector<64x128xf32>
      %cst_43 = arith.constant dense<0.000000e+00> : vector<128xf32>
      %68 = vector.multi_reduction <add>, %67, %cst_43 [0] : vector<64x128xf32> to vector<128xf32>
      %69 = vector.shape_cast %68 : vector<128xf32> to vector<1x128xf32>
      %cst_44 = arith.constant 1.562500e-02 : f32
      %70 = vector.broadcast %cst_44 : f32 to vector<1x128xf32>
      %71 = arith.mulf %69, %70 : vector<1x128xf32>
      %72 = vector.broadcast %71 : vector<1x128xf32> to vector<64x128xf32>
      %73 = arith.subf %61, %72 : vector<64x128xf32>
      %74 = arith.mulf %73, %73 : vector<64x128xf32>
      %75 = arith.mulf %74, %66 : vector<64x128xf32>
      %cst_45 = arith.constant dense<0.000000e+00> : vector<128xf32>
      %76 = vector.multi_reduction <add>, %75, %cst_45 [0] : vector<64x128xf32> to vector<128xf32>
      %77 = vector.shape_cast %76 : vector<128xf32> to vector<1x128xf32>
      %cst_46 = arith.constant 1.562500e-02 : f32
      %78 = vector.broadcast %cst_46 : f32 to vector<1x128xf32>
      %79 = arith.mulf %77, %78 : vector<1x128xf32>
      %cst_47 = arith.constant 9.99999974E-6 : f32
      %80 = vector.broadcast %cst_47 : f32 to vector<1x128xf32>
      %81 = arith.addf %79, %80 : vector<1x128xf32>
      %82 = math.rsqrt %81 : vector<1x128xf32>
      %83 = vector.broadcast %82 : vector<1x128xf32> to vector<64x128xf32>
      %84 = arith.mulf %73, %83 : vector<64x128xf32>
      %c0_48 = arith.constant 0 : index
      %c0_49 = arith.constant 0 : index
      %85 = vector.load %arg15[%c0_48, %c0_49] : memref<1x128xf32, #tpu.memory_space<vmem>>, vector<1x128xf32>
      %86 = vector.broadcast %85 : vector<1x128xf32> to vector<64x128xf32>
      %87 = arith.mulf %84, %86 : vector<64x128xf32>
      %c0_50 = arith.constant 0 : index
      %c0_51 = arith.constant 0 : index
      %88 = vector.load %arg16[%c0_50, %c0_51] : memref<1x128xf32, #tpu.memory_space<vmem>>, vector<1x128xf32>
      %89 = vector.broadcast %88 : vector<1x128xf32> to vector<64x128xf32>
      %90 = arith.addf %87, %89 : vector<64x128xf32>
      %c0_52 = arith.constant 0 : index
      %c0_53 = arith.constant 0 : index
      %91 = vector.load %arg17[%c0_52, %c0_53] : memref<64x128xf32, #tpu.memory_space<vmem>>, vector<64x128xf32>
      tpu.vector_store %arg17[%c0_52, %c0_53], %90 {strides = array<i32>} : memref<64x128xf32, #tpu.memory_space<vmem>>, vector<64x128xf32>,
    } else {
    }
    return
  }
  func.func @transform_0(%arg0: i32) -> (i32, i32) {
    %c0_i32 = arith.constant 0 : i32
    %c0_i32_0 = arith.constant 0 : i32
    return %arg0, %c0_i32 : i32, i32
  }
  func.func @transform_1(%arg0: i32) -> (i32, i32) {
    %c0_i32 = arith.constant 0 : i32
    %c0_i32_0 = arith.constant 0 : i32
    return %arg0, %c0_i32 : i32, i32
  }
  func.func @transform_2(%arg0: i32) -> (i32, i32) {
    %c0_i32 = arith.constant 0 : i32
    %c0_i32_0 = arith.constant 0 : i32
    return %c0_i32, %arg0 : i32, i32
  }
  func.func @transform_3(%arg0: i32) -> (i32, i32) {
    %c0_i32 = arith.constant 0 : i32
    %c0_i32_0 = arith.constant 0 : i32
    return %arg0, %c0_i32 : i32, i32
  }
  func.func @transform_4(%arg0: i32) -> (i32, i32) {
    %c0_i32 = arith.constant 0 : i32
    %c0_i32_0 = arith.constant 0 : i32
    %c0_i32_1 = arith.constant 0 : i32
    return %c0_i32, %c0_i32_0 : i32, i32
  }
  func.func @transform_5(%arg0: i32) -> (i32, i32) {
    %c0_i32 = arith.constant 0 : i32
    %c0_i32_0 = arith.constant 0 : i32
    %c0_i32_1 = arith.constant 0 : i32
    return %c0_i32, %c0_i32_0 : i32, i32
  }
  func.func @transform_6(%arg0: i32) -> (i32, i32) {
    %c0_i32 = arith.constant 0 : i32
    %c0_i32_0 = arith.constant 0 : i32
    %c0_i32_1 = arith.constant 0 : i32
    return %c0_i32, %c0_i32_0 : i32, i32
  }
  func.func @transform_7(%arg0: i32) -> (i32, i32) {
    %c0_i32 = arith.constant 0 : i32
    %c0_i32_0 = arith.constant 0 : i32
    %c0_i32_1 = arith.constant 0 : i32
    return %c0_i32, %c0_i32_0 : i32, i32
  }
  func.func @transform_8(%arg0: i32) -> (i32, i32) {
    %c0_i32 = arith.constant 0 : i32
    %c0_i32_0 = arith.constant 0 : i32
    %c0_i32_1 = arith.constant 0 : i32
    return %c0_i32, %c0_i32_0 : i32, i32
  }
  func.func @transform_9(%arg0: i32) -> (i32, i32) {
    %c0_i32 = arith.constant 0 : i32
    %c0_i32_0 = arith.constant 0 : i32
    %c0_i32_1 = arith.constant 0 : i32
    return %c0_i32, %c0_i32_0 : i32, i32
  }
  func.func @transform_10(%arg0: i32) -> (i32, i32) {
    %c0_i32 = arith.constant 0 : i32
    %c0_i32_0 = arith.constant 0 : i32
    %c0_i32_1 = arith.constant 0 : i32
    return %c0_i32, %c0_i32_0 : i32, i32
  }
  func.func @transform_11(%arg0: i32) -> (i32, i32) {
    %c0_i32 = arith.constant 0 : i32
    %c0_i32_0 = arith.constant 0 : i32
    %c0_i32_1 = arith.constant 0 : i32
    return %c0_i32, %c0_i32_0 : i32, i32
  }
  func.func @transform_12(%arg0: i32) -> (i32, i32) {
    %c0_i32 = arith.constant 0 : i32
    %c0_i32_0 = arith.constant 0 : i32
    %c0_i32_1 = arith.constant 0 : i32
    return %c0_i32, %c0_i32_0 : i32, i32
  }
  func.func @transform_13(%arg0: i32) -> (i32, i32) {
    %c0_i32 = arith.constant 0 : i32
    %c0_i32_0 = arith.constant 0 : i32
    %c0_i32_1 = arith.constant 0 : i32
    return %c0_i32, %c0_i32_0 : i32, i32
  }
  func.func @transform_14(%arg0: i32) -> (i32, i32) {
    %c0_i32 = arith.constant 0 : i32
    %c0_i32_0 = arith.constant 0 : i32
    %c0_i32_1 = arith.constant 0 : i32
    return %c0_i32, %c0_i32_0 : i32, i32
  }
  func.func @transform_15(%arg0: i32) -> (i32, i32) {
    %c0_i32 = arith.constant 0 : i32
    %c0_i32_0 = arith.constant 0 : i32
    %c0_i32_1 = arith.constant 0 : i32
    return %c0_i32, %c0_i32_0 : i32, i32
  }
  func.func @transform_16(%arg0: i32) -> (i32, i32) {
    %c0_i32 = arith.constant 0 : i32
    %c0_i32_0 = arith.constant 0 : i32
    %c0_i32_1 = arith.constant 0 : i32
    return %c0_i32, %c0_i32_0 : i32, i32
  }
}

</mosaic_0001>

<bundles_post_ra>
// kernel: tpu_custom_call.1
= control target key start
LH: loop header
LB: loop body
LE: loop exit
PB: predicated region body
PF: predicated region fallthrough
CT: control target
= control target key end

     0   :  { %s7695_s0 = inlined_call_operand.vmem [shape: f32[1024,16], index: 0, kind: input, shape index: {}]   ;;  %s7696_s1 = inlined_call_operand.vmem [shape: f32[1024,4], index: 1, kind: input, shape index: {}]   ;;  %s7697_s2 = inlined_call_operand.vmem [shape: s32[1,1024], index: 2, kind: input, shape index: {}]   ;;  %s7698_s3 = inlined_call_operand.vmem [shape: s32[1024,1], index: 3, kind: input, shape index: {}]   ;;  %s7699_s4 = inlined_call_operand.vmem [shape: bf16[64,128], index: 4, kind: input, shape index: {}]   ;;  %s7700_s5 = inlined_call_operand.vmem [shape: f32[64,4], index: 5, kind: input, shape index: {}]   ;;  %s7701_s6 = inlined_call_operand.vmem [shape: f32[16,16], index: 6, kind: input, shape index: {}]   ;;  %s7702_s7 = inlined_call_operand.vmem [shape: f32[1,16], index: 7, kind: input, shape index: {}]   ;;  %s7703_s8 = inlined_call_operand.vmem [shape: f32[16,128], index: 8, kind: input, shape index: {}]   ;;  %s7704_s9 = inlined_call_operand.vmem [shape: f32[1,128], index: 9, kind: input, shape index: {}]   ;;  %s7705_s10 = inlined_call_operand.vmem [shape: f32[4,128], index: 10, kind: input, shape index: {}]   ;;  %s7706_s11 = inlined_call_operand.vmem [shape: bf16[128,128], index: 11, kind: input, shape index: {}]   ;;  %s7707_s12 = inlined_call_operand.vmem [shape: f32[1,128], index: 12, kind: input, shape index: {}]   ;;  %s7708_s13 = inlined_call_operand.vmem [shape: f32[4,128], index: 13, kind: input, shape index: {}]   ;;  %s7709_s14 = inlined_call_operand.vmem [shape: f32[1,128], index: 14, kind: input, shape index: {}]   ;;  %s7710_s15 = inlined_call_operand.vmem [shape: f32[1,128], index: 15, kind: input, shape index: {}]   ;;  %s7711_s16 = inlined_call_operand.hbm [shape: f32[64,128], index: 16, kind: output, shape index: {}]  }
   0x1   :  { %7717 = sst [smem:[#allocation85_spill]] %s7695_s0 }
   0x2   :  { %7718 = sst [smem:[#allocation86_spill]] %s7710_s15 }
   0x3   :  { %7719 = sst [smem:[#allocation87_spill]] %s7711_s16 }
   0x4   :  { %21 = vsyncpa [#allocation3], 0  ;;  %s6137_s21 = smov 0  }
   0x5 LB: > { %7720 = sst [smem:[#allocation5_spill]] %s6042_s21  ;;  %s6143_s22 = sadd.s32 4294967295, %s6042_s21   ;;  %s6042_s21 = sphi %s6137_s21, %s27_s21  }
   0x6   : > { %p4719_p0 = scmp.ge.s32.totalorder %s6042_s21, 1  ;;  %p491_p1 = scmp.lt.s32.totalorder %s6042_s21, 3 }
   0x8   : > { %p492_p2 = pnand %p4719_p0, %p491_p1 }
   0xa   : > { %495 = sbr.rel (%p492_p2) target bundleno = 1515 (0x5eb), region = 84 }
  0x11   : > { %s4720_s23 = sshll.u32 %s6143_s22, 6  ;;  %s4724_s24 = sshll.u32 %s6143_s22, 2 }
  0x12   : > { %p551_p3 = scmp.lt.s32.totalorder %s4720_s23, 127  ;;  %p563_p4 = scmp.lt.s32.totalorder %s4724_s24, 7 }
  0x13   : > { %s7721_s28 = sld [smem:[#allocation85_spill]]  ;;  %p4727_p5 = scmp.ne.s32.totalorder %s6143_s22, 0 }
  0x14   : > { %s7930_s23 = smov (!%p551_p3, %s4720_s23), 127  ;;  %s7932_s24 = smov (!%p563_p4, %s4724_s24), 7 }
  0x15   : > { %s4721_s25 = sshll.u32 %s7930_s23, 3  ;;  %s565_s20 = scalar_lea.vmem %s7697_s2, %s7932_s24  ;;  %v6044_v0 = vmov (!%p4727_p5), 0.0  }
  0x16   : > { %s6159_s17 = scalar_lea.vmem %s7696_s1, %s4721_s25  ;;  %s6168_s15 = scalar_lea.vmem %s7698_s3, %s4721_s25  ;;  %578 = vst [vmem:[#allocation2] sm:$0xff] (!%p4727_p5), %v6044_v0  ;;  %579 = vst [vmem:[#allocation2 + $0x8] sm:$0xff] (!%p4727_p5), %v6044_v0 }
  0x17   : > { %577 = sbr.rel (%p4727_p5) target bundleno = 30 (0x1e), region = 88  ;;  %580 = vst [vmem:[#allocation2 + $0x10] sm:$0xff] (!%p4727_p5), %v6044_v0  ;;  %581 = vst [vmem:[#allocation2 + $0x18] sm:$0xff] (!%p4727_p5), %v6044_v0 }
  0x18   : > { %582 = vst [vmem:[#allocation2 + $0x20] sm:$0xff] (!%p4727_p5), %v6044_v0  ;;  %583 = vst [vmem:[#allocation2 + $0x28] sm:$0xff] (!%p4727_p5), %v6044_v0 }
  0x19   : > { %s6154_s29 = scalar_lea.vmem %s7721_s28, %s4721_s25  ;;  %584 = vst [vmem:[#allocation2 + $0x30] sm:$0xff] (!%p4727_p5), %v6044_v0  ;;  %585 = vst [vmem:[#allocation2 + $0x38] sm:$0xff] (!%p4727_p5), %v6044_v0 }
  0x1e PF: > { %v779_v1 = vld [vmem:[%s7701_s6] sm:$0xff]  ;;  %v780_v2 = vld [vmem:[%s7701_s6 + $0x8] sm:$0xff]  ;;  %vm788_vm0 = vcmask 130048   ;;  %v6045_v5 = vmov 0   ;;  %v588_v7 = vld [vmem:[%s6154_s29 + $0x10] sm:$0xff]  ;;  %vm2466_vm5 = vcmask 523264  }
  0x1f   : > { %v586_v3 = vld [vmem:[%s6154_s29] sm:$0xff]  ;;  %v5938_v4 = vpack.c.bf16 %v780_v2, %v779_v1  ;;  %5972 = vset.pattern.permute.xlu0 %v6045_v5  ;;  %5973 = vset.pattern.permute.xlu1 %v6045_v5  ;;  %v587_v6 = vld [vmem:[%s6154_s29 + $0x8] sm:$0xff]  ;;  %v589_v8 = vld [vmem:[%s6154_s29 + $0x18] sm:$0xff]  ;;  %vm7716_vm12 = vcmask 1043456   ;;  %p5096_p6 = scmp.ne.s32.totalorder %s6143_s22, 1 }
  0x20   : > { %5478 = vmatprep.mubr.msk.f32.mxu0 %vm788_vm0, %v586_v3  ;;  %v590_v9 = vld [vmem:[%s6154_s29 + $0x20] sm:$0xff]  ;;  %v591_v10 = vld [vmem:[%s6154_s29 + $0x28] sm:$0xff]  ;;  %v592_v11 = vld [vmem:[%s6154_s29 + $0x30] sm:$0xff]  ;;  %s7926_s28 = sld [smem:[#allocation86_spill]] (!%p5096_p6) }
  0x21   : > { %5939 = vmatprep.subr.bf16.mxu0 %v5938_v4  ;;  %5946 = vmatprep.subr.bf16.mxu1 %v5938_v4  ;;  %v715_v12 = vld [vmem:[%s6168_s15] sm:$0xff]  ;;  %v717_v13 = vld [vmem:[%s6168_s15 + $0x10] sm:$0xff]  ;;  %v593_v14 = vld [vmem:[%s6154_s29 + $0x38] sm:$0xff] }
  0x22   : > { %5941 = vmatpush3.bf16.msra.mxu0 %v5938_v4  ;;  %5947 = vmatpush3.bf16.msra.mxu1 %v5938_v4  ;;  %v716_v15 = vld [vmem:[%s6168_s15 + $0x8] sm:$0xff]  ;;  %v594_v16 = vld [vmem:[%s6154_s29 + $0x40] sm:$0xff]  ;;  %v718_v17 = vld [vmem:[%s6168_s15 + $0x18] sm:$0xff] }
  0x23   : > { %2019 = vperm.xlu0 %5972, %v715_v12   ;;  %2025 = vperm.xlu1 %5973, %v717_v13   ;;  %v634_v18 = vld [vmem:[%s6154_s29 + $0x180] sm:$0xff]  ;;  %v635_v19 = vld [vmem:[%s6154_s29 + $0x188] sm:$0xff]  ;;  %v596_v22 = vld [vmem:[%s6154_s29 + $0x50] sm:$0xff] }
  0x24   : > { %v595_v20 = vld [vmem:[%s6154_s29 + $0x48] sm:$0xff]  ;;  %v719_v21 = vld [vmem:[%s6168_s15 + $0x20] sm:$0xff]  ;;  %5550 = vmatprep.mubr.msk.f32.mxu1 %vm788_vm0, %v634_v18  ;;  %v636_v24 = vld [vmem:[%s6154_s29 + $0x190] sm:$0xff] }
  0x25   : > { %5479 = vmatmul.mubr.msk.f32.vlgmr.msra.gmra.mrb[0].mxu0 %vm788_vm0, %v587_v6  ;;  %v720_v23 = vld [vmem:[%s6168_s15 + $0x28] sm:$0xff]  ;;  %5551 = vmatmul.mubr.msk.f32.vlgmr.msra.gmra.mrb[0].mxu1 %vm788_vm0, %v635_v19  ;;  %v637_v25 = vld [vmem:[%s6154_s29 + $0x198] sm:$0xff]  ;;  %v721_v27 = vld [vmem:[%s6168_s15 + $0x30] sm:$0xff] }
  0x26   : > { %5481 = vmatprep.mubr.msk.f32.mxu0 %vm788_vm0, %v588_v7  ;;  %v597_v26 = vld [vmem:[%s6154_s29 + $0x58] sm:$0xff]  ;;  %v598_v28 = vld [vmem:[%s6154_s29 + $0x60] sm:$0xff]  ;;  %5553 = vmatprep.mubr.msk.f32.mxu1 %vm788_vm0, %v636_v24  ;;  %v639_v31 = vld [vmem:[%s6154_s29 + $0x1a8] sm:$0xff] }
  0x27   : > { %2022 = vperm.xlu0 %5972, %v716_v15   ;;  %2028 = vperm.xlu1 %5973, %v718_v17   ;;  %v722_v29 = vld [vmem:[%s6168_s15 + $0x38] sm:$0xff]  ;;  %v638_v30 = vld [vmem:[%s6154_s29 + $0x1a0] sm:$0xff]  ;;  %v599_v32 = vld [vmem:[%s6154_s29 + $0x68] sm:$0xff] }
  0x28   : > { %v723_v33 = vld [vmem:[%s6168_s15 + $0x40] sm:$0xff]  ;;  %v600_v34 = vld [vmem:[%s6154_s29 + $0x70] sm:$0xff]  ;;  %v724_v35 = vld [vmem:[%s6168_s15 + $0x48] sm:$0xff] }
  0x29   : > { %5482 = vmatmul.mubr.msk.f32.gmra.mrb[2].mxu0 %vm788_vm0, %v589_v8  ;;  %5554 = vmatmul.mubr.msk.f32.gmra.mrb[2].mxu1 %vm788_vm0, %v637_v25  ;;  %v640_v36 = vld [vmem:[%s6154_s29 + $0x1b0] sm:$0xff]  ;;  %v641_v37 = vld [vmem:[%s6154_s29 + $0x1b8] sm:$0xff]  ;;  %v602_v40 = vld [vmem:[%s6154_s29 + $0x80] sm:$0xff] }
  0x2a   : > { %5484 = vmatprep.mubr.msk.f32.mxu0 %vm788_vm0, %v590_v9  ;;  %5556 = vmatprep.mubr.msk.f32.mxu1 %vm788_vm0, %v638_v30  ;;  %v601_v38 = vld [vmem:[%s6154_s29 + $0x78] sm:$0xff]  ;;  %v725_v39 = vld [vmem:[%s6168_s15 + $0x50] sm:$0xff]  ;;  %v642_v42 = vld [vmem:[%s6154_s29 + $0x1c0] sm:$0xff] }
  0x2b   : > { %2031 = vperm.xlu0 %5972, %v719_v21   ;;  %2034 = vperm.xlu1 %5973, %v720_v23   ;;  %v726_v41 = vld [vmem:[%s6168_s15 + $0x58] sm:$0xff]  ;;  %v643_v43 = vld [vmem:[%s6154_s29 + $0x1c8] sm:$0xff]  ;;  %v727_v45 = vld [vmem:[%s6168_s15 + $0x60] sm:$0xff] }
  0x2c   : > { %v603_v44 = vld [vmem:[%s6154_s29 + $0x88] sm:$0xff]  ;;  %v604_v46 = vld [vmem:[%s6154_s29 + $0x90] sm:$0xff]  ;;  %v645_v49 = vld [vmem:[%s6154_s29 + $0x1d8] sm:$0xff] }
  0x2d   : > { %5485 = vmatmul.mubr.msk.f32.gmra.mrb[4].mxu0 %vm788_vm0, %v591_v10  ;;  %5557 = vmatmul.mubr.msk.f32.gmra.mrb[4].mxu1 %vm788_vm0, %v639_v31  ;;  %v728_v47 = vld [vmem:[%s6168_s15 + $0x68] sm:$0xff]  ;;  %v644_v48 = vld [vmem:[%s6154_s29 + $0x1d0] sm:$0xff]  ;;  %v605_v50 = vld [vmem:[%s6154_s29 + $0x98] sm:$0xff] }
  0x2e   : > { %5487 = vmatprep.mubr.msk.f32.mxu0 %vm788_vm0, %v592_v11  ;;  %5559 = vmatprep.mubr.msk.f32.mxu1 %vm788_vm0, %v640_v36  ;;  %v729_v51 = vld [vmem:[%s6168_s15 + $0x70] sm:$0xff]  ;;  %v606_v52 = vld [vmem:[%s6154_s29 + $0xa0] sm:$0xff]  ;;  %v730_v53 = vld [vmem:[%s6168_s15 + $0x78] sm:$0xff] }
  0x2f   : > { %2037 = vperm.xlu0 %5972, %v721_v27   ;;  %2040 = vperm.xlu1 %5973, %v722_v29   ;;  %v646_v54 = vld [vmem:[%s6154_s29 + $0x1e0] sm:$0xff]  ;;  %v607_v55 = vld [vmem:[%s6154_s29 + $0xa8] sm:$0xff]  ;;  %v608_v57 = vld [vmem:[%s6154_s29 + $0xb0] sm:$0xff] }
  0x30   : > { %v5974_v56 = vld [vmem:[%s7699_s4] sm:$0xff]   ;;  %v732_v58 = vld [vmem:[%s6168_s15 + $0x88] sm:$0xff]  ;;  %v648_v61 = vld [vmem:[%s6154_s29 + $0x1f0] sm:$0xff] }
  0x31   : > { %5488 = vmatmul.mubr.msk.f32.gmra.mrb[6].mxu0 %vm788_vm0, %v593_v14  ;;  %5560 = vmatmul.mubr.msk.f32.gmra.mrb[6].mxu1 %vm788_vm0, %v641_v37  ;;  %v731_v59 = vld [vmem:[%s6168_s15 + $0x80] sm:$0xff]  ;;  %v647_v60 = vld [vmem:[%s6154_s29 + $0x1e8] sm:$0xff]  ;;  %v649_v62 = vld [vmem:[%s6154_s29 + $0x1f8] sm:$0xff] }
  0x32   : > { %5490 = vmatprep.mubr.msk.f32.mxu0 %vm788_vm0, %v594_v16  ;;  %5562 = vmatprep.mubr.msk.f32.mxu1 %vm788_vm0, %v642_v42  ;;  %v5975_v63 = vld [vmem:[%s7699_s4 + $0x8] sm:$0xff]   ;;  %v609_v0 = vld [vmem:[%s6154_s29 + $0xb8] sm:$0xff]  ;;  %v733_v1 = vld [vmem:[%s6168_s15 + $0x90] sm:$0xff] }
  0x33   : > { %2043 = vperm.xlu0 %5972, %v723_v33   ;;  %2046 = vperm.xlu1 %5973, %v724_v35   ;;  %v610_v2 = vld [vmem:[%s6154_s29 + $0xc0] sm:$0xff]  ;;  %v734_v3 = vld [vmem:[%s6168_s15 + $0x98] sm:$0xff]  ;;  %v611_v4 = vld [vmem:[%s6154_s29 + $0xc8] sm:$0xff] }
  0x34   : > { %5674 = vmatprep.subr.bf16.mxu0 %v5974_v56  ;;  %v735_v5 = vld [vmem:[%s6168_s15 + $0xa0] sm:$0xff]  ;;  %v612_v6 = vld [vmem:[%s6154_s29 + $0xd0] sm:$0xff]  ;;  %v736_v7 = vld [vmem:[%s6168_s15 + $0xa8] sm:$0xff] }
  0x35   : > { %5491 = vmatmul.mubr.msk.f32.gmra.mrb[8].mxu0 %vm788_vm0, %v595_v20  ;;  %5563 = vmatmul.mubr.msk.f32.gmra.mrb[8].mxu1 %vm788_vm0, %v643_v43  ;;  %v613_v8 = vld [vmem:[%s6154_s29 + $0xd8] sm:$0xff]  ;;  %v737_v9 = vld [vmem:[%s6168_s15 + $0xb0] sm:$0xff]  ;;  %v614_v10 = vld [vmem:[%s6154_s29 + $0xe0] sm:$0xff] }
  0x36   : > { %5493 = vmatprep.mubr.msk.f32.mxu0 %vm788_vm0, %v596_v22  ;;  %5565 = vmatprep.mubr.msk.f32.mxu1 %vm788_vm0, %v644_v48  ;;  %v738_v11 = vld [vmem:[%s6168_s15 + $0xb8] sm:$0xff]  ;;  %v615_v12 = vld [vmem:[%s6154_s29 + $0xe8] sm:$0xff]  ;;  %v739_v13 = vld [vmem:[%s6168_s15 + $0xc0] sm:$0xff] }
  0x37   : > { %2049 = vperm.xlu0 %5972, %v725_v39   ;;  %2052 = vperm.xlu1 %5973, %v726_v41   ;;  %v616_v14 = vld [vmem:[%s6154_s29 + $0xf0] sm:$0xff]  ;;  %v740_v15 = vld [vmem:[%s6168_s15 + $0xc8] sm:$0xff]  ;;  %v617_v16 = vld [vmem:[%s6154_s29 + $0xf8] sm:$0xff] }
  0x38   : > { %5675 = vmatpush3.bf16.msra.mxu0 %v5974_v56  ;;  %v741_v17 = vld [vmem:[%s6168_s15 + $0xd0] sm:$0xff]  ;;  %v618_v18 = vld [vmem:[%s6154_s29 + $0x100] sm:$0xff]  ;;  %v742_v19 = vld [vmem:[%s6168_s15 + $0xd8] sm:$0xff] }
  0x39   : > { %5494 = vmatmul.mubr.msk.f32.gmra.mrb[10].mxu0 %vm788_vm0, %v597_v26  ;;  %5566 = vmatmul.mubr.msk.f32.gmra.mrb[10].mxu1 %vm788_vm0, %v645_v49  ;;  %v619_v20 = vld [vmem:[%s6154_s29 + $0x108] sm:$0xff]  ;;  %v743_v21 = vld [vmem:[%s6168_s15 + $0xe0] sm:$0xff]  ;;  %v620_v22 = vld [vmem:[%s6154_s29 + $0x110] sm:$0xff] }
  0x3a   : > { %5496 = vmatprep.mubr.msk.f32.mxu0 %vm788_vm0, %v598_v28  ;;  %5568 = vmatprep.mubr.msk.f32.mxu1 %vm788_vm0, %v646_v54  ;;  %v744_v23 = vld [vmem:[%s6168_s15 + $0xe8] sm:$0xff]  ;;  %v621_v24 = vld [vmem:[%s6154_s29 + $0x118] sm:$0xff]  ;;  %v745_v25 = vld [vmem:[%s6168_s15 + $0xf0] sm:$0xff] }
  0x3b   : > { %2055 = vperm.xlu0 %5972, %v727_v45   ;;  %2058 = vperm.xlu1 %5973, %v728_v47   ;;  %v622_v26 = vld [vmem:[%s6154_s29 + $0x120] sm:$0xff]  ;;  %v746_v27 = vld [vmem:[%s6168_s15 + $0xf8] sm:$0xff]  ;;  %v623_v28 = vld [vmem:[%s6154_s29 + $0x128] sm:$0xff] }
  0x3c   : > { %5676 = vmatprep.subr.bf16.mxu0 %v5975_v63  ;;  %v747_v29 = vld [vmem:[%s6168_s15 + $0x100] sm:$0xff]  ;;  %v624_v30 = vld [vmem:[%s6154_s29 + $0x130] sm:$0xff]  ;;  %v748_v31 = vld [vmem:[%s6168_s15 + $0x108] sm:$0xff] }
  0x3d   : > { %5497 = vmatmul.mubr.msk.f32.gmra.mrb[12].mxu0 %vm788_vm0, %v599_v32  ;;  %5569 = vmatmul.mubr.msk.f32.gmra.mrb[12].mxu1 %vm788_vm0, %v647_v60  ;;  %v625_v32 = vld [vmem:[%s6154_s29 + $0x138] sm:$0xff]  ;;  %v749_v33 = vld [vmem:[%s6168_s15 + $0x110] sm:$0xff]  ;;  %v627_v36 = vld [vmem:[%s6154_s29 + $0x148] sm:$0xff] }
  0x3e   : > { %5499 = vmatprep.mubr.msk.f32.mxu0 %vm788_vm0, %v600_v34  ;;  %5571 = vmatprep.mubr.msk.f32.mxu1 %vm788_vm0, %v648_v61  ;;  %v626_v34 = vld [vmem:[%s6154_s29 + $0x140] sm:$0xff]  ;;  %v750_v35 = vld [vmem:[%s6168_s15 + $0x118] sm:$0xff]  ;;  %v752_v39 = vld [vmem:[%s6168_s15 + $0x128] sm:$0xff] }
  0x3f   : > { %2061 = vperm.xlu0 %5972, %v729_v51   ;;  %2064 = vperm.xlu1 %5973, %v730_v53   ;;  %v751_v37 = vld [vmem:[%s6168_s15 + $0x120] sm:$0xff]  ;;  %v753_v41 = vld [vmem:[%s6168_s15 + $0x130] sm:$0xff]  ;;  %v631_v48 = vld [vmem:[%s6154_s29 + $0x168] sm:$0xff] }
  0x40   : > { %5677 = vmatpush3.bf16.msra.mxu0 %v5975_v63  ;;  %v5976_v42 = vld [vmem:[%s7699_s4 + $0x10] sm:$0xff]   ;;  %v630_v43 = vld [vmem:[%s6154_s29 + $0x160] sm:$0xff]  ;;  %v633_v53 = vld [vmem:[%s6154_s29 + $0x178] sm:$0xff] }
  0x41   : > { %5500 = vmatmul.mubr.msk.f32.gmra.mrb[14].mxu0 %vm788_vm0, %v601_v38  ;;  %5572 = vmatmul.mubr.msk.f32.gmra.mrb[14].mxu1 %vm788_vm0, %v649_v62  ;;  %v628_v38 = vld [vmem:[%s6154_s29 + $0x150] sm:$0xff]  ;;  %v1430_v45 = vld [vmem:[%s7703_s8] sm:$0xff]  ;;  %v764_v61 = vld [vmem:[%s6168_s15 + $0x188] sm:$0xff] }
  0x42   : > { %5502 = vmatprep.mubr.msk.f32.mxu0 %vm788_vm0, %v602_v40  ;;  %v629_v40 = vld [vmem:[%s6154_s29 + $0x158] sm:$0xff]  ;;  %5678 = vmatprep.subr.bf16.mxu0 %v5976_v42  ;;  %v755_v49 = vld [vmem:[%s6168_s15 + $0x140] sm:$0xff]  ;;  %v632_v51 = vld [vmem:[%s6154_s29 + $0x170] sm:$0xff] }
  0x43   : > { %2067 = vperm.xlu0 %5972, %v731_v59   ;;  %2070 = vperm.xlu1 %5973, %v732_v58   ;;  %v757_v54 = vld [vmem:[%s6168_s15 + $0x150] sm:$0xff]  ;;  %v759_v56 = vld [vmem:[%s6168_s15 + $0x160] sm:$0xff]  ;;  %v762_v59 = vld [vmem:[%s6168_s15 + $0x178] sm:$0xff] }
  0x44   : > { %5679 = vmatpush3.bf16.msra.mxu0 %v5976_v42  ;;  %v761_v58 = vld [vmem:[%s6168_s15 + $0x170] sm:$0xff]  ;;  %v763_v60 = vld [vmem:[%s6168_s15 + $0x180] sm:$0xff]  ;;  %v766_v63 = vld [vmem:[%s6168_s15 + $0x198] sm:$0xff] }
  0x45   : > { %5503 = vmatmul.mubr.msk.f32.gmra.mrb[16].mxu0 %vm788_vm0, %v603_v44  ;;  %v754_v44 = vld [vmem:[%s6168_s15 + $0x138] sm:$0xff]  ;;  %v765_v62 = vld [vmem:[%s6168_s15 + $0x190] sm:$0xff] }
  0x46   : > { %5505 = vmatprep.mubr.msk.f32.mxu0 %vm788_vm0, %v604_v46  ;;  %v1431_v46 = vld [vmem:[%s7703_s8 + $0x8] sm:$0xff] }
  0x47   : > { %2073 = vperm.xlu0 %5972, %v733_v1   ;;  %2076 = vperm.xlu1 %5973, %v734_v3   ;;  %v5942_v47 = vpack.c.bf16 %v1431_v46, %v1430_v45  ;;  %v768_v1 = vld [vmem:[%s6168_s15 + $0x1a8] sm:$0xff]  ;;  %v770_v3 = vld [vmem:[%s6168_s15 + $0x1b8] sm:$0xff] }
  0x49   : > { %5506 = vmatmul.mubr.msk.f32.gmra.mrb[18].mxu0 %vm788_vm0, %v605_v50  ;;  %v5977_v50 = vld [vmem:[%s7699_s4 + $0x18] sm:$0xff]   ;;  %5943 = vmatprep.subr.bf16.mxu1 %v5942_v47 }
  0x4a   : > { %5508 = vmatprep.mubr.msk.f32.mxu0 %vm788_vm0, %v606_v52  ;;  %v756_v52 = vld [vmem:[%s6168_s15 + $0x148] sm:$0xff]  ;;  %5945 = vmatpush3.bf16.msra.mxu1 %v5942_v47 }
  0x4b   : > { %2079 = vperm.xlu0 %5972, %v735_v5   ;;  %2082 = vperm.xlu1 %5973, %v736_v7   ;;  %v772_v5 = vld [vmem:[%s6168_s15 + $0x1c8] sm:$0xff]  ;;  %v774_v7 = vld [vmem:[%s6168_s15 + $0x1d8] sm:$0xff] }
  0x4c   : > { %5680 = vmatprep.subr.bf16.mxu0 %v5977_v50 }
  0x4d   : > { %5509 = vmatmul.mubr.msk.f32.gmra.mrb[20].mxu0 %vm788_vm0, %v607_v55  ;;  %v758_v55 = vld [vmem:[%s6168_s15 + $0x158] sm:$0xff] }
  0x4e   : > { %5511 = vmatprep.mubr.msk.f32.mxu0 %vm788_vm0, %v608_v57  ;;  %5681 = vmatpush3.bf16.msra.mxu0 %v5977_v50  ;;  %v760_v57 = vld [vmem:[%s6168_s15 + $0x168] sm:$0xff] }
  0x4f   : > { %2085 = vperm.xlu0 %5972, %v737_v9   ;;  %2088 = vperm.xlu1 %5973, %v738_v11   ;;  %v776_v9 = vld [vmem:[%s6168_s15 + $0x1e8] sm:$0xff]  ;;  %v777_v11 = vld [vmem:[%s6168_s15 + $0x1f0] sm:$0xff] }
  0x51   : > { %5512 = vmatmul.mubr.msk.f32.gmra.mrb[22].mxu0 %vm788_vm0, %v609_v0  ;;  %v767_v0 = vld [vmem:[%s6168_s15 + $0x1a0] sm:$0xff] }
  0x52   : > { %5514 = vmatprep.mubr.msk.f32.mxu0 %vm788_vm0, %v610_v2  ;;  %v769_v2 = vld [vmem:[%s6168_s15 + $0x1b0] sm:$0xff] }
  0x53   : > { %2091 = vperm.xlu0 %5972, %v739_v13   ;;  %2094 = vperm.xlu1 %5973, %v740_v15  }
  0x55   : > { %5515 = vmatmul.mubr.msk.f32.gmra.mrb[24].mxu0 %vm788_vm0, %v611_v4  ;;  %v771_v4 = vld [vmem:[%s6168_s15 + $0x1c0] sm:$0xff] }
  0x56   : > { %5517 = vmatprep.mubr.msk.f32.mxu0 %vm788_vm0, %v612_v6  ;;  %v773_v6 = vld [vmem:[%s6168_s15 + $0x1d0] sm:$0xff] }
  0x57   : > { %2097 = vperm.xlu0 %5972, %v741_v17   ;;  %2100 = vperm.xlu1 %5973, %v742_v19  }
  0x59   : > { %5518 = vmatmul.mubr.msk.f32.gmra.mrb[26].mxu0 %vm788_vm0, %v613_v8  ;;  %v775_v8 = vld [vmem:[%s6168_s15 + $0x1e0] sm:$0xff] }
  0x5a   : > { %5520 = vmatprep.mubr.msk.f32.mxu0 %vm788_vm0, %v614_v10  ;;  %v7714_v10 = vlaneseq }
  0x5b   : > { %2103 = vperm.xlu0 %5972, %v743_v21   ;;  %2106 = vperm.xlu1 %5973, %v744_v23  }
  0x5c   : > { %v6388_v13 = vand.u32 127, %v7714_v10 }
  0x5d   : > { %5521 = vmatmul.mubr.msk.f32.gmra.mrb[28].mxu0 %vm788_vm0, %v615_v12  ;;  %v778_v12 = vld [vmem:[%s6168_s15 + $0x1f8] sm:$0xff] }
  0x5e   : > { %5523 = vmatprep.mubr.msk.f32.mxu0 %vm788_vm0, %v616_v14 }
  0x5f   : > { %2109 = vperm.xlu0 %5972, %v745_v25   ;;  %2112 = vperm.xlu1 %5973, %v746_v27  }
  0x61   : > { %5524 = vmatmul.mubr.msk.f32.gmra.mrb[30].mxu0 %vm788_vm0, %v617_v16  ;;  %v6046_v16 = vmov 0.0  }
  0x62   : > { %5526 = vmatprep.mubr.msk.f32.mxu0 %vm788_vm0, %v618_v18 }
  0x63   : > { %2115 = vperm.xlu0 %5972, %v747_v29   ;;  %2118 = vperm.xlu1 %5973, %v748_v31  }
  0x65   : > { %5527 = vmatmul.mubr.msk.f32.gmra.mrb[32].mxu0 %vm788_vm0, %v619_v20 }
  0x66   : > { %5529 = vmatprep.mubr.msk.f32.mxu0 %vm788_vm0, %v620_v22 }
  0x67   : > { %2121 = vperm.xlu0 %5972, %v749_v33   ;;  %2124 = vperm.xlu1 %5973, %v750_v35  }
  0x69   : > { %5530 = vmatmul.mubr.msk.f32.gmra.mrb[34].mxu0 %vm788_vm0, %v621_v24 }
  0x6a   : > { %5532 = vmatprep.mubr.msk.f32.mxu0 %vm788_vm0, %v622_v26 }
  0x6b   : > { %2127 = vperm.xlu0 %5972, %v751_v37   ;;  %2130 = vperm.xlu1 %5973, %v752_v39  }
  0x6d   : > { %5533 = vmatmul.mubr.msk.f32.gmra.mrb[36].mxu0 %vm788_vm0, %v623_v28 }
  0x6e   : > { %5535 = vmatprep.mubr.msk.f32.mxu0 %vm788_vm0, %v624_v30 }
  0x6f   : > { %2133 = vperm.xlu0 %5972, %v753_v41   ;;  %2136 = vperm.xlu1 %5973, %v754_v44   ;;  %v6417_v41 = vld [vmem:[%s7705_s10] sm:$0xf] }
  0x70   : > { %5746 = vmatprep.subr.msk.mxu1 %vm7716_vm12, %v6417_v41 }
  0x71   : > { %5536 = vmatmul.mubr.msk.f32.gmra.mrb[38].mxu0 %vm788_vm0, %v625_v32 }
  0x72   : > { %5538 = vmatprep.mubr.msk.f32.mxu0 %vm788_vm0, %v626_v34 }
  0x73   : > { %2139 = vperm.xlu0 %5972, %v755_v49   ;;  %2142 = vperm.xlu1 %5973, %v756_v52  }
  0x75   : > { %5539 = vmatmul.mubr.msk.f32.gmra.mrb[40].mxu0 %vm788_vm0, %v627_v36 }
  0x76   : > { %5541 = vmatprep.mubr.msk.f32.mxu0 %vm788_vm0, %v628_v38 }
  0x77   : > { %2145 = vperm.xlu0 %5972, %v757_v54   ;;  %2148 = vperm.xlu1 %5973, %v758_v55  }
  0x79   : > { %5542 = vmatmul.mubr.msk.f32.gmra.mrb[42].mxu0 %vm788_vm0, %v629_v40 }
  0x7a   : > { %5544 = vmatprep.mubr.msk.f32.mxu0 %vm788_vm0, %v630_v43 }
  0x7b   : > { %2151 = vperm.xlu0 %5972, %v759_v56   ;;  %2154 = vperm.xlu1 %5973, %v760_v57  }
  0x7d   : > { %5545 = vmatmul.mubr.msk.f32.gmra.mrb[44].mxu0 %vm788_vm0, %v631_v48 }
  0x7e   : > { %5547 = vmatprep.mubr.msk.f32.mxu0 %vm788_vm0, %v632_v51 }
  0x7f   : > { %2157 = vperm.xlu0 %5972, %v761_v58   ;;  %2160 = vperm.xlu1 %5973, %v762_v59  }
  0x81   : > { %5548 = vmatmul.mubr.msk.f32.gmra.mrb[46].mxu0 %vm788_vm0, %v633_v53 }
  0x83   : > { %2163 = vperm.xlu0 %5972, %v763_v60   ;;  %2166 = vperm.xlu1 %5973, %v764_v61  }
  0x87   : > { %2169 = vperm.xlu0 %5972, %v765_v62   ;;  %2172 = vperm.xlu1 %5973, %v766_v63  }
  0x8b   : > { %2175 = vperm.xlu0 %5972, %v767_v0   ;;  %2178 = vperm.xlu1 %5973, %v768_v1  }
  0x8f   : > { %2181 = vperm.xlu0 %5972, %v769_v2   ;;  %2184 = vperm.xlu1 %5973, %v770_v3  }
  0x93   : > { %2187 = vperm.xlu0 %5972, %v771_v4   ;;  %2190 = vperm.xlu1 %5973, %v772_v5  }
  0x97   : > { %2193 = vperm.xlu0 %5972, %v773_v6   ;;  %2196 = vperm.xlu1 %5973, %v774_v7  }
  0x9b   : > { %2199 = vperm.xlu0 %5972, %v775_v8   ;;  %2202 = vperm.xlu1 %5973, %v776_v9  }
  0x9f   : > { %2205 = vperm.xlu0 %5972, %v777_v11   ;;  %2208 = vperm.xlu1 %5973, %v778_v12  }
  0xa2   : > { %v2020_v14 = vpop.permute.xlu0 %2019  ;;  %v2026_v15 = vpop.permute.xlu1 %2025 }
  0xa3   : > { %vm2210_vm1 = vcmp.eq.s32.totalorder %v6388_v13, %v2020_v14  ;;  %vm2212_vm2 = vcmp.eq.s32.totalorder %v6388_v13, %v2026_v15 }
  0xa4   : > { %v4858_v17 = vsel %vm2210_vm1, 1.0, %v6046_v16  ;;  %v4860_v19 = vsel %vm2212_vm2, 1.0, %v6046_v16 }
  0xa6   : > { %v2023_v18 = vpop.permute.xlu0 %2022  ;;  %v2029_v20 = vpop.permute.xlu1 %2028 }
  0xa7   : > { %vm2211_vm3 = vcmp.eq.s32.totalorder %v6388_v13, %v2023_v18  ;;  %vm2213_vm4 = vcmp.eq.s32.totalorder %v6388_v13, %v2029_v20 }
  0xa8   : > { %v4859_v21 = vsel %vm2211_vm3, 1.0, %v6046_v16  ;;  %v4861_v23 = vsel %vm2213_vm4, 1.0, %v6046_v16 }
  0xa9   : > { %v2402_v22 = vpack.c.bf16 %v4859_v21, %v4858_v17  ;;  %v2403_v24 = vpack.c.bf16 %v4861_v23, %v4860_v19 }
  0xaa   : > { %v2032_v25 = vpop.permute.xlu0 %2031  ;;  %v2035_v26 = vpop.permute.xlu1 %2034 }
  0xab   : > { %vm2214_vm6 = vcmp.eq.s32.totalorder %v6388_v13, %v2032_v25  ;;  %5682 = vmatprep.mubr.msk.bf16.mxu0 %vm2466_vm5, %v2402_v22  ;;  %vm2215_vm7 = vcmp.eq.s32.totalorder %v6388_v13, %v2035_v26 }
  0xac   : > { %v4862_v27 = vsel %vm2214_vm6, 1.0, %v6046_v16  ;;  %5683 = vmatmul.mubr.msk.bf16.vlgmr.msra.gmra.mrb[48].mxu0 %vm2466_vm5, %v2403_v24  ;;  %v4863_v28 = vsel %vm2215_vm7, 1.0, %v6046_v16 }
  0xad   : > { %v2404_v29 = vpack.c.bf16 %v4863_v28, %v4862_v27 }
  0xae   : > { %v2038_v30 = vpop.permute.xlu0 %2037  ;;  %v2041_v31 = vpop.permute.xlu1 %2040 }
  0xaf   : > { %vm2216_vm8 = vcmp.eq.s32.totalorder %v6388_v13, %v2038_v30  ;;  %vm2217_vm9 = vcmp.eq.s32.totalorder %v6388_v13, %v2041_v31  ;;  %5686 = vmatprep.mubr.msk.bf16.mxu0 %vm2466_vm5, %v2404_v29 }
  0xb0   : > { %v4864_v32 = vsel %vm2216_vm8, 1.0, %v6046_v16  ;;  %v4865_v33 = vsel %vm2217_vm9, 1.0, %v6046_v16 }
  0xb1   : > { %v2405_v34 = vpack.c.bf16 %v4865_v33, %v4864_v32 }
  0xb2   : > { %v2044_v35 = vpop.permute.xlu0 %2043  ;;  %v2047_v36 = vpop.permute.xlu1 %2046 }
  0xb3   : > { %vm2218_vm10 = vcmp.eq.s32.totalorder %v6388_v13, %v2044_v35  ;;  %vm2219_vm11 = vcmp.eq.s32.totalorder %v6388_v13, %v2047_v36 }
  0xb4   : > { %v4866_v37 = vsel %vm2218_vm10, 1.0, %v6046_v16  ;;  %5687 = vmatmul.mubr.msk.bf16.gmra.mrb[52].mxu0 %vm2466_vm5, %v2405_v34  ;;  %v4867_v38 = vsel %vm2219_vm11, 1.0, %v6046_v16 }
  0xb5   : > { %v2406_v39 = vpack.c.bf16 %v4867_v38, %v4866_v37 }
  0xb6   : > { %v2050_v40 = vpop.permute.xlu0 %2049  ;;  %v2053_v42 = vpop.permute.xlu1 %2052 }
  0xb7   : > { %vm2220_vm13 = vcmp.eq.s32.totalorder %v6388_v13, %v2050_v40  ;;  %vm2221_vm14 = vcmp.eq.s32.totalorder %v6388_v13, %v2053_v42  ;;  %5690 = vmatprep.mubr.msk.bf16.mxu0 %vm2466_vm5, %v2406_v39 }
  0xb8   : > { %v4868_v43 = vsel %vm2220_vm13, 1.0, %v6046_v16  ;;  %v4869_v44 = vsel %vm2221_vm14, 1.0, %v6046_v16 }
  0xb9   : > { %v2407_v45 = vpack.c.bf16 %v4869_v44, %v4868_v43 }
  0xba   : > { %v2056_v46 = vpop.permute.xlu0 %2055  ;;  %v2059_v47 = vpop.permute.xlu1 %2058 }
  0xbb   : > { %vm2222_vm15 = vcmp.eq.s32.totalorder %v6388_v13, %v2056_v46  ;;  %vm2223_vm1 = vcmp.eq.s32.totalorder %v6388_v13, %v2059_v47 }
  0xbc   : > { %v4870_v48 = vsel %vm2222_vm15, 1.0, %v6046_v16  ;;  %5691 = vmatmul.mubr.msk.bf16.gmra.mrb[56].mxu0 %vm2466_vm5, %v2407_v45  ;;  %v4871_v49 = vsel %vm2223_vm1, 1.0, %v6046_v16 }
  0xbd   : > { %v2408_v50 = vpack.c.bf16 %v4871_v49, %v4870_v48  ;;  %v6490_v48 = vld [vmem:[%s7702_s7] ss:$0 sm:$0xff] }
  0xbe   : > { %v2062_v51 = vpop.permute.xlu0 %2061  ;;  %v2065_v52 = vpop.permute.xlu1 %2064 }
  0xbf   : > { %vm2224_vm2 = vcmp.eq.s32.totalorder %v6388_v13, %v2062_v51  ;;  %vm2225_vm3 = vcmp.eq.s32.totalorder %v6388_v13, %v2065_v52  ;;  %5694 = vmatprep.mubr.msk.bf16.mxu0 %vm2466_vm5, %v2408_v50 }
  0xc0   : > { %v4872_v53 = vsel %vm2224_vm2, 1.0, %v6046_v16  ;;  %v4873_v54 = vsel %vm2225_vm3, 1.0, %v6046_v16 }
  0xc1   : > { %v2409_v55 = vpack.c.bf16 %v4873_v54, %v4872_v53 }
  0xc2   : > { %v2068_v56 = vpop.permute.xlu0 %2067  ;;  %v2071_v57 = vpop.permute.xlu1 %2070 }
  0xc3   : > { %vm2226_vm4 = vcmp.eq.s32.totalorder %v6388_v13, %v2068_v56  ;;  %vm2227_vm6 = vcmp.eq.s32.totalorder %v6388_v13, %v2071_v57 }
  0xc4   : > { %v4874_v58 = vsel %vm2226_vm4, 1.0, %v6046_v16  ;;  %5695 = vmatmul.mubr.msk.bf16.gmra.mrb[60].mxu0 %vm2466_vm5, %v2409_v55  ;;  %v4875_v59 = vsel %vm2227_vm6, 1.0, %v6046_v16 }
  0xc5   : > { %v2410_v60 = vpack.c.bf16 %v4875_v59, %v4874_v58 }
  0xc6   : > { %v2074_v61 = vpop.permute.xlu0 %2073  ;;  %v2077_v62 = vpop.permute.xlu1 %2076 }
  0xc7   : > { %vm2228_vm7 = vcmp.eq.s32.totalorder %v6388_v13, %v2074_v61  ;;  %vm2229_vm8 = vcmp.eq.s32.totalorder %v6388_v13, %v2077_v62  ;;  %5698 = vmatprep.mubr.msk.bf16.mxu0 %vm2466_vm5, %v2410_v60 }
  0xc8   : > { %v4876_v63 = vsel %vm2228_vm7, 1.0, %v6046_v16  ;;  %v4877_v0 = vsel %vm2229_vm8, 1.0, %v6046_v16 }
  0xc9   : > { %v2411_v1 = vpack.c.bf16 %v4877_v0, %v4876_v63 }
  0xca   : > { %v2080_v2 = vpop.permute.xlu0 %2079  ;;  %v2083_v3 = vpop.permute.xlu1 %2082 }
  0xcb   : > { %vm2230_vm9 = vcmp.eq.s32.totalorder %v6388_v13, %v2080_v2  ;;  %vm2231_vm10 = vcmp.eq.s32.totalorder %v6388_v13, %v2083_v3 }
  0xcc   : > { %v4878_v4 = vsel %vm2230_vm9, 1.0, %v6046_v16  ;;  %5699 = vmatmul.mubr.msk.bf16.gmra.mrb[64].mxu0 %vm2466_vm5, %v2411_v1  ;;  %v4879_v5 = vsel %vm2231_vm10, 1.0, %v6046_v16 }
  0xcd   : > { %v2412_v6 = vpack.c.bf16 %v4879_v5, %v4878_v4 }
  0xce   : > { %v2086_v7 = vpop.permute.xlu0 %2085  ;;  %v2089_v8 = vpop.permute.xlu1 %2088 }
  0xcf   : > { %vm2232_vm11 = vcmp.eq.s32.totalorder %v6388_v13, %v2086_v7  ;;  %vm2233_vm13 = vcmp.eq.s32.totalorder %v6388_v13, %v2089_v8  ;;  %5702 = vmatprep.mubr.msk.bf16.mxu0 %vm2466_vm5, %v2412_v6 }
  0xd0   : > { %v4880_v9 = vsel %vm2232_vm11, 1.0, %v6046_v16  ;;  %v4881_v11 = vsel %vm2233_vm13, 1.0, %v6046_v16 }
  0xd1   : > { %v2413_v12 = vpack.c.bf16 %v4881_v11, %v4880_v9 }
  0xd2   : > { %v2092_v14 = vpop.permute.xlu0 %2091  ;;  %v2095_v15 = vpop.permute.xlu1 %2094 }
  0xd3   : > { %vm2234_vm14 = vcmp.eq.s32.totalorder %v6388_v13, %v2092_v14  ;;  %vm2235_vm15 = vcmp.eq.s32.totalorder %v6388_v13, %v2095_v15 }
  0xd4   : > { %v4882_v17 = vsel %vm2234_vm14, 1.0, %v6046_v16  ;;  %5703 = vmatmul.mubr.msk.bf16.gmra.mrb[68].mxu0 %vm2466_vm5, %v2413_v12  ;;  %v4883_v18 = vsel %vm2235_vm15, 1.0, %v6046_v16 }
  0xd5   : > { %v2414_v19 = vpack.c.bf16 %v4883_v18, %v4882_v17 }
  0xd6   : > { %v2098_v20 = vpop.permute.xlu0 %2097  ;;  %v2101_v21 = vpop.permute.xlu1 %2100 }
  0xd7   : > { %vm2236_vm1 = vcmp.eq.s32.totalorder %v6388_v13, %v2098_v20  ;;  %vm2237_vm2 = vcmp.eq.s32.totalorder %v6388_v13, %v2101_v21  ;;  %5706 = vmatprep.mubr.msk.bf16.mxu0 %vm2466_vm5, %v2414_v19 }
  0xd8   : > { %v4884_v22 = vsel %vm2236_vm1, 1.0, %v6046_v16  ;;  %v4885_v23 = vsel %vm2237_vm2, 1.0, %v6046_v16 }
  0xd9   : > { %v2415_v24 = vpack.c.bf16 %v4885_v23, %v4884_v22 }
  0xda   : > { %v2104_v25 = vpop.permute.xlu0 %2103  ;;  %v2107_v26 = vpop.permute.xlu1 %2106 }
  0xdb   : > { %vm2238_vm3 = vcmp.eq.s32.totalorder %v6388_v13, %v2104_v25  ;;  %vm2239_vm4 = vcmp.eq.s32.totalorder %v6388_v13, %v2107_v26 }
  0xdc   : > { %v4886_v27 = vsel %vm2238_vm3, 1.0, %v6046_v16  ;;  %5707 = vmatmul.mubr.msk.bf16.gmra.mrb[72].mxu0 %vm2466_vm5, %v2415_v24  ;;  %v4887_v28 = vsel %vm2239_vm4, 1.0, %v6046_v16 }
  0xdd   : > { %v2416_v29 = vpack.c.bf16 %v4887_v28, %v4886_v27 }
  0xde   : > { %v2110_v30 = vpop.permute.xlu0 %2109  ;;  %v2113_v31 = vpop.permute.xlu1 %2112 }
  0xdf   : > { %vm2240_vm6 = vcmp.eq.s32.totalorder %v6388_v13, %v2110_v30  ;;  %vm2241_vm7 = vcmp.eq.s32.totalorder %v6388_v13, %v2113_v31  ;;  %5710 = vmatprep.mubr.msk.bf16.mxu0 %vm2466_vm5, %v2416_v29 }
  0xe0   : > { %v4888_v32 = vsel %vm2240_vm6, 1.0, %v6046_v16  ;;  %v4889_v33 = vsel %vm2241_vm7, 1.0, %v6046_v16 }
  0xe1   : > { %v2417_v34 = vpack.c.bf16 %v4889_v33, %v4888_v32 }
  0xe2   : > { %v2116_v35 = vpop.permute.xlu0 %2115  ;;  %v2119_v36 = vpop.permute.xlu1 %2118 }
  0xe3   : > { %vm2242_vm8 = vcmp.eq.s32.totalorder %v6388_v13, %v2116_v35  ;;  %vm2243_vm9 = vcmp.eq.s32.totalorder %v6388_v13, %v2119_v36 }
  0xe4   : > { %v4890_v37 = vsel %vm2242_vm8, 1.0, %v6046_v16  ;;  %5711 = vmatmul.mubr.msk.bf16.gmra.mrb[76].mxu0 %vm2466_vm5, %v2417_v34  ;;  %v4891_v38 = vsel %vm2243_vm9, 1.0, %v6046_v16 }
  0xe5   : > { %v2418_v39 = vpack.c.bf16 %v4891_v38, %v4890_v37 }
  0xe6   : > { %v2122_v40 = vpop.permute.xlu0 %2121  ;;  %v2125_v42 = vpop.permute.xlu1 %2124 }
  0xe7   : > { %vm2244_vm10 = vcmp.eq.s32.totalorder %v6388_v13, %v2122_v40  ;;  %vm2245_vm11 = vcmp.eq.s32.totalorder %v6388_v13, %v2125_v42  ;;  %5714 = vmatprep.mubr.msk.bf16.mxu0 %vm2466_vm5, %v2418_v39 }
  0xe8   : > { %v4892_v43 = vsel %vm2244_vm10, 1.0, %v6046_v16  ;;  %v4893_v44 = vsel %vm2245_vm11, 1.0, %v6046_v16 }
  0xe9   : > { %v2419_v45 = vpack.c.bf16 %v4893_v44, %v4892_v43 }
  0xea   : > { %v2128_v46 = vpop.permute.xlu0 %2127  ;;  %v2131_v47 = vpop.permute.xlu1 %2130 }
  0xeb   : > { %vm2246_vm13 = vcmp.eq.s32.totalorder %v6388_v13, %v2128_v46  ;;  %vm2247_vm14 = vcmp.eq.s32.totalorder %v6388_v13, %v2131_v47 }
  0xec   : > { %v4894_v49 = vsel %vm2246_vm13, 1.0, %v6046_v16  ;;  %5715 = vmatmul.mubr.msk.bf16.gmra.mrb[80].mxu0 %vm2466_vm5, %v2419_v45  ;;  %v4895_v50 = vsel %vm2247_vm14, 1.0, %v6046_v16 }
  0xed   : > { %v2420_v52 = vpack.c.bf16 %v4895_v50, %v4894_v49 }
  0xee   : > { %v2134_v53 = vpop.permute.xlu0 %2133  ;;  %v2137_v56 = vpop.permute.xlu1 %2136 }
  0xef   : > { %vm2248_vm15 = vcmp.eq.s32.totalorder %v6388_v13, %v2134_v53  ;;  %vm2249_vm1 = vcmp.eq.s32.totalorder %v6388_v13, %v2137_v56  ;;  %5718 = vmatprep.mubr.msk.bf16.mxu0 %vm2466_vm5, %v2420_v52 }
  0xf0   : > { %v4896_v58 = vsel %vm2248_vm15, 1.0, %v6046_v16  ;;  %v4897_v59 = vsel %vm2249_vm1, 1.0, %v6046_v16 }
  0xf1   : > { %v2421_v62 = vpack.c.bf16 %v4897_v59, %v4896_v58 }
  0xf2   : > { %v2140_v63 = vpop.permute.xlu0 %2139  ;;  %v2143_v3 = vpop.permute.xlu1 %2142 }
  0xf3   : > { %vm2250_vm2 = vcmp.eq.s32.totalorder %v6388_v13, %v2140_v63  ;;  %vm2251_vm3 = vcmp.eq.s32.totalorder %v6388_v13, %v2143_v3 }
  0xf4   : > { %v4898_v5 = vsel %vm2250_vm2, 1.0, %v6046_v16  ;;  %5719 = vmatmul.mubr.msk.bf16.gmra.mrb[84].mxu0 %vm2466_vm5, %v2421_v62  ;;  %v4899_v6 = vsel %vm2251_vm3, 1.0, %v6046_v16 }
  0xf5   : > { %v2422_v9 = vpack.c.bf16 %v4899_v6, %v4898_v5 }
  0xf6   : > { %v2146_v11 = vpop.permute.xlu0 %2145  ;;  %v2149_v17 = vpop.permute.xlu1 %2148 }
  0xf7   : > { %vm2252_vm4 = vcmp.eq.s32.totalorder %v6388_v13, %v2146_v11  ;;  %vm2253_vm6 = vcmp.eq.s32.totalorder %v6388_v13, %v2149_v17  ;;  %5722 = vmatprep.mubr.msk.bf16.mxu0 %vm2466_vm5, %v2422_v9 }
  0xf8   : > { %v5480_v51 = vpop.f32.mrb[0].mxu0  ;;  %v4900_v19 = vsel %vm2252_vm4, 1.0, %v6046_v16  ;;  %v6532_v31 = vpop.f32.mrb[0].mxu1 }
  0xf9   : > { %v1053_v54 = vadd.f32 %v5480_v51, %v6490_v48  ;;  %v1047_v55 = vpop.f32.mrb[1].mxu0  ;;  %v6541_v43 = vpop.f32.mrb[1].mxu1 }
  0xfa   : > { %v1048_v57 = vadd.f32 %v6490_v48, %v1047_v55  ;;  %v2152_v23 = vpop.permute.xlu0 %2151  ;;  %v2155_v27 = vpop.permute.xlu1 %2154 }
  0xfb   : > { %v1367_v0 = vmax.f32 %v1053_v54, 0.0  ;;  %vm2254_vm7 = vcmp.eq.s32.totalorder %v6388_v13, %v2152_v23  ;;  %vm2255_vm8 = vcmp.eq.s32.totalorder %v6388_v13, %v2155_v27 }
  0xfc   : > { %v1366_v60 = vmax.f32 %v1048_v57, 0.0  ;;  %v5483_v61 = vpop.f32.mrb[2].mxu0  ;;  %v4902_v29 = vsel %vm2254_vm7, 1.0, %v6046_v16  ;;  %v4903_v30 = vsel %vm2255_vm8, 1.0, %v6046_v16  ;;  %v6545_v45 = vpop.f32.mrb[2].mxu1 }
  0xfd   : > { %v1063_v1 = vadd.f32 %v5483_v61, %v6490_v48  ;;  %v1057_v2 = vpop.f32.mrb[3].mxu0  ;;  %v2424_v34 = vpack.c.bf16 %v4903_v30, %v4902_v29  ;;  %v6554_v57 = vpop.f32.mrb[3].mxu1 }
  0xfe   : > { %v1058_v4 = vadd.f32 %v6490_v48, %v1057_v2  ;;  %5578 = vmatprep.mubr.msk.f32.mxu1 %vm788_vm0, %v1366_v60  ;;  %v2158_v35 = vpop.permute.xlu0 %2157  ;;  %v2161_v39 = vpop.permute.xlu1 %2160 }
  0xff   : > { %5579 = vmatmul.mubr.msk.f32.vlgmr.msra.gmra.mrb[16].mxu1 %vm788_vm0, %v1367_v0  ;;  %v1369_v12 = vmax.f32 %v1063_v1, 0.0  ;;  %vm2256_vm9 = vcmp.eq.s32.totalorder %v6388_v13, %v2158_v35  ;;  %vm2257_vm10 = vcmp.eq.s32.totalorder %v6388_v13, %v2161_v39 }
 0x100   : > { %v1368_v7 = vmax.f32 %v1058_v4, 0.0  ;;  %v5486_v8 = vpop.f32.mrb[4].mxu0  ;;  %5747 = vmatpush3.msk.msra.mxu1 %vm7716_vm12, %v6417_v41  ;;  %v4901_v41 = vsel %vm2253_vm6, 1.0, %v6046_v16  ;;  %v4904_v42 = vsel %vm2256_vm9, 1.0, %v6046_v16  ;;  %v4905_v44 = vsel %vm2257_vm10, 1.0, %v6046_v16  ;;  %v6558_v59 = vpop.f32.mrb[4].mxu1 }
 0x101   : > { %v1073_v14 = vadd.f32 %v5486_v8, %v6490_v48  ;;  %v1067_v15 = vpop.f32.mrb[5].mxu0  ;;  %v2423_v22 = vpack.c.bf16 %v4901_v41, %v4900_v19  ;;  %v2425_v49 = vpack.c.bf16 %v4905_v44, %v4904_v42  ;;  %v6567_v6 = vpop.f32.mrb[5].mxu1 }
 0x102   : > { %v1068_v18 = vadd.f32 %v6490_v48, %v1067_v15  ;;  %5581 = vmatprep.mubr.msk.f32.mxu1 %vm788_vm0, %v1368_v7  ;;  %v2164_v50 = vpop.permute.xlu0 %2163  ;;  %v2167_v54 = vpop.permute.xlu1 %2166 }
 0x103   : > { %5582 = vmatmul.mubr.msk.f32.gmra.mrb[18].mxu1 %vm788_vm0, %v1369_v12  ;;  %v1371_v24 = vmax.f32 %v1073_v14, 0.0  ;;  %5723 = vmatmul.mubr.msk.bf16.gmra.mrb[88].mxu0 %vm2466_vm5, %v2423_v22  ;;  %vm2258_vm11 = vcmp.eq.s32.totalorder %v6388_v13, %v2164_v50  ;;  %vm2259_vm13 = vcmp.eq.s32.totalorder %v6388_v13, %v2167_v54 }
 0x104   : > { %v1370_v20 = vmax.f32 %v1068_v18, 0.0  ;;  %v5489_v21 = vpop.f32.mrb[6].mxu0  ;;  %5726 = vmatprep.mubr.msk.bf16.mxu0 %vm2466_vm5, %v2424_v34  ;;  %v4906_v56 = vsel %vm2258_vm11, 1.0, %v6046_v16  ;;  %v4907_v58 = vsel %vm2259_vm13, 1.0, %v6046_v16  ;;  %v6571_v8 = vpop.f32.mrb[6].mxu1 }
 0x105   : > { %v1083_v25 = vadd.f32 %v5489_v21, %v6490_v48  ;;  %v1077_v26 = vpop.f32.mrb[7].mxu0  ;;  %v2426_v62 = vpack.c.bf16 %v4907_v58, %v4906_v56  ;;  %v6580_v21 = vpop.f32.mrb[7].mxu1 }
 0x106   : > { %v1078_v28 = vadd.f32 %v6490_v48, %v1077_v26  ;;  %5584 = vmatprep.mubr.msk.f32.mxu1 %vm788_vm0, %v1370_v20  ;;  %v2170_v63 = vpop.permute.xlu0 %2169  ;;  %v2173_v3 = vpop.permute.xlu1 %2172 }
 0x107   : > { %5585 = vmatmul.mubr.msk.f32.gmra.mrb[20].mxu1 %vm788_vm0, %v1371_v24  ;;  %v1373_v36 = vmax.f32 %v1083_v25, 0.0  ;;  %vm2260_vm14 = vcmp.eq.s32.totalorder %v6388_v13, %v2170_v63  ;;  %vm2261_vm15 = vcmp.eq.s32.totalorder %v6388_v13, %v2173_v3 }
 0x108   : > { %v1372_v32 = vmax.f32 %v1078_v28, 0.0  ;;  %v5492_v33 = vpop.f32.mrb[8].mxu0  ;;  %v4908_v5 = vsel %vm2260_vm14, 1.0, %v6046_v16  ;;  %v4909_v7 = vsel %vm2261_vm15, 1.0, %v6046_v16  ;;  %v6584_v23 = vpop.f32.mrb[8].mxu1 }
 0x109   : > { %v1093_v37 = vadd.f32 %v5492_v33, %v6490_v48  ;;  %v1087_v38 = vpop.f32.mrb[9].mxu0  ;;  %v2427_v12 = vpack.c.bf16 %v4909_v7, %v4908_v5  ;;  %v6593_v35 = vpop.f32.mrb[9].mxu1 }
 0x10a   : > { %v1088_v40 = vadd.f32 %v6490_v48, %v1087_v38  ;;  %5587 = vmatprep.mubr.msk.f32.mxu1 %vm788_vm0, %v1372_v32  ;;  %v2176_v14 = vpop.permute.xlu0 %2175  ;;  %v2179_v19 = vpop.permute.xlu1 %2178 }
 0x10b   : > { %5588 = vmatmul.mubr.msk.f32.gmra.mrb[22].mxu1 %vm788_vm0, %v1373_v36  ;;  %v1375_v51 = vmax.f32 %v1093_v37, 0.0  ;;  %5727 = vmatmul.mubr.msk.bf16.gmra.mrb[92].mxu0 %vm2466_vm5, %v2425_v49  ;;  %vm2262_vm1 = vcmp.eq.s32.totalorder %v6388_v13, %v2176_v14  ;;  %vm2263_vm2 = vcmp.eq.s32.totalorder %v6388_v13, %v2179_v19 }
 0x10c   : > { %v1374_v46 = vmax.f32 %v1088_v40, 0.0  ;;  %v5495_v47 = vpop.f32.mrb[10].mxu0  ;;  %5730 = vmatprep.mubr.msk.bf16.mxu0 %vm2466_vm5, %v2426_v62  ;;  %v4910_v20 = vsel %vm2262_vm1, 1.0, %v6046_v16  ;;  %v4911_v22 = vsel %vm2263_vm2, 1.0, %v6046_v16  ;;  %v6597_v37 = vpop.f32.mrb[10].mxu1 }
 0x10d   : > { %v1103_v52 = vadd.f32 %v5495_v47, %v6490_v48  ;;  %v1097_v53 = vpop.f32.mrb[11].mxu0  ;;  %v2428_v26 = vpack.c.bf16 %v4911_v22, %v4910_v20 }
 0x10e   : > { %v1098_v55 = vadd.f32 %v6490_v48, %v1097_v53  ;;  %5590 = vmatprep.mubr.msk.f32.mxu1 %vm788_vm0, %v1374_v46  ;;  %v2182_v27 = vpop.permute.xlu0 %2181  ;;  %v2185_v32 = vpop.permute.xlu1 %2184 }
 0x10f   : > { %5591 = vmatmul.mubr.msk.f32.gmra.mrb[24].mxu1 %vm788_vm0, %v1375_v51  ;;  %v1377_v0 = vmax.f32 %v1103_v52, 0.0  ;;  %vm2264_vm3 = vcmp.eq.s32.totalorder %v6388_v13, %v2182_v27  ;;  %vm2265_vm4 = vcmp.eq.s32.totalorder %v6388_v13, %v2185_v32  ;;  %v6606_v52 = vpop.f32.mrb[11].mxu1 }
 0x110   : > { %v1376_v60 = vmax.f32 %v1098_v55, 0.0  ;;  %v5498_v61 = vpop.f32.mrb[12].mxu0  ;;  %v4912_v34 = vsel %vm2264_vm3, 1.0, %v6046_v16  ;;  %v4913_v36 = vsel %vm2265_vm4, 1.0, %v6046_v16  ;;  %v6610_v54 = vpop.f32.mrb[12].mxu1 }
 0x111   : > { %v1113_v1 = vadd.f32 %v5498_v61, %v6490_v48  ;;  %v1107_v2 = vpop.f32.mrb[13].mxu0  ;;  %v2429_v40 = vpack.c.bf16 %v4913_v36, %v4912_v34  ;;  %v6619_v3 = vpop.f32.mrb[13].mxu1 }
 0x112   : > { %v1108_v4 = vadd.f32 %v6490_v48, %v1107_v2  ;;  %5593 = vmatprep.mubr.msk.f32.mxu1 %vm788_vm0, %v1376_v60  ;;  %v2188_v42 = vpop.permute.xlu0 %2187  ;;  %v2191_v49 = vpop.permute.xlu1 %2190 }
 0x113   : > { %5594 = vmatmul.mubr.msk.f32.gmra.mrb[26].mxu1 %vm788_vm0, %v1377_v0  ;;  %v1379_v15 = vmax.f32 %v1113_v1, 0.0  ;;  %5731 = vmatmul.mubr.msk.bf16.gmra.mrb[96].mxu0 %vm2466_vm5, %v2427_v12  ;;  %vm2266_vm6 = vcmp.eq.s32.totalorder %v6388_v13, %v2188_v42  ;;  %vm2267_vm7 = vcmp.eq.s32.totalorder %v6388_v13, %v2191_v49 }
 0x114   : > { %v1378_v9 = vmax.f32 %v1108_v4, 0.0  ;;  %v5501_v11 = vpop.f32.mrb[14].mxu0  ;;  %5734 = vmatprep.mubr.msk.bf16.mxu0 %vm2466_vm5, %v2428_v26  ;;  %v4914_v51 = vsel %vm2266_vm6, 1.0, %v6046_v16  ;;  %v4915_v53 = vsel %vm2267_vm7, 1.0, %v6046_v16  ;;  %v6623_v5 = vpop.f32.mrb[14].mxu1 }
 0x115   : > { %v1123_v17 = vadd.f32 %v5501_v11, %v6490_v48  ;;  %v1117_v18 = vpop.f32.mrb[15].mxu0  ;;  %v2430_v58 = vpack.c.bf16 %v4915_v53, %v4914_v51  ;;  %v6632_v20 = vpop.f32.mrb[15].mxu1 }
 0x116   : > { %v1118_v41 = vadd.f32 %v6490_v48, %v1117_v18  ;;  %5596 = vmatprep.mubr.msk.f32.mxu1 %vm788_vm0, %v1378_v9  ;;  %v2194_v60 = vpop.permute.xlu0 %2193  ;;  %v2197_v0 = vpop.permute.xlu1 %2196 }
 0x117   : > { %5597 = vmatmul.mubr.msk.f32.gmra.mrb[28].mxu1 %vm788_vm0, %v1379_v15  ;;  %v1381_v28 = vmax.f32 %v1123_v17, 0.0  ;;  %vm2268_vm8 = vcmp.eq.s32.totalorder %v6388_v13, %v2194_v60  ;;  %vm2269_vm9 = vcmp.eq.s32.totalorder %v6388_v13, %v2197_v0 }
 0x118   : > { %v1380_v24 = vmax.f32 %v1118_v41, 0.0  ;;  %v5504_v25 = vpop.f32.mrb[16].mxu0  ;;  %v4916_v2 = vsel %vm2268_vm8, 1.0, %v6046_v16  ;;  %v4917_v4 = vsel %vm2269_vm9, 1.0, %v6046_v16 }
 0x119   : > { %v1133_v29 = vadd.f32 %v5504_v25, %v6490_v48  ;;  %v1127_v30 = vpop.f32.mrb[17].mxu0  ;;  %v2431_v11 = vpack.c.bf16 %v4917_v4, %v4916_v2 }
 0x11a   : > { %v1128_v33 = vadd.f32 %v6490_v48, %v1127_v30  ;;  %5599 = vmatprep.mubr.msk.f32.mxu1 %vm788_vm0, %v1380_v24  ;;  %v2200_v12 = vpop.permute.xlu0 %2199  ;;  %v2203_v18 = vpop.permute.xlu1 %2202 }
 0x11b   : > { %5600 = vmatmul.mubr.msk.f32.gmra.mrb[30].mxu1 %vm788_vm0, %v1381_v28  ;;  %v1383_v44 = vmax.f32 %v1133_v29, 0.0  ;;  %5735 = vmatmul.mubr.msk.bf16.gmra.mrb[100].mxu0 %vm2466_vm5, %v2429_v40  ;;  %vm2270_vm10 = vcmp.eq.s32.totalorder %v6388_v13, %v2200_v12  ;;  %vm2271_vm11 = vcmp.eq.s32.totalorder %v6388_v13, %v2203_v18 }
 0x11c   : > { %v1382_v38 = vmax.f32 %v1128_v33, 0.0  ;;  %v5507_v39 = vpop.f32.mrb[18].mxu0  ;;  %5738 = vmatprep.mubr.msk.bf16.mxu0 %vm2466_vm5, %v2430_v58  ;;  %v4918_v41 = vsel %vm2270_vm10, 1.0, %v6046_v16  ;;  %v4919_v22 = vsel %vm2271_vm11, 1.0, %v6046_v16 }
 0x11d   : > { %v1143_v46 = vadd.f32 %v5507_v39, %v6490_v48  ;;  %v1137_v47 = vpop.f32.mrb[19].mxu0  ;;  %v2432_v26 = vpack.c.bf16 %v4919_v22, %v4918_v41 }
 0x11e   : > { %v1138_v50 = vadd.f32 %v6490_v48, %v1137_v47  ;;  %5602 = vmatprep.mubr.msk.f32.mxu1 %vm788_vm0, %v1382_v38  ;;  %v2206_v27 = vpop.permute.xlu0 %2205  ;;  %v2209_v32 = vpop.permute.xlu1 %2208 }
 0x11f   : > { %5603 = vmatmul.mubr.msk.f32.gmra.mrb[32].mxu1 %vm788_vm0, %v1383_v44  ;;  %v1385_v61 = vmax.f32 %v1143_v46, 0.0  ;;  %vm2272_vm13 = vcmp.eq.s32.totalorder %v6388_v13, %v2206_v27  ;;  %vm2273_vm14 = vcmp.eq.s32.totalorder %v6388_v13, %v2209_v32 }
 0x120   : > { %v1384_v55 = vmax.f32 %v1138_v50, 0.0  ;;  %v5510_v56 = vpop.f32.mrb[20].mxu0  ;;  %v4920_v34 = vsel %vm2272_vm13, 1.0, %v6046_v16  ;;  %v4921_v36 = vsel %vm2273_vm14, 1.0, %v6046_v16 }
 0x121   : > { %v1153_v62 = vadd.f32 %v5510_v56, %v6490_v48  ;;  %v1147_v63 = vpop.f32.mrb[21].mxu0  ;;  %v2433_v40 = vpack.c.bf16 %v4921_v36, %v4920_v34 }
 0x122   : > { %v1148_v1 = vadd.f32 %v6490_v48, %v1147_v63  ;;  %5605 = vmatprep.mubr.msk.f32.mxu1 %vm788_vm0, %v1384_v55 }
 0x123   : > { %5606 = vmatmul.mubr.msk.f32.gmra.mrb[34].mxu1 %vm788_vm0, %v1385_v61  ;;  %v1387_v14 = vmax.f32 %v1153_v62, 0.0  ;;  %5739 = vmatmul.mubr.msk.bf16.gmra.mrb[104].mxu0 %vm2466_vm5, %v2431_v11 }
 0x124   : > { %v1386_v7 = vmax.f32 %v1148_v1, 0.0  ;;  %v5513_v9 = vpop.f32.mrb[22].mxu0  ;;  %5742 = vmatprep.mubr.msk.bf16.mxu0 %vm2466_vm5, %v2432_v26 }
 0x125   : > { %v1163_v15 = vadd.f32 %v5513_v9, %v6490_v48  ;;  %v1157_v17 = vpop.f32.mrb[23].mxu0 }
 0x126   : > { %v1158_v19 = vadd.f32 %v6490_v48, %v1157_v17  ;;  %5608 = vmatprep.mubr.msk.f32.mxu1 %vm788_vm0, %v1386_v7 }
 0x127   : > { %5609 = vmatmul.mubr.msk.f32.gmra.mrb[36].mxu1 %vm788_vm0, %v1387_v14  ;;  %v1389_v28 = vmax.f32 %v1163_v15, 0.0 }
 0x128   : > { %v1388_v24 = vmax.f32 %v1158_v19, 0.0  ;;  %v5516_v25 = vpop.f32.mrb[24].mxu0 }
 0x129   : > { %v1173_v29 = vadd.f32 %v5516_v25, %v6490_v48  ;;  %v1167_v30 = vpop.f32.mrb[25].mxu0 }
 0x12a   : > { %v1168_v33 = vadd.f32 %v6490_v48, %v1167_v30  ;;  %5611 = vmatprep.mubr.msk.f32.mxu1 %vm788_vm0, %v1388_v24 }
 0x12b   : > { %5612 = vmatmul.mubr.msk.f32.gmra.mrb[38].mxu1 %vm788_vm0, %v1389_v28  ;;  %v1391_v42 = vmax.f32 %v1173_v29, 0.0  ;;  %5743 = vmatmul.mubr.msk.bf16.gmra.mrb[108].mxu0 %vm2466_vm5, %v2433_v40  ;;  %vm7715_vm5 = vcmask 31744  }
 0x12c   : > { %v1390_v38 = vmax.f32 %v1168_v33, 0.0  ;;  %v5519_v39 = vpop.f32.mrb[26].mxu0 }
 0x12d   : > { %v1183_v44 = vadd.f32 %v5519_v39, %v6490_v48  ;;  %v1177_v46 = vpop.f32.mrb[27].mxu0 }
 0x12e   : > { %v1178_v47 = vadd.f32 %v6490_v48, %v1177_v46  ;;  %5614 = vmatprep.mubr.msk.f32.mxu1 %vm788_vm0, %v1390_v38 }
 0x12f   : > { %5615 = vmatmul.mubr.msk.f32.gmra.mrb[40].mxu1 %vm788_vm0, %v1391_v42  ;;  %v1393_v50 = vmax.f32 %v1183_v44, 0.0 }
 0x130   : > { %v1392_v13 = vmax.f32 %v1178_v47, 0.0  ;;  %v5522_v49 = vpop.f32.mrb[28].mxu0 }
 0x131   : > { %v1193_v16 = vadd.f32 %v5522_v49, %v6490_v48  ;;  %v1187_v51 = vpop.f32.mrb[29].mxu0 }
 0x132   : > { %v1188_v53 = vadd.f32 %v6490_v48, %v1187_v51  ;;  %5617 = vmatprep.mubr.msk.f32.mxu1 %vm788_vm0, %v1392_v13 }
 0x133   : > { %5618 = vmatmul.mubr.msk.f32.gmra.mrb[42].mxu1 %vm788_vm0, %v1393_v50  ;;  %v1395_v58 = vmax.f32 %v1193_v16, 0.0 }
 0x134   : > { %v1394_v55 = vmax.f32 %v1188_v53, 0.0  ;;  %v5525_v56 = vpop.f32.mrb[30].mxu0 }
 0x135   : > { %v1203_v60 = vadd.f32 %v5525_v56, %v6490_v48  ;;  %v1197_v61 = vpop.f32.mrb[31].mxu0 }
 0x136   : > { %v1198_v62 = vadd.f32 %v6490_v48, %v1197_v61  ;;  %5620 = vmatprep.mubr.msk.f32.mxu1 %vm788_vm0, %v1394_v55  ;;  %v1288_v61 = vadd.f32 %v6490_v48, %v6541_v43 }
 0x137   : > { %5621 = vmatmul.mubr.msk.f32.gmra.mrb[44].mxu1 %vm788_vm0, %v1395_v58  ;;  %v1397_v1 = vmax.f32 %v1203_v60, 0.0 }
 0x138   : > { %v1396_v63 = vmax.f32 %v1198_v62, 0.0  ;;  %v5528_v0 = vpop.f32.mrb[32].mxu0 }
 0x139   : > { %v1213_v2 = vadd.f32 %v5528_v0, %v6490_v48  ;;  %v1207_v4 = vpop.f32.mrb[33].mxu0 }
 0x13a   : > { %v1208_v7 = vadd.f32 %v6490_v48, %v1207_v4  ;;  %5623 = vmatprep.mubr.msk.f32.mxu1 %vm788_vm0, %v1396_v63  ;;  %v1414_v4 = vmax.f32 %v1288_v61, 0.0 }
 0x13b   : > { %5624 = vmatmul.mubr.msk.f32.gmra.mrb[46].mxu1 %vm788_vm0, %v1397_v1  ;;  %v1399_v12 = vmax.f32 %v1213_v2, 0.0 }
 0x13c   : > { %v1398_v9 = vmax.f32 %v1208_v7, 0.0  ;;  %v5531_v11 = vpop.f32.mrb[34].mxu0  ;;  %v1298_v7 = vadd.f32 %v6490_v48, %v6554_v57 }
 0x13d   : > { %v1223_v14 = vadd.f32 %v5531_v11, %v6490_v48  ;;  %v1217_v15 = vpop.f32.mrb[35].mxu0  ;;  %v1293_v11 = vadd.f32 %v6532_v31, %v6490_v48  ;;  %v1318_v31 = vadd.f32 %v6490_v48, %v6580_v21 }
 0x13e   : > { %v1218_v17 = vadd.f32 %v6490_v48, %v1217_v15  ;;  %5626 = vmatprep.mubr.msk.f32.mxu1 %vm788_vm0, %v1398_v9  ;;  %v1416_v43 = vmax.f32 %v1298_v7, 0.0  ;;  %v1303_v15 = vadd.f32 %v6545_v45, %v6490_v48  ;;  %v1328_v45 = vadd.f32 %v6490_v48, %v6593_v35  ;;  %v669_v7 = vld [vmem:[%s6159_s17 + $0x98] sm:$0xff] }
 0x13f   : > { %5627 = vmatmul.mubr.msk.f32.gmra.mrb[48].mxu1 %vm788_vm0, %v1399_v12  ;;  %v1401_v41 = vmax.f32 %v1223_v14, 0.0  ;;  %v1308_v12 = vadd.f32 %v6490_v48, %v6567_v6  ;;  %v1415_v14 = vmax.f32 %v1293_v11, 0.0 }
 0x140   : > { %v1400_v18 = vmax.f32 %v1218_v17, 0.0  ;;  %v5534_v19 = vpop.f32.mrb[36].mxu0  ;;  %v1417_v17 = vmax.f32 %v1303_v15, 0.0 }
 0x141   : > { %v1233_v22 = vadd.f32 %v5534_v19, %v6490_v48  ;;  %v1227_v24 = vpop.f32.mrb[37].mxu0  ;;  %v1418_v57 = vmax.f32 %v1308_v12, 0.0  ;;  %v1420_v19 = vmax.f32 %v1318_v31, 0.0  ;;  %v673_v31 = vld [vmem:[%s6159_s17 + $0xb8] sm:$0xff] }
 0x142   : > { %v1228_v25 = vadd.f32 %v6490_v48, %v1227_v24  ;;  %5629 = vmatprep.mubr.msk.f32.mxu1 %vm788_vm0, %v1400_v18  ;;  %v1313_v18 = vadd.f32 %v6558_v59, %v6490_v48  ;;  %v1338_v59 = vadd.f32 %v6490_v48, %v6606_v52  ;;  %v1333_v24 = vadd.f32 %v6584_v23, %v6490_v48 }
 0x143   : > { %5630 = vmatmul.mubr.msk.f32.gmra.mrb[50].mxu1 %vm788_vm0, %v1401_v41  ;;  %v1403_v28 = vmax.f32 %v1233_v22, 0.0  ;;  %v1323_v41 = vadd.f32 %v6571_v8, %v6490_v48  ;;  %v1422_v22 = vmax.f32 %v1328_v45, 0.0  ;;  %v1348_v8 = vadd.f32 %v6490_v48, %v6619_v3 }
 0x144   : > { %v1402_v26 = vmax.f32 %v1228_v25, 0.0  ;;  %v5537_v27 = vpop.f32.mrb[38].mxu0  ;;  %v1419_v6 = vmax.f32 %v1313_v18, 0.0  ;;  %v1424_v25 = vmax.f32 %v1338_v59, 0.0  ;;  %v1423_v35 = vmax.f32 %v1333_v24, 0.0  ;;  %v5979_v59 = vld [vmem:[%s7706_s11 + $0x8] sm:$0xff]  }
 0x145   : > { %v1243_v29 = vadd.f32 %v5537_v27, %v6490_v48  ;;  %v1237_v30 = vpop.f32.mrb[39].mxu0  ;;  %v1421_v21 = vmax.f32 %v1323_v41, 0.0  ;;  %v1426_v52 = vmax.f32 %v1348_v8, 0.0  ;;  %v1358_v23 = vadd.f32 %v6490_v48, %v6632_v20  ;;  %v678_v24 = vld [vmem:[%s6159_s17 + $0xe0] sm:$0xff] }
 0x146   : > { %v1238_v32 = vadd.f32 %v6490_v48, %v1237_v30  ;;  %5632 = vmatprep.mubr.msk.f32.mxu1 %vm788_vm0, %v1402_v26  ;;  %v1343_v26 = vadd.f32 %v6597_v37, %v6490_v48  ;;  %v650_v30 = vld [vmem:[%s6159_s17] sm:$0xff] }
 0x147   : > { %5633 = vmatmul.mubr.msk.f32.gmra.mrb[52].mxu1 %vm788_vm0, %v1403_v28  ;;  %v1405_v36 = vmax.f32 %v1243_v29, 0.0  ;;  %v1353_v28 = vadd.f32 %v6610_v54, %v6490_v48  ;;  %v1428_v3 = vmax.f32 %v1358_v23, 0.0  ;;  %v1363_v29 = vadd.f32 %v6623_v5, %v6490_v48  ;;  %v651_v54 = vld [vmem:[%s6159_s17 + $0x8] sm:$0xff]  ;;  %v654_v5 = vld [vmem:[%s6159_s17 + $0x20] sm:$0xff]  ;;  %v680_v23 = vld [vmem:[%s6159_s17 + $0xf0] sm:$0xff] }
 0x148   : > { %v1404_v33 = vmax.f32 %v1238_v32, 0.0  ;;  %v5540_v34 = vpop.f32.mrb[40].mxu0  ;;  %v1425_v27 = vmax.f32 %v1343_v26, 0.0  ;;  %v652_v32 = vld [vmem:[%s6159_s17 + $0x10] sm:$0xff]  ;;  %v679_v26 = vld [vmem:[%s6159_s17 + $0xe8] sm:$0xff] }
 0x149   : > { %v1253_v38 = vadd.f32 %v5540_v34, %v6490_v48  ;;  %v1247_v39 = vpop.f32.mrb[41].mxu0  ;;  %v1427_v37 = vmax.f32 %v1353_v28, 0.0  ;;  %v1429_v20 = vmax.f32 %v1363_v29, 0.0  ;;  %v656_v34 = vld [vmem:[%s6159_s17 + $0x30] sm:$0xff]  ;;  %v682_v28 = vld [vmem:[%s6159_s17 + $0x100] sm:$0xff] }
 0x14a   : > { %v1248_v40 = vadd.f32 %v6490_v48, %v1247_v39  ;;  %5635 = vmatprep.mubr.msk.f32.mxu1 %vm788_vm0, %v1404_v33  ;;  %v655_v33 = vld [vmem:[%s6159_s17 + $0x28] sm:$0xff] }
 0x14b   : > { %5636 = vmatmul.mubr.msk.f32.gmra.mrb[54].mxu1 %vm788_vm0, %v1405_v36  ;;  %v1407_v46 = vmax.f32 %v1253_v38, 0.0  ;;  %v657_v36 = vld [vmem:[%s6159_s17 + $0x38] sm:$0xff]  ;;  %v658_v38 = vld [vmem:[%s6159_s17 + $0x40] sm:$0xff]  ;;  %v659_v39 = vld [vmem:[%s6159_s17 + $0x48] sm:$0xff] }
 0x14c   : > { %v1406_v42 = vmax.f32 %v1248_v40, 0.0  ;;  %v5543_v44 = vpop.f32.mrb[42].mxu0  ;;  %v660_v40 = vld [vmem:[%s6159_s17 + $0x50] sm:$0xff] }
 0x14d   : > { %v1263_v47 = vadd.f32 %v5543_v44, %v6490_v48  ;;  %v1257_v13 = vpop.f32.mrb[43].mxu0  ;;  %v661_v44 = vld [vmem:[%s6159_s17 + $0x58] sm:$0xff] }
 0x14e   : > { %v1258_v49 = vadd.f32 %v6490_v48, %v1257_v13  ;;  %5638 = vmatprep.mubr.msk.f32.mxu1 %vm788_vm0, %v1406_v42 }
 0x14f   : > { %5639 = vmatmul.mubr.msk.f32.gmra.mrb[56].mxu1 %vm788_vm0, %v1407_v46  ;;  %v1409_v51 = vmax.f32 %v1263_v47, 0.0  ;;  %v662_v47 = vld [vmem:[%s6159_s17 + $0x60] sm:$0xff] }
 0x150   : > { %v1408_v50 = vmax.f32 %v1258_v49, 0.0  ;;  %v5546_v16 = vpop.f32.mrb[44].mxu0 }
 0x151   : > { %v1273_v53 = vadd.f32 %v5546_v16, %v6490_v48  ;;  %v1267_v55 = vpop.f32.mrb[45].mxu0  ;;  %v663_v16 = vld [vmem:[%s6159_s17 + $0x68] sm:$0xff] }
 0x152   : > { %v1268_v56 = vadd.f32 %v6490_v48, %v1267_v55  ;;  %5641 = vmatprep.mubr.msk.f32.mxu1 %vm788_vm0, %v1408_v50 }
 0x153   : > { %5642 = vmatmul.mubr.msk.f32.gmra.mrb[58].mxu1 %vm788_vm0, %v1409_v51  ;;  %v1411_v62 = vmax.f32 %v1273_v53, 0.0  ;;  %v664_v53 = vld [vmem:[%s6159_s17 + $0x70] sm:$0xff] }
 0x154   : > { %v1410_v58 = vmax.f32 %v1268_v56, 0.0  ;;  %v5549_v60 = vpop.f32.mrb[46].mxu0 }
 0x155   : > { %v1283_v63 = vadd.f32 %v5549_v60, %v6490_v48  ;;  %v1277_v0 = vpop.f32.mrb[47].mxu0  ;;  %v666_v60 = vld [vmem:[%s6159_s17 + $0x80] sm:$0xff] }
 0x156   : > { %v1278_v1 = vadd.f32 %v6490_v48, %v1277_v0  ;;  %5644 = vmatprep.mubr.msk.f32.mxu1 %vm788_vm0, %v1410_v58  ;;  %v653_v48 = vld [vmem:[%s6159_s17 + $0x18] sm:$0xff]  ;;  %v667_v0 = vld [vmem:[%s6159_s17 + $0x88] sm:$0xff] }
 0x157   : > { %5645 = vmatmul.mubr.msk.f32.gmra.mrb[60].mxu1 %vm788_vm0, %v1411_v62  ;;  %v1413_v9 = vmax.f32 %v1283_v63, 0.0  ;;  %v665_v58 = vld [vmem:[%s6159_s17 + $0x78] sm:$0xff] }
 0x158   : > { %v1412_v2 = vmax.f32 %v1278_v1, 0.0 }
 0x15a   : > { %5647 = vmatprep.mubr.msk.f32.mxu1 %vm788_vm0, %v1412_v2  ;;  %v668_v2 = vld [vmem:[%s6159_s17 + $0x90] sm:$0xff] }
 0x15b   : > { %5648 = vmatmul.mubr.msk.f32.gmra.mrb[62].mxu1 %vm788_vm0, %v1413_v9  ;;  %v670_v9 = vld [vmem:[%s6159_s17 + $0xa0] sm:$0xff] }
 0x15c   : > { %5650 = vmatprep.mubr.msk.f32.mxu1 %vm788_vm0, %v1414_v4  ;;  %v5978_v4 = vld [vmem:[%s7706_s11] sm:$0xff]  }
 0x15d   : > { %5844 = vmatprep.subr.bf16.mxu0 %v5978_v4 }
 0x15e   : > { %5845 = vmatpush3.bf16.msra.mxu0 %v5978_v4  ;;  %v5982_v4 = vld [vmem:[%s7706_s11 + $0x20] sm:$0xff]  }
 0x15f   : > { %5651 = vmatmul.mubr.msk.f32.gmra.mrb[64].mxu1 %vm788_vm0, %v1415_v14  ;;  %v671_v14 = vld [vmem:[%s6159_s17 + $0xa8] sm:$0xff]  ;;  %5846 = vmatprep.subr.bf16.mxu0 %v5979_v59 }
 0x160   : > { %5653 = vmatprep.mubr.msk.f32.mxu1 %vm788_vm0, %v1416_v43 }
 0x162   : > { %5847 = vmatpush3.bf16.msra.mxu0 %v5979_v59 }
 0x163   : > { %5654 = vmatmul.mubr.msk.f32.gmra.mrb[66].mxu1 %vm788_vm0, %v1417_v17  ;;  %v674_v17 = vld [vmem:[%s6159_s17 + $0xc0] sm:$0xff] }
 0x164   : > { %5656 = vmatprep.mubr.msk.f32.mxu1 %vm788_vm0, %v1418_v57  ;;  %v672_v57 = vld [vmem:[%s6159_s17 + $0xb0] sm:$0xff] }
 0x167   : > { %5657 = vmatmul.mubr.msk.f32.gmra.mrb[68].mxu1 %vm788_vm0, %v1419_v6  ;;  %v675_v6 = vld [vmem:[%s6159_s17 + $0xc8] sm:$0xff] }
 0x168   : > { %5659 = vmatprep.mubr.msk.f32.mxu1 %vm788_vm0, %v1420_v19 }
 0x16b   : > { %5660 = vmatmul.mubr.msk.f32.gmra.mrb[70].mxu1 %vm788_vm0, %v1421_v21  ;;  %v677_v21 = vld [vmem:[%s6159_s17 + $0xd8] sm:$0xff] }
 0x16c   : > { %5662 = vmatprep.mubr.msk.f32.mxu1 %vm788_vm0, %v1422_v22  ;;  %v676_v22 = vld [vmem:[%s6159_s17 + $0xd0] sm:$0xff] }
 0x16f   : > { %5663 = vmatmul.mubr.msk.f32.gmra.mrb[72].mxu1 %vm788_vm0, %v1423_v35 }
 0x170   : > { %5665 = vmatprep.mubr.msk.f32.mxu1 %vm788_vm0, %v1424_v25 }
 0x173   : > { %5666 = vmatmul.mubr.msk.f32.gmra.mrb[74].mxu1 %vm788_vm0, %v1425_v27  ;;  %v681_v27 = vld [vmem:[%s6159_s17 + $0xf8] sm:$0xff] }
 0x174   : > { %5668 = vmatprep.mubr.msk.f32.mxu1 %vm788_vm0, %v1426_v52 }
 0x177   : > { %5669 = vmatmul.mubr.msk.f32.gmra.mrb[76].mxu1 %vm788_vm0, %v1427_v37 }
 0x178   : > { %5671 = vmatprep.mubr.msk.f32.mxu1 %vm788_vm0, %v1428_v3 }
 0x17b   : > { %5672 = vmatmul.mubr.msk.f32.gmra.mrb[78].mxu1 %vm788_vm0, %v1429_v20  ;;  %v683_v20 = vld [vmem:[%s6159_s17 + $0x108] sm:$0xff] }
 0x17c   : > { %5748 = vmatprep.mubr.msk.f32.mxu1 %vm7715_vm5, %v650_v30 }
 0x17f   : > { %5749 = vmatmul.mubr.msk.f32.vlgmr.msra.gmra.mrb[80].mxu1 %vm7715_vm5, %v651_v54  ;;  %v6761_v42 = vpop.f32.mrb[48].mxu0  ;;  %v684_v54 = vld [vmem:[%s6159_s17 + $0x110] sm:$0xff] }
 0x180   : > { %5751 = vmatprep.mubr.msk.f32.mxu1 %vm7715_vm5, %v652_v32  ;;  %v6765_v46 = vpop.f32.mrb[49].mxu0  ;;  %v5980_v32 = vld [vmem:[%s7706_s11 + $0x10] sm:$0xff]  }
 0x181   : > { %v6768_v13 = vpop.f32.mrb[50].mxu0  ;;  %5848 = vmatprep.subr.bf16.mxu0 %v5980_v32 }
 0x182   : > { %v6770_v49 = vpop.f32.mrb[51].mxu0  ;;  %5849 = vmatpush3.bf16.msra.mxu0 %v5980_v32  ;;  %v698_v32 = vld [vmem:[%s6159_s17 + $0x180] sm:$0xff] }
 0x183   : > { %5752 = vmatmul.mubr.msk.f32.gmra.mrb[82].mxu1 %vm7715_vm5, %v653_v48  ;;  %v685_v48 = vld [vmem:[%s6159_s17 + $0x118] sm:$0xff] }
 0x184   : > { %5754 = vmatprep.mubr.msk.f32.mxu1 %vm7715_vm5, %v654_v5  ;;  %v686_v5 = vld [vmem:[%s6159_s17 + $0x120] sm:$0xff] }
 0x187   : > { %5755 = vmatmul.mubr.msk.f32.gmra.mrb[84].mxu1 %vm7715_vm5, %v655_v33  ;;  %v6773_v50 = vpop.f32.mrb[52].mxu0 }
 0x188   : > { %5757 = vmatprep.mubr.msk.f32.mxu1 %vm7715_vm5, %v656_v34  ;;  %v6777_v51 = vpop.f32.mrb[53].mxu0 }
 0x189   : > { %v6780_v55 = vpop.f32.mrb[54].mxu0 }
 0x18a   : > { %v6782_v56 = vpop.f32.mrb[55].mxu0 }
 0x18b   : > { %5758 = vmatmul.mubr.msk.f32.gmra.mrb[86].mxu1 %vm7715_vm5, %v657_v36 }
 0x18c   : > { %5760 = vmatprep.mubr.msk.f32.mxu1 %vm7715_vm5, %v658_v38  ;;  %v687_v38 = vld [vmem:[%s6159_s17 + $0x128] sm:$0xff] }
 0x18f   : > { %5761 = vmatmul.mubr.msk.f32.gmra.mrb[88].mxu1 %vm7715_vm5, %v659_v39  ;;  %v6788_v61 = vpop.f32.mrb[56].mxu0 }
 0x190   : > { %5763 = vmatprep.mubr.msk.f32.mxu1 %vm7715_vm5, %v660_v40  ;;  %v6790_v62 = vpop.f32.mrb[57].mxu0  ;;  %v688_v40 = vld [vmem:[%s6159_s17 + $0x130] sm:$0xff] }
 0x191   : > { %v6793_v63 = vpop.f32.mrb[58].mxu0 }
 0x192   : > { %v6797_v1 = vpop.f32.mrb[59].mxu0 }
 0x193   : > { %5764 = vmatmul.mubr.msk.f32.gmra.mrb[90].mxu1 %vm7715_vm5, %v661_v44  ;;  %v689_v44 = vld [vmem:[%s6159_s17 + $0x138] sm:$0xff] }
 0x194   : > { %5766 = vmatprep.mubr.msk.f32.mxu1 %vm7715_vm5, %v662_v47  ;;  %v5981_v47 = vld [vmem:[%s7706_s11 + $0x18] sm:$0xff]  }
 0x195   : > { %5850 = vmatprep.subr.bf16.mxu0 %v5981_v47 }
 0x196   : > { %5851 = vmatpush3.bf16.msra.mxu0 %v5981_v47  ;;  %v699_v47 = vld [vmem:[%s6159_s17 + $0x188] sm:$0xff] }
 0x197   : > { %5767 = vmatmul.mubr.msk.f32.gmra.mrb[92].mxu1 %vm7715_vm5, %v663_v16  ;;  %v6807_v11 = vpop.f32.mrb[60].mxu0  ;;  %v690_v16 = vld [vmem:[%s6159_s17 + $0x140] sm:$0xff]  ;;  %5852 = vmatprep.subr.bf16.mxu0 %v5982_v4 }
 0x198   : > { %5769 = vmatprep.mubr.msk.f32.mxu1 %vm7715_vm5, %v664_v53  ;;  %v6809_v43 = vpop.f32.mrb[61].mxu0 }
 0x199   : > { %v6812_v12 = vpop.f32.mrb[62].mxu0 }
 0x19a   : > { %v6816_v15 = vpop.f32.mrb[63].mxu0  ;;  %5853 = vmatpush3.bf16.msra.mxu0 %v5982_v4 }
 0x19b   : > { %5770 = vmatmul.mubr.msk.f32.gmra.mrb[94].mxu1 %vm7715_vm5, %v665_v58 }
 0x19c   : > { %5772 = vmatprep.mubr.msk.f32.mxu1 %vm7715_vm5, %v666_v60 }
 0x19f   : > { %5773 = vmatmul.mubr.msk.f32.gmra.mrb[96].mxu1 %vm7715_vm5, %v667_v0  ;;  %v6823_v18 = vpop.f32.mrb[64].mxu0  ;;  %v691_v0 = vld [vmem:[%s6159_s17 + $0x148] sm:$0xff] }
 0x1a0   : > { %5775 = vmatprep.mubr.msk.f32.mxu1 %vm7715_vm5, %v668_v2  ;;  %v6825_v19 = vpop.f32.mrb[65].mxu0 }
 0x1a1   : > { %v6828_v45 = vpop.f32.mrb[66].mxu0 }
 0x1a2   : > { %v6832_v41 = vpop.f32.mrb[67].mxu0 }
 0x1a3   : > { %5776 = vmatmul.mubr.msk.f32.gmra.mrb[98].mxu1 %vm7715_vm5, %v669_v7  ;;  %v692_v7 = vld [vmem:[%s6159_s17 + $0x150] sm:$0xff] }
 0x1a4   : > { %5778 = vmatprep.mubr.msk.f32.mxu1 %vm7715_vm5, %v670_v9  ;;  %v693_v9 = vld [vmem:[%s6159_s17 + $0x158] sm:$0xff] }
 0x1a7   : > { %5779 = vmatmul.mubr.msk.f32.gmra.mrb[100].mxu1 %vm7715_vm5, %v671_v14  ;;  %v6842_v25 = vpop.f32.mrb[68].mxu0  ;;  %v5983_v14 = vld [vmem:[%s7706_s11 + $0x28] sm:$0xff]  }
 0x1a8   : > { %5781 = vmatprep.mubr.msk.f32.mxu1 %vm7715_vm5, %v672_v57  ;;  %v6844_v8 = vpop.f32.mrb[69].mxu0  ;;  %v694_v57 = vld [vmem:[%s6159_s17 + $0x160] sm:$0xff]  ;;  %5854 = vmatprep.subr.bf16.mxu0 %v5983_v14 }
 0x1a9   : > { %v6847_v35 = vpop.f32.mrb[70].mxu0  ;;  %5855 = vmatpush3.bf16.msra.mxu0 %v5983_v14  ;;  %v702_v14 = vld [vmem:[%s6159_s17 + $0x1a0] sm:$0xff] }
 0x1aa   : > { %v6851_v52 = vpop.f32.mrb[71].mxu0 }
 0x1ab   : > { %5782 = vmatmul.mubr.msk.f32.gmra.mrb[102].mxu1 %vm7715_vm5, %v673_v31 }
 0x1ac   : > { %5784 = vmatprep.mubr.msk.f32.mxu1 %vm7715_vm5, %v674_v17 }
 0x1af   : > { %5785 = vmatmul.mubr.msk.f32.gmra.mrb[104].mxu1 %vm7715_vm5, %v675_v6  ;;  %v6858_v3 = vpop.f32.mrb[72].mxu0 }
 0x1b0   : > { %5787 = vmatprep.mubr.msk.f32.mxu1 %vm7715_vm5, %v676_v22  ;;  %7722 = vst [vmem:[#allocation6_spill] sm:$0xff] %v6858_v3  ;;  %v6860_v37 = vpop.f32.mrb[73].mxu0 }
 0x1b1   : > { %7723 = vst [vmem:[#allocation7_spill] sm:$0xff] %v6860_v37  ;;  %v6863_v29 = vpop.f32.mrb[74].mxu0 }
 0x1b2   : > { %7724 = vst [vmem:[#allocation8_spill] sm:$0xff] %v6863_v29  ;;  %v6867_v30 = vpop.f32.mrb[75].mxu0 }
 0x1b3   : > { %5788 = vmatmul.mubr.msk.f32.gmra.mrb[106].mxu1 %vm7715_vm5, %v677_v21  ;;  %7725 = vst [vmem:[#allocation9_spill] sm:$0xff] %v6867_v30  ;;  %v695_v21 = vld [vmem:[%s6159_s17 + $0x168] sm:$0xff] }
 0x1b4   : > { %5790 = vmatprep.mubr.msk.f32.mxu1 %vm7715_vm5, %v678_v24 }
 0x1b7   : > { %5791 = vmatmul.mubr.msk.f32.gmra.mrb[108].mxu1 %vm7715_vm5, %v679_v26  ;;  %v6877_v33 = vpop.f32.mrb[76].mxu0  ;;  %v5984_v26 = vld [vmem:[%s7706_s11 + $0x30] sm:$0xff]  }
 0x1b8   : > { %5793 = vmatprep.mubr.msk.f32.mxu1 %vm7715_vm5, %v680_v23  ;;  %7726 = vst [vmem:[#allocation10_spill] sm:$0xff] %v6877_v33  ;;  %v6879_v34 = vpop.f32.mrb[77].mxu0  ;;  %v696_v23 = vld [vmem:[%s6159_s17 + $0x170] sm:$0xff]  ;;  %5856 = vmatprep.subr.bf16.mxu0 %v5984_v26 }
 0x1b9   : > { %7727 = vst [vmem:[#allocation11_spill] sm:$0xff] %v6879_v34  ;;  %v6882_v36 = vpop.f32.mrb[78].mxu0  ;;  %5857 = vmatpush3.bf16.msra.mxu0 %v5984_v26 }
 0x1ba   : > { %7728 = vst [vmem:[#allocation12_spill] sm:$0xff] %v6882_v36  ;;  %v6886_v39 = vpop.f32.mrb[79].mxu0 }
 0x1bb   : > { %5794 = vmatmul.mubr.msk.f32.gmra.mrb[110].mxu1 %vm7715_vm5, %v681_v27  ;;  %7729 = vst [vmem:[#allocation13_spill] sm:$0xff] %v6886_v39 }
 0x1bc   : > { %5796 = vmatprep.mubr.msk.f32.mxu1 %vm7715_vm5, %v682_v28 }
 0x1bf   : > { %5797 = vmatmul.mubr.msk.f32.gmra.mrb[112].mxu1 %vm7715_vm5, %v683_v20  ;;  %v6896_v53 = vpop.f32.mrb[80].mxu0  ;;  %v697_v20 = vld [vmem:[%s6159_s17 + $0x178] sm:$0xff] }
 0x1c0   : > { %5799 = vmatprep.mubr.msk.f32.mxu1 %vm7715_vm5, %v684_v54  ;;  %7730 = vst [vmem:[#allocation14_spill] sm:$0xff] %v6896_v53  ;;  %v6898_v58 = vpop.f32.mrb[81].mxu0  ;;  %v5985_v54 = vld [vmem:[%s7706_s11 + $0x38] sm:$0xff]  }
 0x1c1   : > { %7731 = vst [vmem:[#allocation15_spill] sm:$0xff] %v6898_v58  ;;  %v6901_v60 = vpop.f32.mrb[82].mxu0  ;;  %5858 = vmatprep.subr.bf16.mxu0 %v5985_v54 }
 0x1c2   : > { %7732 = vst [vmem:[#allocation16_spill] sm:$0xff] %v6901_v60  ;;  %v6905_v2 = vpop.f32.mrb[83].mxu0  ;;  %5859 = vmatpush3.bf16.msra.mxu0 %v5985_v54  ;;  %v703_v54 = vld [vmem:[%s6159_s17 + $0x1a8] sm:$0xff] }
 0x1c3   : > { %5800 = vmatmul.mubr.msk.f32.gmra.mrb[114].mxu1 %vm7715_vm5, %v685_v48  ;;  %7733 = vst [vmem:[#allocation17_spill] sm:$0xff] %v6905_v2 }
 0x1c4   : > { %5802 = vmatprep.mubr.msk.f32.mxu1 %vm7715_vm5, %v686_v5 }
 0x1c7   : > { %5803 = vmatmul.mubr.msk.f32.gmra.mrb[116].mxu1 %vm7715_vm5, %v687_v38  ;;  %v6918_v31 = vpop.f32.mrb[84].mxu0 }
 0x1c8   : > { %5805 = vmatprep.mubr.msk.f32.mxu1 %vm7715_vm5, %v688_v40  ;;  %7734 = vst [vmem:[#allocation18_spill] sm:$0xff] %v6918_v31  ;;  %v6922_v6 = vpop.f32.mrb[85].mxu0 }
 0x1c9   : > { %7735 = vst [vmem:[#allocation19_spill] sm:$0xff] %v6922_v6  ;;  %v6927_v59 = vpop.f32.mrb[86].mxu0 }
 0x1ca   : > { %7736 = vst [vmem:[#allocation20_spill] sm:$0xff] %v6927_v59  ;;  %v6931_v24 = vpop.f32.mrb[87].mxu0 }
 0x1cb   : > { %5806 = vmatmul.mubr.msk.f32.gmra.mrb[118].mxu1 %vm7715_vm5, %v689_v44  ;;  %7737 = vst [vmem:[#allocation21_spill] sm:$0xff] %v6931_v24 }
 0x1cc   : > { %5808 = vmatprep.mubr.msk.f32.mxu1 %vm7715_vm5, %v690_v16 }
 0x1cf   : > { %5809 = vmatmul.mubr.msk.f32.gmra.mrb[120].mxu1 %vm7715_vm5, %v691_v0  ;;  %v700_v0 = vld [vmem:[%s6159_s17 + $0x190] sm:$0xff] }
 0x1d0   : > { %5811 = vmatprep.mubr.msk.f32.mxu1 %vm7715_vm5, %v692_v7 }
 0x1d2   : > { %v6920_v17 = vpop.f32.mrb[16].mxu1 }
 0x1d3   : > { %v6924_v22 = vpop.f32.mrb[17].mxu1  ;;  %5812 = vmatmul.mubr.msk.f32.gmra.mrb[122].mxu1 %vm7715_vm5, %v693_v9  ;;  %v701_v9 = vld [vmem:[%s6159_s17 + $0x198] sm:$0xff] }
 0x1d4   : > { %5814 = vmatprep.mubr.msk.f32.mxu1 %vm7715_vm5, %v694_v57 }
 0x1d6   : > { %v6937_v27 = vpop.f32.mrb[18].mxu1  ;;  %v6948_v48 = vpop.f32.mrb[88].mxu0 }
 0x1d7   : > { %v6939_v28 = vpop.f32.mrb[19].mxu1  ;;  %5815 = vmatmul.mubr.msk.f32.gmra.mrb[124].mxu1 %vm7715_vm5, %v695_v21  ;;  %7738 = vst [vmem:[#allocation22_spill] sm:$0xff] %v6948_v48  ;;  %v6952_v38 = vpop.f32.mrb[89].mxu0 }
 0x1d8   : > { %5817 = vmatprep.mubr.msk.f32.mxu1 %vm7715_vm5, %v696_v23  ;;  %7739 = vst [vmem:[#allocation23_spill] sm:$0xff] %v6952_v38  ;;  %v6957_v44 = vpop.f32.mrb[90].mxu0 }
 0x1d9   : > { %7740 = vst [vmem:[#allocation24_spill] sm:$0xff] %v6957_v44  ;;  %v6961_v16 = vpop.f32.mrb[91].mxu0  ;;  %v708_v44 = vld [vmem:[%s6159_s17 + $0x1d0] sm:$0xff] }
 0x1da   : > { %v6950_v5 = vpop.f32.mrb[20].mxu1  ;;  %7741 = vst [vmem:[#allocation25_spill] sm:$0xff] %v6961_v16 }
 0x1db   : > { %v6954_v40 = vpop.f32.mrb[21].mxu1  ;;  %5818 = vmatmul.mubr.msk.f32.gmra.mrb[126].mxu1 %vm7715_vm5, %v697_v20 }
 0x1dc   : > { %5820 = vmatprep.mubr.msk.f32.mxu1 %vm7715_vm5, %v698_v32 }
 0x1de   : > { %v6964_v4 = vpop.f32.mrb[22].mxu1  ;;  %v6972_v57 = vpop.f32.mrb[92].mxu0 }
 0x1df   : > { %v6966_v7 = vpop.f32.mrb[23].mxu1  ;;  %5821 = vmatmul.mubr.msk.f32.gmra.mrb[128].mxu1 %vm7715_vm5, %v699_v47  ;;  %7742 = vst [vmem:[#allocation26_spill] sm:$0xff] %v6972_v57  ;;  %v6976_v26 = vpop.f32.mrb[93].mxu0  ;;  %v704_v47 = vld [vmem:[%s6159_s17 + $0x1b0] sm:$0xff]  ;;  %v705_v57 = vld [vmem:[%s6159_s17 + $0x1b8] sm:$0xff] }
 0x1e0   : > { %5823 = vmatprep.mubr.msk.f32.mxu1 %vm7715_vm5, %v700_v0  ;;  %7743 = vst [vmem:[#allocation27_spill] sm:$0xff] %v6976_v26  ;;  %v6981_v20 = vpop.f32.mrb[94].mxu0 }
 0x1e1   : > { %7744 = vst [vmem:[#allocation28_spill] sm:$0xff] %v6981_v20  ;;  %v6985_v32 = vpop.f32.mrb[95].mxu0 }
 0x1e2   : > { %v6974_v21 = vpop.f32.mrb[24].mxu1  ;;  %7745 = vst [vmem:[#allocation29_spill] sm:$0xff] %v6985_v32 }
 0x1e3   : > { %v6978_v23 = vpop.f32.mrb[25].mxu1  ;;  %5824 = vmatmul.mubr.msk.f32.gmra.mrb[130].mxu1 %vm7715_vm5, %v701_v9  ;;  %v706_v9 = vld [vmem:[%s6159_s17 + $0x1c0] sm:$0xff] }
 0x1e4   : > { %5826 = vmatprep.mubr.msk.f32.mxu1 %vm7715_vm5, %v702_v14 }
 0x1e6   : > { %v6988_v0 = vpop.f32.mrb[26].mxu1  ;;  %v6996_v20 = vpop.f32.mrb[96].mxu0 }
 0x1e7   : > { %v6990_v10 = vpop.f32.mrb[27].mxu1  ;;  %5827 = vmatmul.mubr.msk.f32.gmra.mrb[132].mxu1 %vm7715_vm5, %v703_v54  ;;  %7746 = vst [vmem:[#allocation30_spill] sm:$0xff] %v6996_v20  ;;  %v7000_v26 = vpop.f32.mrb[97].mxu0  ;;  %v707_v54 = vld [vmem:[%s6159_s17 + $0x1c8] sm:$0xff] }
 0x1e8   : > { %5829 = vmatprep.mubr.msk.f32.mxu1 %vm7715_vm5, %v704_v47  ;;  %7747 = vst [vmem:[#allocation31_spill] sm:$0xff] %v7000_v26  ;;  %v7005_v48 = vpop.f32.mrb[98].mxu0  ;;  %v709_v26 = vld [vmem:[%s6159_s17 + $0x1d8] sm:$0xff] }
 0x1e9   : > { %7748 = vst [vmem:[#allocation32_spill] sm:$0xff] %v7005_v48  ;;  %v7009_v47 = vpop.f32.mrb[99].mxu0 }
 0x1ea   : > { %v6998_v14 = vpop.f32.mrb[28].mxu1  ;;  %7749 = vst [vmem:[#allocation33_spill] sm:$0xff] %v7009_v47 }
 0x1eb   : > { %v7002_v32 = vpop.f32.mrb[29].mxu1  ;;  %5830 = vmatmul.mubr.msk.f32.gmra.mrb[134].mxu1 %vm7715_vm5, %v705_v57  ;;  %v710_v57 = vld [vmem:[%s6159_s17 + $0x1e0] sm:$0xff] }
 0x1ec   : > { %5832 = vmatprep.mubr.msk.f32.mxu1 %vm7715_vm5, %v706_v9 }
 0x1ee   : > { %v7012_v38 = vpop.f32.mrb[30].mxu1  ;;  %v7020_v48 = vpop.f32.mrb[100].mxu0 }
 0x1ef   : > { %v7014_v20 = vpop.f32.mrb[31].mxu1  ;;  %5833 = vmatmul.mubr.msk.f32.gmra.mrb[136].mxu1 %vm7715_vm5, %v707_v54  ;;  %7750 = vst [vmem:[#allocation34_spill] sm:$0xff] %v7020_v48  ;;  %v7024_v16 = vpop.f32.mrb[101].mxu0  ;;  %v711_v54 = vld [vmem:[%s6159_s17 + $0x1e8] sm:$0xff]  ;;  %v713_v48 = vld [vmem:[%s6159_s17 + $0x1f8] sm:$0xff] }
 0x1f0   : > { %5835 = vmatprep.mubr.msk.f32.mxu1 %vm7715_vm5, %v708_v44  ;;  %7751 = vst [vmem:[#allocation35_spill] sm:$0xff] %v7024_v16  ;;  %v7029_v31 = vpop.f32.mrb[102].mxu0  ;;  %v712_v44 = vld [vmem:[%s6159_s17 + $0x1f0] sm:$0xff] }
 0x1f1   : > { %7752 = vst [vmem:[#allocation36_spill] sm:$0xff] %v7029_v31  ;;  %v7033_v59 = vpop.f32.mrb[103].mxu0 }
 0x1f2   : > { %v7022_v9 = vpop.f32.mrb[32].mxu1  ;;  %7753 = vst [vmem:[#allocation37_spill] sm:$0xff] %v7033_v59 }
 0x1f3   : > { %v7026_v47 = vpop.f32.mrb[33].mxu1  ;;  %5836 = vmatmul.mubr.msk.f32.gmra.mrb[138].mxu1 %vm7715_vm5, %v709_v26 }
 0x1f4   : > { %5838 = vmatprep.mubr.msk.f32.mxu1 %vm7715_vm5, %v710_v57 }
 0x1f6   : > { %v7036_v6 = vpop.f32.mrb[34].mxu1  ;;  %v7043_v16 = vpop.f32.mrb[104].mxu0 }
 0x1f7   : > { %v7038_v24 = vpop.f32.mrb[35].mxu1  ;;  %5839 = vmatmul.mubr.msk.f32.gmra.mrb[140].mxu1 %vm7715_vm5, %v711_v54  ;;  %7754 = vst [vmem:[#allocation38_spill] sm:$0xff] %v7043_v16  ;;  %v7047_v31 = vpop.f32.mrb[105].mxu0 }
 0x1f8   : > { %5841 = vmatprep.mubr.msk.f32.mxu1 %vm7715_vm5, %v712_v44  ;;  %7755 = vst [vmem:[#allocation39_spill] sm:$0xff] %v7047_v31  ;;  %v7052_v59 = vpop.f32.mrb[106].mxu0 }
 0x1f9   : > { %7756 = vst [vmem:[#allocation40_spill] sm:$0xff] %v7052_v59  ;;  %v7054_v53 = vpop.f32.mrb[107].mxu0 }
 0x1fa   : > { %v7045_v26 = vpop.f32.mrb[36].mxu1  ;;  %7757 = vst [vmem:[#allocation41_spill] sm:$0xff] %v7054_v53 }
 0x1fb   : > { %v7049_v57 = vpop.f32.mrb[37].mxu1  ;;  %5842 = vmatmul.mubr.msk.f32.gmra.mrb[142].mxu1 %vm7715_vm5, %v713_v48 }
 0x1fe   : > { %v7056_v60 = vpop.f32.mrb[38].mxu1  ;;  %v7060_v44 = vpop.f32.mrb[108].mxu0 }
 0x1ff   : > { %v7058_v54 = vpop.f32.mrb[39].mxu1  ;;  %7758 = vst [vmem:[#allocation42_spill] sm:$0xff] %v7060_v44  ;;  %v7064_v16 = vpop.f32.mrb[109].mxu0 }
 0x200   : > { %7759 = vst [vmem:[#allocation43_spill] sm:$0xff] %v7064_v16  ;;  %v7068_v31 = vpop.f32.mrb[110].mxu0 }
 0x201   : > { %7761 = vst [vmem:[#allocation45_spill] sm:$0xff] %v7068_v31  ;;  %v7070_v33 = vpop.f32.mrb[111].mxu0 }
 0x202   : > { %v7062_v58 = vpop.f32.mrb[40].mxu1  ;;  %7762 = vst [vmem:[#allocation46_spill] sm:$0xff] %v7070_v33 }
 0x203   : > { %v7066_v2 = vpop.f32.mrb[41].mxu1 }
 0x204   : > { %7760 = vst [vmem:[#allocation44_spill] sm:$0xff] %v7066_v2 }
 0x206   : > { %v7072_v48 = vpop.f32.mrb[42].mxu1 }
 0x207   : > { %7763 = vst [vmem:[#allocation47_spill] sm:$0xff] %v7072_v48  ;;  %v7074_v59 = vpop.f32.mrb[43].mxu1 }
 0x208   : > { %7764 = vst [vmem:[#allocation48_spill] sm:$0xff] %v7074_v59 }
 0x20a   : > { %v7076_v53 = vpop.f32.mrb[44].mxu1 }
 0x20b   : > { %7765 = vst [vmem:[#allocation49_spill] sm:$0xff] %v7076_v53  ;;  %v7078_v36 = vpop.f32.mrb[45].mxu1 }
 0x20c   : > { %7766 = vst [vmem:[#allocation50_spill] sm:$0xff] %v7078_v36 }
 0x20e   : > { %v7080_v34 = vpop.f32.mrb[46].mxu1 }
 0x20f   : > { %7767 = vst [vmem:[#allocation51_spill] sm:$0xff] %v7080_v34  ;;  %v7082_v44 = vpop.f32.mrb[47].mxu1 }
 0x210   : > { %7768 = vst [vmem:[#allocation52_spill] sm:$0xff] %v7082_v44 }
 0x212   : > { %v7084_v39 = vpop.f32.mrb[48].mxu1 }
 0x213   : > { %7769 = vst [vmem:[#allocation53_spill] sm:$0xff] %v7084_v39  ;;  %v7086_v16 = vpop.f32.mrb[49].mxu1 }
 0x214   : > { %7770 = vst [vmem:[#allocation54_spill] sm:$0xff] %v7086_v16 }
 0x216   : > { %v7088_v3 = vpop.f32.mrb[50].mxu1 }
 0x217   : > { %7771 = vst [vmem:[#allocation55_spill] sm:$0xff] %v7088_v3  ;;  %v7090_v31 = vpop.f32.mrb[51].mxu1 }
 0x218   : > { %7772 = vst [vmem:[#allocation56_spill] sm:$0xff] %v7090_v31 }
 0x21a   : > { %v7092_v33 = vpop.f32.mrb[52].mxu1 }
 0x21b   : > { %7773 = vst [vmem:[#allocation57_spill] sm:$0xff] %v7092_v33  ;;  %v7094_v29 = vpop.f32.mrb[53].mxu1 }
 0x21c   : > { %7774 = vst [vmem:[#allocation58_spill] sm:$0xff] %v7094_v29 }
 0x21e   : > { %v7096_v59 = vpop.f32.mrb[54].mxu1 }
 0x21f   : > { %7775 = vst [vmem:[#allocation59_spill] sm:$0xff] %v7096_v59  ;;  %v7098_v53 = vpop.f32.mrb[55].mxu1 }
 0x220   : > { %7776 = vst [vmem:[#allocation60_spill] sm:$0xff] %v7098_v53 }
 0x222   : > { %v7100_v36 = vpop.f32.mrb[56].mxu1 }
 0x223   : > { %7777 = vst [vmem:[#allocation61_spill] sm:$0xff] %v7100_v36  ;;  %v7102_v34 = vpop.f32.mrb[57].mxu1 }
 0x224   : > { %7778 = vst [vmem:[#allocation62_spill] sm:$0xff] %v7102_v34 }
 0x226   : > { %v7104_v44 = vpop.f32.mrb[58].mxu1 }
 0x227   : > { %7779 = vst [vmem:[#allocation63_spill] sm:$0xff] %v7104_v44  ;;  %v7106_v39 = vpop.f32.mrb[59].mxu1 }
 0x228   : > { %7780 = vst [vmem:[#allocation64_spill] sm:$0xff] %v7106_v39 }
 0x22a   : > { %v7108_v16 = vpop.f32.mrb[60].mxu1 }
 0x22b   : > { %7781 = vst [vmem:[#allocation65_spill] sm:$0xff] %v7108_v16  ;;  %v7110_v3 = vpop.f32.mrb[61].mxu1 }
 0x22c   : > { %7782 = vst [vmem:[#allocation66_spill] sm:$0xff] %v7110_v3 }
 0x22e   : > { %v7112_v31 = vpop.f32.mrb[62].mxu1 }
 0x22f   : > { %7783 = vst [vmem:[#allocation67_spill] sm:$0xff] %v7112_v31  ;;  %v7114_v33 = vpop.f32.mrb[63].mxu1 }
 0x230   : > { %7784 = vst [vmem:[#allocation68_spill] sm:$0xff] %v7114_v33 }
 0x232   : > { %v7116_v29 = vpop.f32.mrb[64].mxu1 }
 0x233   : > { %7785 = vst [vmem:[#allocation69_spill] sm:$0xff] %v7116_v29  ;;  %v7118_v59 = vpop.f32.mrb[65].mxu1 }
 0x234   : > { %7786 = vst [vmem:[#allocation70_spill] sm:$0xff] %v7118_v59 }
 0x236   : > { %v7120_v53 = vpop.f32.mrb[66].mxu1 }
 0x237   : > { %7787 = vst [vmem:[#allocation71_spill] sm:$0xff] %v7120_v53  ;;  %v7122_v36 = vpop.f32.mrb[67].mxu1 }
 0x238   : > { %7788 = vst [vmem:[#allocation72_spill] sm:$0xff] %v7122_v36 }
 0x23a   : > { %v7124_v34 = vpop.f32.mrb[68].mxu1 }
 0x23b   : > { %7789 = vst [vmem:[#allocation73_spill] sm:$0xff] %v7124_v34  ;;  %v7126_v44 = vpop.f32.mrb[69].mxu1 }
 0x23c   : > { %7790 = vst [vmem:[#allocation74_spill] sm:$0xff] %v7126_v44 }
 0x23e   : > { %v7128_v39 = vpop.f32.mrb[70].mxu1 }
 0x23f   : > { %7791 = vst [vmem:[#allocation75_spill] sm:$0xff] %v7128_v39  ;;  %v7130_v16 = vpop.f32.mrb[71].mxu1 }
 0x240   : > { %7792 = vst [vmem:[#allocation76_spill] sm:$0xff] %v7130_v16  ;;  %v7151_v16 = vld [vmem:[%s7704_s9] ss:$0 sm:$0xff] }
 0x241   : > { %v1713_v44 = vadd.f32 %v6937_v27, %v7151_v16 }
 0x242   : > { %v7132_v3 = vpop.f32.mrb[72].mxu1 }
 0x243   : > { %7793 = vst [vmem:[#allocation77_spill] sm:$0xff] %v7132_v3  ;;  %v7134_v31 = vpop.f32.mrb[73].mxu1 }
 0x244   : > { %7794 = vst [vmem:[#allocation78_spill] sm:$0xff] %v7134_v31  ;;  %v1703_v31 = vadd.f32 %v6920_v17, %v7151_v16  ;;  %v1708_v17 = vadd.f32 %v7151_v16, %v6939_v28 }
 0x246   : > { %v7136_v33 = vpop.f32.mrb[74].mxu1 }
 0x247   : > { %7795 = vst [vmem:[#allocation79_spill] sm:$0xff] %v7136_v33  ;;  %v7138_v29 = vpop.f32.mrb[75].mxu1 }
 0x248   : > { %7796 = vst [vmem:[#allocation80_spill] sm:$0xff] %v7138_v29 }
 0x24a   : > { %v7140_v59 = vpop.f32.mrb[76].mxu1 }
 0x24b   : > { %7797 = vst [vmem:[#allocation81_spill] sm:$0xff] %v7140_v59  ;;  %v7142_v53 = vpop.f32.mrb[77].mxu1  ;;  %v1698_v59 = vadd.f32 %v7151_v16, %v6924_v22 }
 0x24c   : > { %7798 = vst [vmem:[#allocation82_spill] sm:$0xff] %v7142_v53 }
 0x24e   : > { %v7144_v36 = vpop.f32.mrb[78].mxu1 }
 0x24f   : > { %7799 = vst [vmem:[#allocation83_spill] sm:$0xff] %v7144_v36  ;;  %v7146_v34 = vpop.f32.mrb[79].mxu1 }
 0x250   : > { %7800 = vst [vmem:[#allocation84_spill] sm:$0xff] %v7146_v34 }
 0x252   : > { %v5750_v3 = vpop.f32.mrb[80].mxu1 }
 0x253   : > { %v3436_v33 = vmul.f32 %v5750_v3, %v6770_v49  ;;  %v3116_v29 = vpop.f32.mrb[81].mxu1 }
 0x254   : > { %v3435_v53 = vmul.f32 %v3116_v29, %v6765_v46  ;;  %v1723_v46 = vadd.f32 %v6950_v5, %v7151_v16 }
 0x255   : > { %v3500_v36 = vmul.f32 %v3436_v33, %v1703_v31 }
 0x256   : > { %v3499_v39 = vmul.f32 %v3435_v53, %v1698_v59  ;;  %v5753_v34 = vpop.f32.mrb[82].mxu1 }
 0x257   : > { %v3438_v48 = vmul.f32 %v5753_v34, %v6768_v13  ;;  %v3126_v37 = vpop.f32.mrb[83].mxu1  ;;  %v1718_v13 = vadd.f32 %v7151_v16, %v6954_v40 }
 0x258   : > { %v3437_v49 = vmul.f32 %v6761_v42, %v3126_v37  ;;  %v3563_v3 = vpack.c.bf16 %v3500_v36, %v3499_v39  ;;  %v1733_v37 = vadd.f32 %v6964_v4, %v7151_v16 }
 0x259   : > { %v3502_v2 = vmul.f32 %v3438_v48, %v1713_v44 }
 0x25a   : > { %v3501_v30 = vmul.f32 %v3437_v49, %v1708_v17  ;;  %v5756_v22 = vpop.f32.mrb[84].mxu1  ;;  %5860 = vmatprep.mubr.bf16.mxu0 %v3563_v3  ;;  %v1753_v49 = vadd.f32 %v6988_v0, %v7151_v16 }
 0x25b   : > { %v3440_v29 = vmul.f32 %v5756_v22, %v6782_v56  ;;  %v3136_v33 = vpop.f32.mrb[85].mxu1  ;;  %v1728_v56 = vadd.f32 %v7151_v16, %v6966_v7 }
 0x25c   : > { %v3564_v34 = vpack.c.bf16 %v3502_v2, %v3501_v30  ;;  %v3439_v53 = vmul.f32 %v3136_v33, %v6777_v51  ;;  %v1743_v51 = vadd.f32 %v6974_v21, %v7151_v16  ;;  %v1763_v33 = vadd.f32 %v6998_v14, %v7151_v16 }
 0x25d   : > { %v3504_v31 = vmul.f32 %v3440_v29, %v1723_v46 }
 0x25e   : > { %v3503_v59 = vmul.f32 %v3439_v53, %v1718_v13  ;;  %v5759_v42 = vpop.f32.mrb[86].mxu1  ;;  %5861 = vmatmul.mubr.bf16.vlgmr.msra.gmra.mrb[112].mxu0 %v3564_v34 }
 0x25f   : > { %v3442_v36 = vmul.f32 %v5759_v42, %v6780_v55  ;;  %v3146_v39 = vpop.f32.mrb[87].mxu1  ;;  %v1738_v55 = vadd.f32 %v7151_v16, %v6978_v23 }
 0x260   : > { %v3441_v27 = vmul.f32 %v6773_v50, %v3146_v39  ;;  %v3565_v28 = vpack.c.bf16 %v3504_v31, %v3503_v59  ;;  %v1773_v59 = vadd.f32 %v7012_v38, %v7151_v16 }
 0x261   : > { %v3506_v5 = vmul.f32 %v3442_v36, %v1733_v37 }
 0x262   : > { %v3505_v30 = vmul.f32 %v3441_v27, %v1728_v56  ;;  %v5762_v2 = vpop.f32.mrb[88].mxu1  ;;  %5864 = vmatprep.mubr.bf16.mxu0 %v3565_v28  ;;  %v1783_v56 = vadd.f32 %v7022_v9, %v7151_v16 }
 0x263   : > { %v3444_v40 = vmul.f32 %v5762_v2, %v6797_v1  ;;  %v3156_v44 = vpop.f32.mrb[89].mxu1  ;;  %v1748_v1 = vadd.f32 %v7151_v16, %v6990_v10  ;;  %v1793_v2 = vadd.f32 %v7036_v6, %v7151_v16 }
 0x264   : > { %v3443_v4 = vmul.f32 %v3156_v44, %v6790_v62  ;;  %v3566_v48 = vpack.c.bf16 %v3506_v5, %v3505_v30 }
 0x265   : > { %v3508_v7 = vmul.f32 %v3444_v40, %v1743_v51 }
 0x266   : > { %v3507_v17 = vmul.f32 %v3443_v4, %v1738_v55  ;;  %v5765_v50 = vpop.f32.mrb[90].mxu1  ;;  %5865 = vmatmul.mubr.bf16.gmra.mrb[116].mxu0 %v3566_v48  ;;  %v1803_v4 = vadd.f32 %v7045_v26, %v7151_v16 }
 0x267   : > { %v3446_v3 = vmul.f32 %v5765_v50, %v6793_v63  ;;  %v3166_v22 = vpop.f32.mrb[91].mxu1  ;;  %v1758_v63 = vadd.f32 %v7151_v16, %v7002_v32 }
 0x268   : > { %v3445_v21 = vmul.f32 %v6788_v61, %v3166_v22  ;;  %v3567_v46 = vpack.c.bf16 %v3508_v7, %v3507_v17 }
 0x269   : > { %v3510_v23 = vmul.f32 %v3446_v3, %v1753_v49  ;;  %v1813_v49 = vadd.f32 %v7056_v60, %v7151_v16  ;;  %v7802_v60 = vld [vmem:[#allocation44_spill] sm:$0xff] }
 0x26a   : > { %v3509_v29 = vmul.f32 %v3445_v21, %v1748_v1  ;;  %v5768_v62 = vpop.f32.mrb[92].mxu1  ;;  %5868 = vmatprep.mubr.bf16.mxu0 %v3567_v46  ;;  %v1823_v46 = vadd.f32 %v7062_v58, %v7151_v16  ;;  %v7806_v58 = vld [vmem:[#allocation48_spill] sm:$0xff] }
 0x26b   : > { %v3448_v13 = vmul.f32 %v5768_v62, %v6816_v15  ;;  %v3176_v34 = vpop.f32.mrb[93].mxu1  ;;  %v1768_v15 = vadd.f32 %v7151_v16, %v7014_v20 }
 0x26c   : > { %v3447_v0 = vmul.f32 %v3176_v34, %v6809_v43  ;;  %v3568_v53 = vpack.c.bf16 %v3510_v23, %v3509_v29  ;;  %v7801_v23 = vld [vmem:[#allocation9_spill] sm:$0xff] }
 0x26d   : > { %v3512_v10 = vmul.f32 %v3448_v13, %v1763_v33  ;;  %v7803_v33 = vld [vmem:[#allocation7_spill] sm:$0xff] }
 0x26e   : > { %v3511_v31 = vmul.f32 %v3447_v0, %v1758_v63  ;;  %v5771_v61 = vpop.f32.mrb[94].mxu1  ;;  %5869 = vmatmul.mubr.bf16.gmra.mrb[120].mxu0 %v3568_v53  ;;  %v7804_v0 = vld [vmem:[#allocation47_spill] sm:$0xff] }
 0x26f   : > { %v3450_v42 = vmul.f32 %v5771_v61, %v6812_v12  ;;  %v3186_v37 = vpop.f32.mrb[95].mxu1  ;;  %v1778_v12 = vadd.f32 %v7151_v16, %v7026_v47  ;;  %v1833_v53 = vadd.f32 %v7804_v0, %v7151_v16 }
 0x270   : > { %v3449_v14 = vmul.f32 %v6807_v11, %v3186_v37  ;;  %v3569_v36 = vpack.c.bf16 %v3512_v10, %v3511_v31  ;;  %v7805_v10 = vld [vmem:[#allocation8_spill] sm:$0xff] }
 0x271   : > { %v3514_v32 = vmul.f32 %v3450_v42, %v1773_v59  ;;  %v1828_v59 = vadd.f32 %v7151_v16, %v7806_v58  ;;  %v7807_v42 = vld [vmem:[#allocation6_spill] sm:$0xff] }
 0x272   : > { %v3513_v39 = vmul.f32 %v3449_v14, %v1768_v15  ;;  %v5774_v43 = vpop.f32.mrb[96].mxu1  ;;  %5872 = vmatprep.mubr.bf16.mxu0 %v3569_v36 }
 0x273   : > { %v3452_v27 = vmul.f32 %v5774_v43, %v6832_v41  ;;  %v3196_v28 = vpop.f32.mrb[97].mxu1  ;;  %v1788_v41 = vadd.f32 %v7151_v16, %v7038_v24 }
 0x274   : > { %v3451_v38 = vmul.f32 %v3196_v28, %v6825_v19  ;;  %v3570_v5 = vpack.c.bf16 %v3514_v32, %v3513_v39  ;;  %v7808_v39 = vld [vmem:[#allocation49_spill] sm:$0xff] }
 0x275   : > { %v3516_v20 = vmul.f32 %v3452_v27, %v1783_v56  ;;  %v1843_v43 = vadd.f32 %v7808_v39, %v7151_v16  ;;  %v7809_v56 = vld [vmem:[#allocation13_spill] sm:$0xff] }
 0x276   : > { %v3515_v30 = vmul.f32 %v3451_v38, %v1778_v12  ;;  %v5777_v11 = vpop.f32.mrb[98].mxu1  ;;  %5873 = vmatmul.mubr.bf16.gmra.mrb[124].mxu0 %v3570_v5  ;;  %v7810_v12 = vld [vmem:[#allocation50_spill] sm:$0xff]  ;;  %v7811_v5 = vld [vmem:[#allocation11_spill] sm:$0xff] }
 0x277   : > { %v3454_v51 = vmul.f32 %v5777_v11, %v6828_v45  ;;  %v3206_v40 = vpop.f32.mrb[99].mxu1  ;;  %v1798_v45 = vadd.f32 %v7151_v16, %v7049_v57  ;;  %v1838_v38 = vadd.f32 %v7151_v16, %v7810_v12 }
 0x278   : > { %v3453_v9 = vmul.f32 %v6823_v18, %v3206_v40  ;;  %v3571_v44 = vpack.c.bf16 %v3516_v20, %v3515_v30  ;;  %v7812_v40 = vld [vmem:[#allocation51_spill] sm:$0xff] }
 0x279   : > { %v3518_v47 = vmul.f32 %v3454_v51, %v1793_v2 }
 0x27a   : > { %v3517_v55 = vmul.f32 %v3453_v9, %v1788_v41  ;;  %v5780_v19 = vpop.f32.mrb[100].mxu1  ;;  %5876 = vmatprep.mubr.bf16.mxu0 %v3571_v44  ;;  %v1853_v41 = vadd.f32 %v7812_v40, %v7151_v16  ;;  %v7813_v9 = vld [vmem:[#allocation12_spill] sm:$0xff] }
 0x27b   : > { %v3456_v48 = vmul.f32 %v5780_v19, %v6851_v52  ;;  %v3216_v7 = vpop.f32.mrb[101].mxu1  ;;  %v1808_v52 = vadd.f32 %v7151_v16, %v7058_v54 }
 0x27c   : > { %v3455_v6 = vmul.f32 %v3216_v7, %v6844_v8  ;;  %v3572_v17 = vpack.c.bf16 %v3518_v47, %v3517_v55  ;;  %v7814_v55 = vld [vmem:[#allocation52_spill] sm:$0xff] }
 0x27d   : > { %v3520_v24 = vmul.f32 %v3456_v48, %v1803_v4  ;;  %v1848_v19 = vadd.f32 %v7151_v16, %v7814_v55  ;;  %v7815_v4 = vld [vmem:[#allocation10_spill] sm:$0xff] }
 0x27e   : > { %v3519_v50 = vmul.f32 %v3455_v6, %v1798_v45  ;;  %v5783_v18 = vpop.f32.mrb[102].mxu1  ;;  %5877 = vmatmul.mubr.bf16.gmra.mrb[128].mxu0 %v3572_v17 }
 0x27f   : > { %v3458_v3 = vmul.f32 %v5783_v18, %v6847_v35  ;;  %v3226_v22 = vpop.f32.mrb[103].mxu1  ;;  %v1818_v35 = vadd.f32 %v7151_v16, %v7802_v60  ;;  %v7817_v18 = vld [vmem:[#allocation17_spill] sm:$0xff] }
 0x280   : > { %v3457_v26 = vmul.f32 %v6842_v25, %v3226_v22  ;;  %v3573_v1 = vpack.c.bf16 %v3520_v24, %v3519_v50  ;;  %v7816_v24 = vld [vmem:[#allocation53_spill] sm:$0xff]  ;;  %v7818_v22 = vld [vmem:[#allocation54_spill] sm:$0xff] }
 0x281   : > { %v3522_v57 = vmul.f32 %v3458_v3, %v1813_v49  ;;  %v1863_v50 = vadd.f32 %v7816_v24, %v7151_v16 }
 0x282   : > { %v3521_v21 = vmul.f32 %v3457_v26, %v1808_v52  ;;  %v5786_v8 = vpop.f32.mrb[104].mxu1  ;;  %5880 = vmatprep.mubr.bf16.mxu0 %v3573_v1  ;;  %v1858_v52 = vadd.f32 %v7151_v16, %v7818_v22  ;;  %v7819_v26 = vld [vmem:[#allocation15_spill] sm:$0xff] }
 0x283   : > { %v3460_v29 = vmul.f32 %v5786_v8, %v7801_v23  ;;  %v3236_v62 = vpop.f32.mrb[105].mxu1  ;;  %v7820_v23 = vld [vmem:[#allocation55_spill] sm:$0xff] }
 0x284   : > { %v3459_v13 = vmul.f32 %v3236_v62, %v7803_v33  ;;  %v3574_v34 = vpack.c.bf16 %v3522_v57, %v3521_v21  ;;  %v7821_v62 = vld [vmem:[#allocation16_spill] sm:$0xff] }
 0x285   : > { %v3524_v54 = vmul.f32 %v3460_v29, %v1823_v46  ;;  %v1873_v29 = vadd.f32 %v7820_v23, %v7151_v16  ;;  %v7822_v33 = vld [vmem:[#allocation56_spill] sm:$0xff] }
 0x286   : > { %v3523_v63 = vmul.f32 %v3459_v13, %v1818_v35  ;;  %v5789_v25 = vpop.f32.mrb[106].mxu1  ;;  %5881 = vmatmul.mubr.bf16.gmra.mrb[132].mxu0 %v3574_v34  ;;  %v1868_v13 = vadd.f32 %v7151_v16, %v7822_v33  ;;  %v7823_v34 = vld [vmem:[#allocation14_spill] sm:$0xff] }
 0x287   : > { %v3462_v31 = vmul.f32 %v5789_v25, %v7805_v10  ;;  %v3246_v61 = vpop.f32.mrb[107].mxu1  ;;  %v7824_v10 = vld [vmem:[#allocation57_spill] sm:$0xff] }
 0x288   : > { %v3461_v37 = vmul.f32 %v7807_v42, %v3246_v61  ;;  %v3575_v15 = vpack.c.bf16 %v3524_v54, %v3523_v63  ;;  %v7825_v61 = vld [vmem:[#allocation21_spill] sm:$0xff]  ;;  %v7826_v42 = vld [vmem:[#allocation58_spill] sm:$0xff] }
 0x289   : > { %v3526_v14 = vmul.f32 %v3462_v31, %v1833_v53  ;;  %v1883_v31 = vadd.f32 %v7824_v10, %v7151_v16 }
 0x28a   : > { %v3525_v36 = vmul.f32 %v3461_v37, %v1828_v59  ;;  %v5792_v32 = vpop.f32.mrb[108].mxu1  ;;  %5884 = vmatprep.mubr.bf16.mxu0 %v3575_v15  ;;  %v1878_v37 = vadd.f32 %v7151_v16, %v7826_v42  ;;  %v7827_v15 = vld [vmem:[#allocation19_spill] sm:$0xff] }
 0x28b   : > { %v3464_v27 = vmul.f32 %v5792_v32, %v7809_v56  ;;  %v3256_v28 = vpop.f32.mrb[109].mxu1  ;;  %v7828_v56 = vld [vmem:[#allocation59_spill] sm:$0xff] }
 0x28c   : > { %v3463_v20 = vmul.f32 %v3256_v28, %v7811_v5  ;;  %v3576_v30 = vpack.c.bf16 %v3526_v14, %v3525_v36  ;;  %v7829_v28 = vld [vmem:[#allocation20_spill] sm:$0xff] }
 0x28d   : > { %v3528_v11 = vmul.f32 %v3464_v27, %v1843_v43  ;;  %v1893_v27 = vadd.f32 %v7828_v56, %v7151_v16  ;;  %v7830_v5 = vld [vmem:[#allocation60_spill] sm:$0xff] }
 0x28e   : > { %v3527_v2 = vmul.f32 %v3463_v20, %v1838_v38  ;;  %v5795_v51 = vpop.f32.mrb[110].mxu1  ;;  %5885 = vmatmul.mubr.bf16.gmra.mrb[136].mxu0 %v3576_v30  ;;  %v1888_v20 = vadd.f32 %v7151_v16, %v7830_v5  ;;  %v7831_v30 = vld [vmem:[#allocation18_spill] sm:$0xff] }
 0x28f   : > { %v3466_v44 = vmul.f32 %v5795_v51, %v7813_v9  ;;  %v3266_v47 = vpop.f32.mrb[111].mxu1  ;;  %v7832_v9 = vld [vmem:[#allocation61_spill] sm:$0xff] }
 0x290   : > { %v3465_v48 = vmul.f32 %v7815_v4, %v3266_v47  ;;  %v3577_v7 = vpack.c.bf16 %v3528_v11, %v3527_v2  ;;  %v7833_v47 = vld [vmem:[#allocation25_spill] sm:$0xff]  ;;  %v7834_v4 = vld [vmem:[#allocation62_spill] sm:$0xff] }
 0x291   : > { %v3530_v45 = vmul.f32 %v3466_v44, %v1853_v41  ;;  %v1903_v44 = vadd.f32 %v7832_v9, %v7151_v16 }
 0x292   : > { %v3529_v6 = vmul.f32 %v3465_v48, %v1848_v19  ;;  %v5798_v17 = vpop.f32.mrb[112].mxu1  ;;  %5888 = vmatprep.mubr.bf16.mxu0 %v3577_v7  ;;  %v1898_v48 = vadd.f32 %v7151_v16, %v7834_v4  ;;  %v7835_v7 = vld [vmem:[#allocation23_spill] sm:$0xff] }
 0x293   : > { %v3468_v49 = vmul.f32 %v5798_v17, %v7817_v18  ;;  %v3276_v3 = vpop.f32.mrb[113].mxu1  ;;  %v7836_v18 = vld [vmem:[#allocation63_spill] sm:$0xff] }
 0x294   : > { %v3467_v1 = vmul.f32 %v3276_v3, %v7819_v26  ;;  %v3578_v57 = vpack.c.bf16 %v3530_v45, %v3529_v6  ;;  %v7837_v3 = vld [vmem:[#allocation24_spill] sm:$0xff] }
 0x295   : > { %v3532_v21 = vmul.f32 %v3468_v49, %v1863_v50  ;;  %v1913_v49 = vadd.f32 %v7836_v18, %v7151_v16  ;;  %v7838_v26 = vld [vmem:[#allocation64_spill] sm:$0xff] }
 0x296   : > { %v3531_v8 = vmul.f32 %v3467_v1, %v1858_v52  ;;  %v5801_v46 = vpop.f32.mrb[114].mxu1  ;;  %5889 = vmatmul.mubr.bf16.gmra.mrb[140].mxu0 %v3578_v57  ;;  %v1908_v1 = vadd.f32 %v7151_v16, %v7838_v26  ;;  %v7839_v57 = vld [vmem:[#allocation22_spill] sm:$0xff] }
 0x297   : > { %v3470_v60 = vmul.f32 %v5801_v46, %v7821_v62  ;;  %v3286_v35 = vpop.f32.mrb[115].mxu1  ;;  %v7840_v62 = vld [vmem:[#allocation65_spill] sm:$0xff] }
 0x298   : > { %v3469_v54 = vmul.f32 %v7823_v34, %v3286_v35  ;;  %v3579_v63 = vpack.c.bf16 %v3532_v21, %v3531_v8  ;;  %v7841_v35 = vld [vmem:[#allocation29_spill] sm:$0xff]  ;;  %v7842_v34 = vld [vmem:[#allocation66_spill] sm:$0xff] }
 0x299   : > { %v3534_v25 = vmul.f32 %v3470_v60, %v1873_v29  ;;  %v1923_v60 = vadd.f32 %v7840_v62, %v7151_v16 }
 0x29a   : > { %v3533_v0 = vmul.f32 %v3469_v54, %v1868_v13  ;;  %v5804_v53 = vpop.f32.mrb[116].mxu1  ;;  %5892 = vmatprep.mubr.bf16.mxu0 %v3579_v63  ;;  %v1918_v54 = vadd.f32 %v7151_v16, %v7842_v34  ;;  %v7843_v63 = vld [vmem:[#allocation27_spill] sm:$0xff] }
 0x29b   : > { %v3472_v58 = vmul.f32 %v5804_v53, %v7825_v61  ;;  %v3296_v59 = vpop.f32.mrb[117].mxu1  ;;  %v7844_v61 = vld [vmem:[#allocation67_spill] sm:$0xff] }
 0x29c   : > { %v3471_v14 = vmul.f32 %v3296_v59, %v7827_v15  ;;  %v3580_v36 = vpack.c.bf16 %v3534_v25, %v3533_v0  ;;  %v7845_v59 = vld [vmem:[#allocation28_spill] sm:$0xff] }
 0x29d   : > { %v3536_v32 = vmul.f32 %v3472_v58, %v1883_v31  ;;  %v1933_v58 = vadd.f32 %v7844_v61, %v7151_v16  ;;  %v7846_v15 = vld [vmem:[#allocation68_spill] sm:$0xff] }
 0x29e   : > { %v3535_v39 = vmul.f32 %v3471_v14, %v1878_v37  ;;  %v5807_v43 = vpop.f32.mrb[118].mxu1  ;;  %5893 = vmatmul.mubr.bf16.gmra.mrb[144].mxu0 %v3580_v36  ;;  %v1928_v14 = vadd.f32 %v7151_v16, %v7846_v15  ;;  %v7847_v36 = vld [vmem:[#allocation26_spill] sm:$0xff] }
 0x29f   : > { %v3474_v12 = vmul.f32 %v5807_v43, %v7829_v28  ;;  %v3306_v38 = vpop.f32.mrb[119].mxu1  ;;  %v7848_v28 = vld [vmem:[#allocation69_spill] sm:$0xff] }
 0x2a0   : > { %v3473_v11 = vmul.f32 %v7831_v30, %v3306_v38  ;;  %v3581_v2 = vpack.c.bf16 %v3536_v32, %v3535_v39  ;;  %v7849_v38 = vld [vmem:[#allocation33_spill] sm:$0xff]  ;;  %v7850_v30 = vld [vmem:[#allocation70_spill] sm:$0xff] }
 0x2a1   : > { %v3538_v51 = vmul.f32 %v3474_v12, %v1893_v27  ;;  %v1943_v12 = vadd.f32 %v7848_v28, %v7151_v16 }
 0x2a2   : > { %v3537_v40 = vmul.f32 %v3473_v11, %v1888_v20  ;;  %v5810_v41 = vpop.f32.mrb[120].mxu1  ;;  %5896 = vmatprep.mubr.bf16.mxu0 %v3581_v2  ;;  %v1938_v11 = vadd.f32 %v7151_v16, %v7850_v30  ;;  %v7851_v2 = vld [vmem:[#allocation31_spill] sm:$0xff] }
 0x2a3   : > { %v3476_v55 = vmul.f32 %v5810_v41, %v7833_v47  ;;  %v3316_v19 = vpop.f32.mrb[121].mxu1  ;;  %v7852_v47 = vld [vmem:[#allocation71_spill] sm:$0xff] }
 0x2a4   : > { %v3475_v45 = vmul.f32 %v3316_v19, %v7835_v7  ;;  %v3582_v6 = vpack.c.bf16 %v3538_v51, %v3537_v40  ;;  %v7853_v19 = vld [vmem:[#allocation32_spill] sm:$0xff] }
 0x2a5   : > { %v3540_v17 = vmul.f32 %v3476_v55, %v1903_v44  ;;  %v1953_v55 = vadd.f32 %v7852_v47, %v7151_v16  ;;  %v7854_v7 = vld [vmem:[#allocation72_spill] sm:$0xff] }
 0x2a6   : > { %v3539_v24 = vmul.f32 %v3475_v45, %v1898_v48  ;;  %v5813_v50 = vpop.f32.mrb[122].mxu1  ;;  %5897 = vmatmul.mubr.bf16.gmra.mrb[148].mxu0 %v3582_v6  ;;  %v1948_v45 = vadd.f32 %v7151_v16, %v7854_v7  ;;  %v7855_v6 = vld [vmem:[#allocation30_spill] sm:$0xff] }
 0x2a7   : > { %v3478_v22 = vmul.f32 %v5813_v50, %v7837_v3  ;;  %v3326_v52 = vpop.f32.mrb[123].mxu1  ;;  %v7856_v3 = vld [vmem:[#allocation73_spill] sm:$0xff] }
 0x2a8   : > { %v3477_v21 = vmul.f32 %v7839_v57, %v3326_v52  ;;  %v3583_v8 = vpack.c.bf16 %v3540_v17, %v3539_v24  ;;  %v7857_v52 = vld [vmem:[#allocation37_spill] sm:$0xff]  ;;  %v7858_v57 = vld [vmem:[#allocation74_spill] sm:$0xff] }
 0x2a9   : > { %v3542_v46 = vmul.f32 %v3478_v22, %v1913_v49  ;;  %v1963_v22 = vadd.f32 %v7856_v3, %v7151_v16 }
 0x2aa   : > { %v3541_v23 = vmul.f32 %v3477_v21, %v1908_v1  ;;  %v5816_v29 = vpop.f32.mrb[124].mxu1  ;;  %5900 = vmatprep.mubr.bf16.mxu0 %v3583_v8  ;;  %v1958_v21 = vadd.f32 %v7151_v16, %v7858_v57  ;;  %v7859_v8 = vld [vmem:[#allocation35_spill] sm:$0xff] }
 0x2ab   : > { %v3480_v33 = vmul.f32 %v5816_v29, %v7841_v35  ;;  %v3336_v13 = vpop.f32.mrb[125].mxu1  ;;  %v7860_v35 = vld [vmem:[#allocation75_spill] sm:$0xff] }
 0x2ac   : > { %v3479_v25 = vmul.f32 %v3336_v13, %v7843_v63  ;;  %v3584_v0 = vpack.c.bf16 %v3542_v46, %v3541_v23  ;;  %v7861_v13 = vld [vmem:[#allocation36_spill] sm:$0xff] }
 0x2ad   : > { %v3544_v53 = vmul.f32 %v3480_v33, %v1923_v60  ;;  %v1973_v33 = vadd.f32 %v7860_v35, %v7151_v16  ;;  %v7862_v63 = vld [vmem:[#allocation76_spill] sm:$0xff] }
 0x2ae   : > { %v3543_v10 = vmul.f32 %v3479_v25, %v1918_v54  ;;  %v5819_v31 = vpop.f32.mrb[126].mxu1  ;;  %5901 = vmatmul.mubr.bf16.gmra.mrb[152].mxu0 %v3584_v0  ;;  %v1968_v25 = vadd.f32 %v7151_v16, %v7862_v63  ;;  %v7863_v0 = vld [vmem:[#allocation34_spill] sm:$0xff] }
 0x2af   : > { %v3482_v42 = vmul.f32 %v5819_v31, %v7845_v59  ;;  %v3346_v37 = vpop.f32.mrb[127].mxu1  ;;  %v7864_v59 = vld [vmem:[#allocation77_spill] sm:$0xff]  ;;  %v714_v63 = vld [vmem:[%s565_s20] sm:$0xf] }
 0x2b0   : > { %v3481_v32 = vmul.f32 %v7847_v36, %v3346_v37  ;;  %v3585_v39 = vpack.c.bf16 %v3544_v53, %v3543_v10  ;;  %v7865_v37 = vld [vmem:[#allocation41_spill] sm:$0xff]  ;;  %v7866_v36 = vld [vmem:[#allocation78_spill] sm:$0xff] }
 0x2b1   : > { %v3546_v43 = vmul.f32 %v3482_v42, %v1933_v58  ;;  %v1983_v42 = vadd.f32 %v7864_v59, %v7151_v16 }
 0x2b2   : > { %v3545_v56 = vmul.f32 %v3481_v32, %v1928_v14  ;;  %v5822_v27 = vpop.f32.mrb[128].mxu1  ;;  %5904 = vmatprep.mubr.bf16.mxu0 %v3585_v39  ;;  %v1978_v32 = vadd.f32 %v7151_v16, %v7866_v36  ;;  %v7867_v39 = vld [vmem:[#allocation39_spill] sm:$0xff] }
 0x2b3   : > { %v3484_v5 = vmul.f32 %v5822_v27, %v7849_v38  ;;  %v3356_v20 = vpop.f32.mrb[129].mxu1  ;;  %v7868_v38 = vld [vmem:[#allocation79_spill] sm:$0xff] }
 0x2b4   : > { %v3483_v51 = vmul.f32 %v3356_v20, %v7851_v2  ;;  %v3586_v40 = vpack.c.bf16 %v3546_v43, %v3545_v56  ;;  %v7869_v20 = vld [vmem:[#allocation40_spill] sm:$0xff] }
 0x2b5   : > { %v3548_v41 = vmul.f32 %v3484_v5, %v1943_v12  ;;  %v1993_v5 = vadd.f32 %v7868_v38, %v7151_v16  ;;  %v7870_v2 = vld [vmem:[#allocation80_spill] sm:$0xff] }
 0x2b6   : > { %v3547_v9 = vmul.f32 %v3483_v51, %v1938_v11  ;;  %v5825_v44 = vpop.f32.mrb[130].mxu1  ;;  %5905 = vmatmul.mubr.bf16.gmra.mrb[156].mxu0 %v3586_v40  ;;  %v1988_v51 = vadd.f32 %v7151_v16, %v7870_v2  ;;  %v7871_v40 = vld [vmem:[#allocation38_spill] sm:$0xff] }
 0x2b7   : > { %v3486_v4 = vmul.f32 %v5825_v44, %v7853_v19  ;;  %v3366_v48 = vpop.f32.mrb[131].mxu1  ;;  %v7872_v19 = vld [vmem:[#allocation81_spill] sm:$0xff] }
 0x2b8   : > { %v3485_v17 = vmul.f32 %v7855_v6, %v3366_v48  ;;  %v3587_v24 = vpack.c.bf16 %v3548_v41, %v3547_v9  ;;  %v7873_v48 = vld [vmem:[#allocation46_spill] sm:$0xff] }
 0x2b9   : > { %v3550_v50 = vmul.f32 %v3486_v4, %v1953_v55  ;;  %v2003_v4 = vadd.f32 %v7872_v19, %v7151_v16  ;;  %v7874_v6 = vld [vmem:[#allocation82_spill] sm:$0xff] }
 0x2ba   : > { %v3549_v18 = vmul.f32 %v3485_v17, %v1948_v45  ;;  %v5828_v49 = vpop.f32.mrb[132].mxu1  ;;  %5908 = vmatprep.mubr.bf16.mxu0 %v3587_v24  ;;  %v1998_v17 = vadd.f32 %v7151_v16, %v7874_v6  ;;  %v7875_v24 = vld [vmem:[#allocation43_spill] sm:$0xff] }
 0x2bb   : > { %v3488_v26 = vmul.f32 %v5828_v49, %v7857_v52  ;;  %v3376_v1 = vpop.f32.mrb[133].mxu1  ;;  %v7876_v52 = vld [vmem:[#allocation83_spill] sm:$0xff] }
 0x2bc   : > { %v3487_v46 = vmul.f32 %v3376_v1, %v7859_v8  ;;  %v3588_v23 = vpack.c.bf16 %v3550_v50, %v3549_v18  ;;  %v7877_v1 = vld [vmem:[#allocation45_spill] sm:$0xff]  ;;  %v7878_v8 = vld [vmem:[#allocation84_spill] sm:$0xff] }
 0x2bd   : > { %v3552_v29 = vmul.f32 %v3488_v26, %v1963_v22  ;;  %v2013_v26 = vadd.f32 %v7876_v52, %v7151_v16 }
 0x2be   : > { %v3551_v62 = vmul.f32 %v3487_v46, %v1958_v21  ;;  %v5831_v60 = vpop.f32.mrb[134].mxu1  ;;  %5909 = vmatmul.mubr.bf16.gmra.mrb[160].mxu0 %v3588_v23  ;;  %v2008_v46 = vadd.f32 %v7151_v16, %v7878_v8  ;;  %v7879_v23 = vld [vmem:[#allocation42_spill] sm:$0xff] }
 0x2bf   : > { %v3490_v34 = vmul.f32 %v5831_v60, %v7861_v13  ;;  %v3386_v54 = vpop.f32.mrb[135].mxu1  ;;  %v7880_v13 = vlaneseq }
 0x2c0   : > { %v3489_v53 = vmul.f32 %v7863_v0, %v3386_v54  ;;  %v3589_v10 = vpack.c.bf16 %v3552_v29, %v3551_v62 }
 0x2c1   : > { %v3554_v31 = vmul.f32 %v3490_v34, %v1973_v33  ;;  %v3956_v34 = vshrl.u32 %v7880_v13, 7 }
 0x2c2   : > { %v3553_v61 = vmul.f32 %v3489_v53, %v1968_v25  ;;  %v5834_v58 = vpop.f32.mrb[136].mxu1  ;;  %5912 = vmatprep.mubr.bf16.mxu0 %v3589_v10  ;;  %v6047_v10 = vmov 1.0|1.0  }
 0x2c3   : > { %v3492_v15 = vmul.f32 %v5834_v58, %v7865_v37  ;;  %v3396_v14 = vpop.f32.mrb[137].mxu1  ;;  %v3970_v54 = vsub.s32 1, %v3956_v34  ;;  %v3966_v25 = vsub.s32 0, %v3956_v34  ;;  %v3957_v0 = vadd.s32 8, %v3956_v34 }
 0x2c4   : > { %v3491_v43 = vmul.f32 %v3396_v14, %v7867_v39  ;;  %v3590_v56 = vpack.c.bf16 %v3554_v31, %v3553_v61  ;;  %v3958_v61 = vadd.s32 16, %v3956_v34  ;;  %v3959_v58 = vadd.s32 24, %v3956_v34 }
 0x2c5   : > { %v3556_v27 = vmul.f32 %v3492_v15, %v1983_v42  ;;  %v3971_v53 = vrot.slane %v714_v63, %v3970_v54  ;;  %v3967_v16 = vrot.slane %v714_v63, %v3966_v25  ;;  %v3960_v37 = vadd.s32 32, %v3956_v34 }
 0x2c6   : > { %v3555_v28 = vmul.f32 %v3491_v43, %v1978_v32  ;;  %v5837_v12 = vpop.f32.mrb[138].mxu1  ;;  %5913 = vmatmul.mubr.bf16.gmra.mrb[164].mxu0 %v3590_v56  ;;  %v3961_v15 = vadd.s32 40, %v3956_v34  ;;  %v7372_v32 = vadd.s32 48, %v3956_v34  ;;  %v7374_v39 = vadd.s32 56, %v3956_v34 }
 0x2c7   : > { %v3494_v30 = vmul.f32 %v5837_v12, %v7869_v20  ;;  %v3406_v11 = vpop.f32.mrb[139].mxu1  ;;  %vm3981_vm0 = vcmp.eq.s32.totalorder %v3956_v34, %v3971_v53  ;;  %vm3985_vm15 = vcmp.eq.s32.totalorder %v3957_v0, %v3971_v53  ;;  %vm3980_vm2 = vcmp.eq.s32.totalorder %v3956_v34, %v3967_v16 }
 0x2c8   : > { %v3493_v41 = vmul.f32 %v7871_v40, %v3406_v11  ;;  %v3591_v9 = vpack.c.bf16 %v3556_v27, %v3555_v28  ;;  %vm5064_vm1 = vmpackc.low %vm3985_vm15, %vm3981_vm0  ;;  %vm3984_vm3 = vcmp.eq.s32.totalorder %v3957_v0, %v3967_v16  ;;  %vm3989_vm6 = vcmp.eq.s32.totalorder %v3958_v61, %v3971_v53  ;;  %v7391_v28 = vld [vmem:[%s7707_s12] ss:$0 sm:$0xff] }
 0x2c9   : > { %v3558_v44 = vmul.f32 %v3494_v30, %v1993_v5  ;;  %5065 = vmatprep.mubr.msk.bf16.mxu1 %vm5064_vm1, %v6047_v10  ;;  %vm7352_vm4 = vmpackc.low %vm3984_vm3, %vm3980_vm2  ;;  %vm3993_vm7 = vcmp.eq.s32.totalorder %v3959_v58, %v3971_v53  ;;  %vm3988_vm9 = vcmp.eq.s32.totalorder %v3958_v61, %v3967_v16  ;;  %vm3992_vm10 = vcmp.eq.s32.totalorder %v3959_v58, %v3967_v16 }
 0x2ca   : > { %v3557_v47 = vmul.f32 %v3493_v41, %v1988_v51  ;;  %v5840_v55 = vpop.f32.mrb[140].mxu1  ;;  %5916 = vmatprep.mubr.bf16.mxu0 %v3591_v9  ;;  %vm7356_vm8 = vmpackc.low %vm3993_vm7, %vm3989_vm6  ;;  %vm3997_vm13 = vcmp.eq.s32.totalorder %v3960_v37, %v3971_v53  ;;  %vm4001_vm14 = vcmp.eq.s32.totalorder %v3961_v15, %v3971_v53  ;;  %vm3996_vm15 = vcmp.eq.s32.totalorder %v3960_v37, %v3967_v16 }
 0x2cb   : > { %v3496_v7 = vmul.f32 %v5840_v55, %v7873_v48  ;;  %v3416_v45 = vpop.f32.mrb[141].mxu1  ;;  %vm7360_vm11 = vmpackc.low %vm3992_vm10, %vm3988_vm9  ;;  %vm4000_vm1 = vcmp.eq.s32.totalorder %v3961_v15, %v3967_v16  ;;  %vm4005_vm3 = vcmp.eq.s32.totalorder %v7372_v32, %v3971_v53  ;;  %vm4009_vm6 = vcmp.eq.s32.totalorder %v7374_v39, %v3971_v53 }
 0x2cc   : > { %v3495_v50 = vmul.f32 %v3416_v45, %v7875_v24  ;;  %v3592_v18 = vpack.c.bf16 %v3558_v44, %v3557_v47  ;;  %vm7364_vm0 = vmpackc.low %vm4001_vm14, %vm3997_vm13  ;;  %v7891_v43 = vmov 0  ;;  %vm4004_vm9 = vcmp.eq.s32.totalorder %v7372_v32, %v3967_v16 }
 0x2cd   : > { %v3560_v49 = vmul.f32 %v3496_v7, %v2003_v4  ;;  %vm7368_vm2 = vmpackc.low %vm4000_vm1, %vm3996_vm15  ;;  %vm4008_vm10 = vcmp.eq.s32.totalorder %v7374_v39, %v3967_v16  ;;  %v7893_v56 = vmov 0  ;;  %v3978_v38 = vsub.s32 3, %v3956_v34 }
 0x2ce   : > { %v3559_v3 = vmul.f32 %v3495_v50, %v1998_v17  ;;  %v5843_v22 = vpop.f32.mrb[142].mxu1  ;;  %5917 = vmatmul.mubr.bf16.gmra.mrb[168].mxu0 %v3592_v18  ;;  %vm7378_vm7 = vmpackc.low %vm4009_vm6, %vm4005_vm3  ;;  %v3974_v20 = vsub.s32 2, %v3956_v34 }
 0x2cf   : > { %v3498_v57 = vmul.f32 %v5843_v22, %v7877_v1  ;;  %v3426_v21 = vpop.f32.mrb[143].mxu1  ;;  %v7892_v43 = vsel %vm7378_vm7, 4294967295, %v7891_v43  ;;  %vm7384_vm13 = vmpackc.low %vm4008_vm10, %vm4004_vm9  ;;  %v3979_v51 = vrot.slane %v714_v63, %v3978_v38 }
 0x2d0   : > { %v3497_v29 = vmul.f32 %v7879_v23, %v3426_v21  ;;  %v3593_v62 = vpack.c.bf16 %v3560_v49, %v3559_v3  ;;  %v7894_v56 = vsel %vm7384_vm13, 4294967295, %v7893_v56  ;;  %v3975_v9 = vrot.slane %v714_v63, %v3974_v20 }
 0x2d1   : > { %v3562_v60 = vmul.f32 %v3498_v57, %v2013_v26  ;;  %vm3983_vm14 = vcmp.eq.s32.totalorder %v3956_v34, %v3979_v51  ;;  %vm3987_vm15 = vcmp.eq.s32.totalorder %v3957_v0, %v3979_v51  ;;  %vm3991_vm10 = vcmp.eq.s32.totalorder %v3958_v61, %v3979_v51 }
 0x2d2   : > { %v3561_v35 = vmul.f32 %v3497_v29, %v2008_v46  ;;  %5920 = vmatprep.mubr.bf16.mxu0 %v3593_v62  ;;  %vm7409_vm1 = vmpackc.low %vm3987_vm15, %vm3983_vm14  ;;  %vm3982_vm3 = vcmp.eq.s32.totalorder %v3956_v34, %v3975_v9  ;;  %vm3986_vm6 = vcmp.eq.s32.totalorder %v3957_v0, %v3975_v9  ;;  %vm3995_vm5 = vcmp.eq.s32.totalorder %v3959_v58, %v3979_v51 }
 0x2d3   : > { %vm7413_vm9 = vmpackc.low %vm3986_vm6, %vm3982_vm3  ;;  %vm3990_vm13 = vcmp.eq.s32.totalorder %v3958_v61, %v3975_v9  ;;  %vm3994_vm7 = vcmp.eq.s32.totalorder %v3959_v58, %v3975_v9  ;;  %vm3998_vm15 = vcmp.eq.s32.totalorder %v3960_v37, %v3975_v9  ;;  %vm4002_vm3 = vcmp.eq.s32.totalorder %v3961_v15, %v3975_v9 }
 0x2d4   : > { %v3594_v33 = vpack.c.bf16 %v3562_v60, %v3561_v35  ;;  %vm7417_vm12 = vmpackc.low %vm3995_vm5, %vm3991_vm10  ;;  %vm3999_vm5 = vcmp.eq.s32.totalorder %v3960_v37, %v3979_v51  ;;  %v7905_v21 = vmov 0  ;;  %vm4007_vm10 = vcmp.eq.s32.totalorder %v7372_v32, %v3979_v51 }
 0x2d5   : > { %vm7421_vm14 = vmpackc.low %vm3994_vm7, %vm3990_vm13  ;;  %vm4003_vm7 = vcmp.eq.s32.totalorder %v3961_v15, %v3979_v51 }
 0x2d6   : > { %5921 = vmatmul.mubr.bf16.gmra.mrb[172].mxu0 %v3594_v33  ;;  %vm7438_vm13 = vmpackc.low %vm4003_vm7, %vm3999_vm5  ;;  %vm4011_vm5 = vcmp.eq.s32.totalorder %v7374_v39, %v3979_v51 }
 0x2d7   : > { %vm7442_vm6 = vmpackc.low %vm4002_vm3, %vm3998_vm15  ;;  %vm4006_vm15 = vcmp.eq.s32.totalorder %v7372_v32, %v3975_v9  ;;  %vm4010_vm3 = vcmp.eq.s32.totalorder %v7374_v39, %v3975_v9 }
 0x2d8   : > { %v7906_v21 = vsel %vm7442_vm6, 4294967295, %v7905_v21  ;;  %vm7458_vm7 = vmpackc.low %vm4011_vm5, %vm4007_vm10 }
 0x2d9   : > { %vm7464_vm6 = vmpackc.low %vm4010_vm3, %vm4006_vm15 }
 0x331   : > { %v5862_v27 = vpop.f32.mrb[112].mxu0 }
 0x332   : > { %v3700_v12 = vpop.f32.mrb[113].mxu0  ;;  %v7394_v30 = vadd.f32 %v5862_v27, %v7391_v28 }
 0x333   : > { %v5863_v5 = vpop.f32.mrb[114].mxu0  ;;  %v7400_v40 = vadd.f32 %v7391_v28, %v3700_v12 }
 0x334   : > { %v7397_v11 = vadd.f32 %v5863_v5, %v7391_v28  ;;  %v3703_v2 = vpop.f32.mrb[115].mxu0 }
 0x335   : > { %v7403_v41 = vadd.f32 %v7391_v28, %v3703_v2 }
 0x336   : > { %v4101_v44 = vpack.c.bf16 %v7397_v11, %v7394_v30 }
 0x337   : > { %v4100_v47 = vpack.c.bf16 %v7403_v41, %v7400_v40 }
 0x339   : > { %v5866_v4 = vpop.f32.mrb[116].mxu0 }
 0x33a   : > { %v3716_v48 = vpop.f32.mrb[117].mxu0  ;;  %v7426_v17 = vadd.f32 %v5866_v4, %v7391_v28 }
 0x33b   : > { %v5867_v45 = vpop.f32.mrb[118].mxu0  ;;  %v7432_v18 = vadd.f32 %v7391_v28, %v3716_v48 }
 0x33c   : > { %v7429_v24 = vadd.f32 %v5867_v45, %v7391_v28  ;;  %v3719_v50 = vpop.f32.mrb[119].mxu0 }
 0x33d   : > { %v3720_v49 = vadd.f32 %v7391_v28, %v3719_v50 }
 0x33e   : > { %v4103_v3 = vpack.c.bf16 %v7429_v24, %v7426_v17 }
 0x33f   : > { %v4102_v22 = vpack.c.bf16 %v3720_v49, %v7432_v18 }
 0x341   : > { %v5870_v52 = vpop.f32.mrb[120].mxu0 }
 0x342   : > { %v3732_v26 = vpop.f32.mrb[121].mxu0  ;;  %v7447_v8 = vadd.f32 %v5870_v52, %v7391_v28 }
 0x343   : > { %v5871_v57 = vpop.f32.mrb[122].mxu0  ;;  %v3733_v29 = vadd.f32 %v7391_v28, %v3732_v26 }
 0x344   : > { %v7450_v46 = vadd.f32 %v5871_v57, %v7391_v28  ;;  %v3735_v23 = vpop.f32.mrb[123].mxu0 }
 0x345   : > { %v3736_v62 = vadd.f32 %v7391_v28, %v3735_v23 }
 0x346   : > { %v4105_v60 = vpack.c.bf16 %v7450_v46, %v7447_v8 }
 0x347   : > { %v4104_v35 = vpack.c.bf16 %v3736_v62, %v3733_v29 }
 0x349   : > { %v5874_v33 = vpop.f32.mrb[124].mxu0 }
 0x34a   : > { %v3748_v13 = vpop.f32.mrb[125].mxu0  ;;  %v7469_v25 = vadd.f32 %v5874_v33, %v7391_v28 }
 0x34b   : > { %v5875_v54 = vpop.f32.mrb[126].mxu0  ;;  %v3749_v16 = vadd.f32 %v7391_v28, %v3748_v13 }
 0x34c   : > { %v7472_v0 = vadd.f32 %v5875_v54, %v7391_v28  ;;  %v3751_v53 = vpop.f32.mrb[127].mxu0 }
 0x34d   : > { %v3752_v61 = vadd.f32 %v7391_v28, %v3751_v53 }
 0x34e   : > { %v4107_v58 = vpack.c.bf16 %v7472_v0, %v7469_v25 }
 0x34f   : > { %v4106_v37 = vpack.c.bf16 %v3752_v61, %v3749_v16 }
 0x351   : > { %v5878_v15 = vpop.f32.mrb[128].mxu0 }
 0x352   : > { %v3764_v32 = vpop.f32.mrb[129].mxu0  ;;  %v3773_v27 = vadd.f32 %v5878_v15, %v7391_v28 }
 0x353   : > { %v5879_v39 = vpop.f32.mrb[130].mxu0  ;;  %v3765_v5 = vadd.f32 %v7391_v28, %v3764_v32 }
 0x354   : > { %v3776_v12 = vadd.f32 %v5879_v39, %v7391_v28  ;;  %v3767_v38 = vpop.f32.mrb[131].mxu0 }
 0x355   : > { %v3768_v20 = vadd.f32 %v7391_v28, %v3767_v38 }
 0x356   : > { %v4109_v2 = vpack.c.bf16 %v3776_v12, %v3773_v27 }
 0x357   : > { %v4108_v51 = vpack.c.bf16 %v3768_v20, %v3765_v5 }
 0x359   : > { %v5882_v9 = vpop.f32.mrb[132].mxu0  ;;  %5385 = vmatprep.subr.bf16.mxu1 %v4108_v51 }
 0x35a   : > { %v3780_v4 = vpop.f32.mrb[133].mxu0  ;;  %5386 = vmatpush3.bf16.msra.mxu1 %v4100_v47  ;;  %v3789_v45 = vadd.f32 %v5882_v9, %v7391_v28 }
 0x35b   : > { %v5883_v48 = vpop.f32.mrb[134].mxu0  ;;  %5387 = vmatprep.subr.bf16.mxu1 %v4109_v2  ;;  %v3781_v49 = vadd.f32 %v7391_v28, %v3780_v4 }
 0x35c   : > { %v3792_v50 = vadd.f32 %v5883_v48, %v7391_v28  ;;  %v3783_v18 = vpop.f32.mrb[135].mxu0 }
 0x35d   : > { %v3784_v52 = vadd.f32 %v7391_v28, %v3783_v18 }
 0x35e   : > { %v4111_v26 = vpack.c.bf16 %v3792_v50, %v3789_v45  ;;  %5388 = vmatpush3.bf16.msra.mxu1 %v4101_v44 }
 0x35f   : > { %v4110_v57 = vpack.c.bf16 %v3784_v52, %v3781_v49 }
 0x361   : > { %v5886_v23 = vpop.f32.mrb[136].mxu0  ;;  %5389 = vmatprep.subr.bf16.mxu1 %v4110_v57 }
 0x362   : > { %v3796_v40 = vpop.f32.mrb[137].mxu0  ;;  %5390 = vmatpush3.bf16.msra.mxu1 %v4102_v22  ;;  %v3805_v47 = vadd.f32 %v5886_v23, %v7391_v28 }
 0x363   : > { %v5887_v41 = vpop.f32.mrb[138].mxu0  ;;  %5391 = vmatprep.subr.bf16.mxu1 %v4111_v26  ;;  %v3797_v33 = vadd.f32 %v7391_v28, %v3796_v40 }
 0x364   : > { %v3808_v29 = vadd.f32 %v5887_v41, %v7391_v28  ;;  %v3799_v62 = vpop.f32.mrb[139].mxu0 }
 0x365   : > { %v3800_v13 = vadd.f32 %v7391_v28, %v3799_v62 }
 0x366   : > { %v4113_v54 = vpack.c.bf16 %v3808_v29, %v3805_v47  ;;  %5392 = vmatpush3.bf16.msra.mxu1 %v4103_v3 }
 0x367   : > { %v4112_v30 = vpack.c.bf16 %v3800_v13, %v3797_v33 }
 0x369   : > { %v5890_v11 = vpop.f32.mrb[140].mxu0  ;;  %5393 = vmatprep.subr.bf16.mxu1 %v4112_v30 }
 0x36a   : > { %v3812_v44 = vpop.f32.mrb[141].mxu0  ;;  %5394 = vmatpush3.bf16.msra.mxu1 %v4104_v35  ;;  %v3821_v53 = vadd.f32 %v5890_v11, %v7391_v28 }
 0x36b   : > { %v5891_v22 = vpop.f32.mrb[142].mxu0  ;;  %5395 = vmatprep.subr.bf16.mxu1 %v4113_v54  ;;  %v3813_v15 = vadd.f32 %v7391_v28, %v3812_v44 }
 0x36c   : > { %v3824_v16 = vadd.f32 %v5891_v22, %v7391_v28  ;;  %v3815_v61 = vpop.f32.mrb[143].mxu0 }
 0x36d   : > { %v3816_v32 = vadd.f32 %v7391_v28, %v3815_v61 }
 0x36e   : > { %v4115_v39 = vpack.c.bf16 %v3824_v16, %v3821_v53  ;;  %5396 = vmatpush3.bf16.msra.mxu1 %v4105_v60 }
 0x36f   : > { %v4114_v17 = vpack.c.bf16 %v3816_v32, %v3813_v15 }
 0x371   : > { %v5894_v24 = vpop.f32.mrb[144].mxu0  ;;  %5397 = vmatprep.subr.bf16.mxu1 %v4114_v17 }
 0x372   : > { %v3828_v3 = vpop.f32.mrb[145].mxu0  ;;  %5398 = vmatpush3.bf16.msra.mxu1 %v4106_v37  ;;  %v7507_v27 = vadd.f32 %v5894_v24, %v7391_v28 }
 0x373   : > { %v5895_v35 = vpop.f32.mrb[146].mxu0  ;;  %5399 = vmatprep.subr.bf16.mxu1 %v4115_v39  ;;  %v3829_v5 = vadd.f32 %v7391_v28, %v3828_v3 }
 0x374   : > { %v7510_v12 = vadd.f32 %v5895_v35, %v7391_v28  ;;  %v3831_v38 = vpop.f32.mrb[147].mxu0 }
 0x375   : > { %v3832_v20 = vadd.f32 %v7391_v28, %v3831_v38 }
 0x376   : > { %v4117_v8 = vpack.c.bf16 %v7510_v12, %v7507_v27  ;;  %5400 = vmatpush3.bf16.msra.mxu1 %v4107_v58 }
 0x377   : > { %v4116_v46 = vpack.c.bf16 %v3832_v20, %v3829_v5 }
 0x379   : > { %v5898_v60 = vpop.f32.mrb[148].mxu0  ;;  %5067 = vmatmul.mubr.msk.bf16.vlgmr.msra.gmra.mrb[144].mxu1 %vm7352_vm4, %v6047_v10  ;;  %vm7911_vm4 = vnez %v7892_v43 }
 0x37a   : > { %v3844_v37 = vpop.f32.mrb[149].mxu0  ;;  %5069 = vmatprep.mubr.msk.bf16.mxu1 %vm7356_vm8, %v6047_v10  ;;  %v7526_v51 = vadd.f32 %v5898_v60, %v7391_v28  ;;  %vm7912_vm8 = vnez %v7894_v56 }
 0x37b   : > { %v5899_v2 = vpop.f32.mrb[150].mxu0  ;;  %v3845_v0 = vadd.f32 %v7391_v28, %v3844_v37 }
 0x37c   : > { %v7529_v9 = vadd.f32 %v5899_v2, %v7391_v28  ;;  %v3847_v25 = vpop.f32.mrb[151].mxu0 }
 0x37d   : > { %v3848_v58 = vadd.f32 %v7391_v28, %v3847_v25 }
 0x37e   : > { %v4119_v31 = vpack.c.bf16 %v7529_v9, %v7526_v51 }
 0x37f   : > { %v4118_v4 = vpack.c.bf16 %v3848_v58, %v3845_v0 }
 0x381   : > { %v5902_v48 = vpop.f32.mrb[152].mxu0  ;;  %5071 = vmatmul.mubr.msk.bf16.gmra.mrb[148].mxu1 %vm7360_vm11, %v6047_v10  ;;  %vm7913_vm11 = vnez %v7906_v21 }
 0x382   : > { %v3860_v59 = vpop.f32.mrb[153].mxu0  ;;  %5073 = vmatprep.mubr.msk.bf16.mxu1 %vm7364_vm0, %v6047_v10  ;;  %v7542_v50 = vadd.f32 %v5902_v48, %v7391_v28 }
 0x383   : > { %v5903_v45 = vpop.f32.mrb[154].mxu0  ;;  %v3861_v52 = vadd.f32 %v7391_v28, %v3860_v59 }
 0x384   : > { %v7545_v18 = vadd.f32 %v5903_v45, %v7391_v28  ;;  %v3863_v49 = vpop.f32.mrb[155].mxu0 }
 0x385   : > { %v3864_v26 = vadd.f32 %v7391_v28, %v3863_v49 }
 0x386   : > { %v4121_v42 = vpack.c.bf16 %v7545_v18, %v7542_v50 }
 0x387   : > { %v4120_v57 = vpack.c.bf16 %v3864_v26, %v3861_v52 }
 0x389   : > { %v5906_v23 = vpop.f32.mrb[156].mxu0  ;;  %5075 = vmatmul.mubr.msk.bf16.gmra.mrb[152].mxu1 %vm7368_vm2, %v6047_v10 }
 0x38a   : > { %v3876_v14 = vpop.f32.mrb[157].mxu0  ;;  %5077 = vmatprep.mubr.msk.bf16.mxu1 %vm7911_vm4, %v6047_v10  ;;  %v7558_v41 = vadd.f32 %v5906_v23, %v7391_v28 }
 0x38b   : > { %v5907_v40 = vpop.f32.mrb[158].mxu0  ;;  %v3877_v62 = vadd.f32 %v7391_v28, %v3876_v14 }
 0x38c   : > { %v7561_v47 = vadd.f32 %v5907_v40, %v7391_v28  ;;  %v3879_v29 = vpop.f32.mrb[159].mxu0 }
 0x38d   : > { %v3880_v33 = vadd.f32 %v7391_v28, %v3879_v29 }
 0x38e   : > { %v4123_v36 = vpack.c.bf16 %v7561_v47, %v7558_v41 }
 0x38f   : > { %v4122_v13 = vpack.c.bf16 %v3880_v33, %v3877_v62 }
 0x391   : > { %v5910_v54 = vpop.f32.mrb[160].mxu0  ;;  %5079 = vmatmul.mubr.msk.bf16.gmra.mrb[156].mxu1 %vm7912_vm8, %v6047_v10 }
 0x392   : > { %v3892_v43 = vpop.f32.mrb[161].mxu0  ;;  %5081 = vmatprep.mubr.msk.bf16.mxu1 %vm7409_vm1, %v6047_v10  ;;  %v3901_v11 = vadd.f32 %v5910_v54, %v7391_v28 }
 0x393   : > { %v5911_v30 = vpop.f32.mrb[162].mxu0  ;;  %v3893_v53 = vadd.f32 %v7391_v28, %v3892_v43 }
 0x394   : > { %v3904_v44 = vadd.f32 %v5911_v30, %v7391_v28  ;;  %v3895_v22 = vpop.f32.mrb[163].mxu0 }
 0x395   : > { %v3896_v16 = vadd.f32 %v7391_v28, %v3895_v22 }
 0x396   : > { %v4125_v61 = vpack.c.bf16 %v3904_v44, %v3901_v11  ;;  %v4092_v44 = vld [vmem:[#allocation2] sm:$0xff] }
 0x397   : > { %v4124_v15 = vpack.c.bf16 %v3896_v16, %v3893_v53 }
 0x399   : > { %v5914_v32 = vpop.f32.mrb[164].mxu0  ;;  %5425 = vmatprep.subr.bf16.mxu1 %v4124_v15 }
 0x39a   : > { %v3908_v56 = vpop.f32.mrb[165].mxu0  ;;  %5426 = vmatpush3.bf16.msra.mxu1 %v4116_v46  ;;  %v3917_v55 = vadd.f32 %v5914_v32, %v7391_v28 }
 0x39b   : > { %v5915_v39 = vpop.f32.mrb[166].mxu0  ;;  %5427 = vmatprep.subr.bf16.mxu1 %v4125_v61  ;;  %v3909_v3 = vadd.f32 %v7391_v28, %v3908_v56  ;;  %v4093_v61 = vld [vmem:[#allocation2 + $0x8] sm:$0xff] }
 0x39c   : > { %v3920_v17 = vadd.f32 %v5915_v39, %v7391_v28  ;;  %v3911_v24 = vpop.f32.mrb[167].mxu0 }
 0x39d   : > { %v3912_v35 = vadd.f32 %v7391_v28, %v3911_v24 }
 0x39e   : > { %v4127_v38 = vpack.c.bf16 %v3920_v17, %v3917_v55  ;;  %5428 = vmatpush3.bf16.msra.mxu1 %v4117_v8 }
 0x39f   : > { %v4126_v5 = vpack.c.bf16 %v3912_v35, %v3909_v3  ;;  %v4094_v3 = vld [vmem:[#allocation2 + $0x10] sm:$0xff] }
 0x3a1   : > { %v5918_v20 = vpop.f32.mrb[168].mxu0  ;;  %5429 = vmatprep.subr.bf16.mxu1 %v4126_v5 }
 0x3a2   : > { %v3924_v46 = vpop.f32.mrb[169].mxu0  ;;  %5430 = vmatpush3.bf16.msra.mxu1 %v4118_v4  ;;  %v3933_v37 = vadd.f32 %v5918_v20, %v7391_v28  ;;  %v4095_v20 = vld [vmem:[#allocation2 + $0x18] sm:$0xff] }
 0x3a3   : > { %v5919_v60 = vpop.f32.mrb[170].mxu0  ;;  %5431 = vmatprep.subr.bf16.mxu1 %v4127_v38  ;;  %v3925_v0 = vadd.f32 %v7391_v28, %v3924_v46 }
 0x3a4   : > { %v3936_v2 = vadd.f32 %v5919_v60, %v7391_v28  ;;  %v3927_v25 = vpop.f32.mrb[171].mxu0 }
 0x3a5   : > { %v3928_v58 = vadd.f32 %v7391_v28, %v3927_v25 }
 0x3a6   : > { %v4129_v48 = vpack.c.bf16 %v3936_v2, %v3933_v37  ;;  %5432 = vmatpush3.bf16.msra.mxu1 %v4119_v31 }
 0x3a7   : > { %v4128_v27 = vpack.c.bf16 %v3928_v58, %v3925_v0 }
 0x3a9   : > { %v5922_v12 = vpop.f32.mrb[172].mxu0  ;;  %5433 = vmatprep.subr.bf16.mxu1 %v4128_v27 }
 0x3aa   : > { %v3940_v8 = vpop.f32.mrb[173].mxu0  ;;  %5434 = vmatpush3.bf16.msra.mxu1 %v4120_v57  ;;  %v3949_v59 = vadd.f32 %v5922_v12, %v7391_v28 }
 0x3ab   : > { %v5923_v4 = vpop.f32.mrb[174].mxu0  ;;  %5435 = vmatprep.subr.bf16.mxu1 %v4129_v48  ;;  %v3941_v52 = vadd.f32 %v7391_v28, %v3940_v8  ;;  %v4096_v48 = vld [vmem:[#allocation2 + $0x20] sm:$0xff] }
 0x3ac   : > { %v3952_v45 = vadd.f32 %v5923_v4, %v7391_v28  ;;  %v3943_v49 = vpop.f32.mrb[175].mxu0  ;;  %v4097_v4 = vld [vmem:[#allocation2 + $0x28] sm:$0xff] }
 0x3ad   : > { %v3944_v26 = vadd.f32 %v7391_v28, %v3943_v49 }
 0x3ae   : > { %v4131_v23 = vpack.c.bf16 %v3952_v45, %v3949_v59  ;;  %5436 = vmatpush3.bf16.msra.mxu1 %v4121_v42 }
 0x3af   : > { %v4130_v51 = vpack.c.bf16 %v3944_v26, %v3941_v52 }
 0x3b1   : > { %5437 = vmatprep.subr.bf16.mxu1 %v4130_v51 }
 0x3b2   : > { %5438 = vmatpush3.bf16.msra.mxu1 %v4122_v13 }
 0x3b3   : > { %5439 = vmatprep.subr.bf16.mxu1 %v4131_v23 }
 0x3b6   : > { %5440 = vmatpush3.bf16.msra.mxu1 %v4123_v36 }
 0x3b9   : > { %5083 = vmatmul.mubr.msk.bf16.vlgmr.msra.gmra.mrb[160].mxu1 %vm7413_vm9, %v6047_v10  ;;  %vm7918_vm9 = vcmask (!%p5096_p6), 31744  }
 0x3ba   : > { %5085 = vmatprep.mubr.msk.bf16.mxu1 %vm7417_vm12, %v6047_v10  ;;  %vm7914_vm12 = vcmask (!%p5096_p6), 1043456  }
 0x3bb   : > { %vm7915_vm0 = vmmov (!%p5096_p6), %vm7914_vm12 }
 0x3bc   : > { %vm7916_vm2 = vmmov (!%p5096_p6), %vm7915_vm0 }
 0x3bd   : > { %vm7917_vm1 = vmmov (!%p5096_p6), %vm7915_vm0 }
 0x3c1   : > { %5087 = vmatmul.mubr.msk.bf16.gmra.mrb[164].mxu1 %vm7421_vm14, %v6047_v10  ;;  %vm7919_vm14 = vmmov (!%p5096_p6), %vm7918_vm9 }
 0x3c2   : > { %5089 = vmatprep.mubr.msk.bf16.mxu1 %vm7438_vm13, %v6047_v10  ;;  %vm7920_vm13 = vmmov (!%p5096_p6), %vm7918_vm9 }
 0x3c9   : > { %5091 = vmatmul.mubr.msk.bf16.gmra.mrb[168].mxu1 %vm7913_vm11, %v6047_v10 }
 0x3ca   : > { %5093 = vmatprep.mubr.msk.bf16.mxu1 %vm7458_vm7, %v6047_v10 }
 0x3d1   : > { %5095 = vmatmul.mubr.msk.bf16.gmra.mrb[172].mxu1 %vm7464_vm6, %v6047_v10  ;;  %vm7921_vm6 = vmmov (!%p5096_p6), %vm7918_vm9 }
 0x3d2   : > { %vm7922_vm10 = vmmov (!%p5096_p6), %vm7921_vm6 }
 0x3d3   : > { %vm7923_vm5 = vmmov (!%p5096_p6), %vm7921_vm6 }
 0x3d4   : > { %vm7924_vm7 = vmmov (!%p5096_p6), %vm7923_vm5 }
 0x3d5   : > { %vm7925_vm15 = vmmov (!%p5096_p6), %vm7923_vm5 }
 0x44c   : > { %v5401_v28 = vpop.f32.mrb[144].mxu1 }
 0x44d   : > { %v5402_v19 = vpop.f32.mrb[145].mxu1 }
 0x44e   : > { %v5403_v7 = vadd.f32 %v5402_v19, %v5401_v28  ;;  %v5404_v6 = vpop.f32.mrb[146].mxu1  ;;  %v4098_v28 = vld [vmem:[#allocation2 + $0x30] sm:$0xff] }
 0x44f   : > { %v5405_v9 = vpop.f32.mrb[147].mxu1 }
 0x450   : > { %v5406_v31 = vadd.f32 %v5405_v9, %v5404_v6  ;;  %v4099_v9 = vld [vmem:[#allocation2 + $0x38] sm:$0xff] }
 0x454   : > { %v5407_v1 = vpop.f32.mrb[148].mxu1 }
 0x455   : > { %v5408_v50 = vpop.f32.mrb[149].mxu1 }
 0x456   : > { %v5409_v18 = vadd.f32 %v5408_v50, %v5407_v1  ;;  %v5410_v42 = vpop.f32.mrb[150].mxu1 }
 0x457   : > { %v5411_v21 = vpop.f32.mrb[151].mxu1 }
 0x458   : > { %v5412_v57 = vadd.f32 %v5411_v21, %v5410_v42  ;;  %v4354_v42 = vld [vmem:[%s7700_s5] sm:$0xff] (!%p5096_p6) }
 0x459   : > { %v4358_v21 = vld [vmem:[%s7700_s5 + $0x20] sm:$0xff] (!%p5096_p6)  ;;  %5926 = vmatprep.mubr.msk.f32.mxu0 (!%p5096_p6), %vm7918_vm9, %v4354_v42 }
 0x45a   : > { %5932 = vmatprep.mubr.msk.f32.mxu1 (!%p5096_p6), %vm7919_vm14, %v4358_v21 }
 0x45c   : > { %v5413_v14 = vpop.f32.mrb[152].mxu1 }
 0x45d   : > { %v5414_v40 = vpop.f32.mrb[153].mxu1 }
 0x45e   : > { %v5415_v34 = vadd.f32 %v5414_v40, %v5413_v14  ;;  %v5416_v41 = vpop.f32.mrb[154].mxu1  ;;  %v4359_v14 = vld [vmem:[%s7700_s5 + $0x28] sm:$0xff] (!%p5096_p6)  ;;  %v4356_v40 = vld [vmem:[%s7700_s5 + $0x10] sm:$0xff] (!%p5096_p6) }
 0x45f   : > { %v5417_v47 = vpop.f32.mrb[155].mxu1 }
 0x460   : > { %v5418_v29 = vadd.f32 %v5417_v47, %v5416_v41 }
 0x464   : > { %v5419_v63 = vpop.f32.mrb[156].mxu1 }
 0x465   : > { %v5420_v10 = vpop.f32.mrb[157].mxu1 }
 0x466   : > { %v5421_v62 = vadd.f32 %v5420_v10, %v5419_v63  ;;  %v5422_v33 = vpop.f32.mrb[158].mxu1 }
 0x467   : > { %v5423_v36 = vpop.f32.mrb[159].mxu1 }
 0x468   : > { %v5424_v13 = vadd.f32 %v5423_v36, %v5422_v33  ;;  %v4357_v36 = vld [vmem:[%s7700_s5 + $0x18] sm:$0xff] (!%p5096_p6) }
 0x48c   : > { %v5441_v54 = vpop.f32.mrb[160].mxu1 }
 0x48d   : > { %v5442_v43 = vpop.f32.mrb[161].mxu1 }
 0x48e   : > { %v5443_v30 = vadd.f32 %v5442_v43, %v5441_v54  ;;  %v5444_v11 = vpop.f32.mrb[162].mxu1 }
 0x48f   : > { %v5445_v22 = vpop.f32.mrb[163].mxu1 }
 0x490   : > { %v4232_v53 = vadd.f32 %v5443_v30, %v5403_v7  ;;  %v5446_v16 = vadd.f32 %v5445_v22, %v5444_v11  ;;  %v6048_v30 = vmov (!%p5096_p6), 8  }
 0x491   : > { %5986 = vset.pattern.permute.xlu0 (!%p5096_p6), %v6048_v30  ;;  %5987 = vset.pattern.permute.xlu1 (!%p5096_p6), %v6048_v30 }
 0x492   : > { %v4262_v15 = vadd.f32 %v4232_v53, %v4092_v44  ;;  %v4235_v32 = vadd.f32 %v5446_v16, %v5406_v31 }
 0x494   : > { %4270 = vst [vmem:[#allocation2] sm:$0xff] %v4262_v15  ;;  %v4263_v56 = vadd.f32 %v4235_v32, %v4093_v61  ;;  %v5447_v39 = vpop.f32.mrb[164].mxu1 }
 0x495   : > { %v5448_v55 = vpop.f32.mrb[165].mxu1 }
 0x496   : > { %4271 = vst [vmem:[#allocation2 + $0x8] sm:$0xff] %v4263_v56  ;;  %v5449_v17 = vadd.f32 %v5448_v55, %v5447_v39  ;;  %v5450_v24 = vpop.f32.mrb[166].mxu1 }
 0x497   : > { %v5451_v35 = vpop.f32.mrb[167].mxu1 }
 0x498   : > { %v4240_v38 = vadd.f32 %v5449_v17, %v5409_v18  ;;  %v5452_v5 = vadd.f32 %v5451_v35, %v5450_v24  ;;  %v4362_v18 = vld [vmem:[%s7708_s13] sm:$0xf] (!%p5096_p6) }
 0x499   : > { %5924 = vmatprep.subr.msk.mxu0 (!%p5096_p6), %vm7914_vm12, %v4362_v18  ;;  %5948 = vmatprep.subr.msk.mxu1 (!%p5096_p6), %vm7915_vm0, %v4362_v18 }
 0x49a   : > { %v4264_v46 = vadd.f32 %v4240_v38, %v4094_v3  ;;  %v4243_v60 = vadd.f32 %v5452_v5, %v5412_v57  ;;  %v4355_v57 = vld [vmem:[%s7700_s5 + $0x8] sm:$0xff] (!%p5096_p6)  ;;  %5925 = vmatpush3.msk.msra.mxu0 (!%p5096_p6), %vm7916_vm2, %v4362_v18  ;;  %5949 = vmatpush3.msk.msra.mxu1 (!%p5096_p6), %vm7917_vm1, %v4362_v18 }
 0x49b   : > { %v4282_v41 = vld [vmem:[#allocation2] sm:$0xff] (!%p5096_p6)  ;;  %5927 = vmatmul.mubr.msk.f32.vlgmr.msra.gmra.mrb[0].mxu0 (!%p5096_p6), %vm7920_vm13, %v4355_v57  ;;  %5933 = vmatmul.mubr.msk.f32.vlgmr.msra.gmra.mrb[0].mxu1 (!%p5096_p6), %vm7921_vm6, %v4359_v14 }
 0x49c   : > { %4272 = vst [vmem:[#allocation2 + $0x10] sm:$0xff] %v4264_v46  ;;  %v4265_v37 = vadd.f32 %v4243_v60, %v4095_v20  ;;  %v5453_v2 = vpop.f32.mrb[168].mxu1  ;;  %v4290_v63 = vmax.f32 (!%p5096_p6), %v4282_v41, 1.0  ;;  %5929 = vmatprep.mubr.msk.f32.mxu0 (!%p5096_p6), %vm7922_vm10, %v4356_v40 }
 0x49d   : > { %v5454_v25 = vpop.f32.mrb[169].mxu1 }
 0x49e   : > { %4273 = vst [vmem:[#allocation2 + $0x18] sm:$0xff] %v4265_v37  ;;  %v5455_v0 = vadd.f32 %v5454_v25, %v5453_v2  ;;  %v5456_v58 = vpop.f32.mrb[170].mxu1  ;;  %5988 = vrcp.f32 (!%p5096_p6), %v4290_v63 }
 0x49f   : > { %v5457_v27 = vpop.f32.mrb[171].mxu1  ;;  %5930 = vmatmul.mubr.msk.f32.gmra.mrb[2].mxu0 (!%p5096_p6), %vm7924_vm7, %v4357_v36 }
 0x4a0   : > { %v4248_v12 = vadd.f32 %v5455_v0, %v5415_v34  ;;  %v5458_v8 = vadd.f32 %v5457_v27, %v5456_v58  ;;  %v4360_v34 = vld [vmem:[%s7700_s5 + $0x30] sm:$0xff] (!%p5096_p6) }
 0x4a1   : > { %5935 = vmatprep.mubr.msk.f32.mxu1 (!%p5096_p6), %vm7923_vm5, %v4360_v34 }
 0x4a2   : > { %v4266_v59 = vadd.f32 %v4248_v12, %v4096_v48  ;;  %v4251_v45 = vadd.f32 %v5458_v8, %v5418_v29  ;;  %v4283_v29 = vld [vmem:[#allocation2 + $0x8] sm:$0xff] (!%p5096_p6) }
 0x4a3   : > { %v7647_v47 = vld [vmem:[#allocation2 + $0x10] sm:$0xff] (!%p5096_p6) }
 0x4a4   : > { %4274 = vst [vmem:[#allocation2 + $0x20] sm:$0xff] %v4266_v59  ;;  %v4267_v49 = vadd.f32 %v4251_v45, %v4097_v4  ;;  %v5459_v52 = vpop.f32.mrb[172].mxu1  ;;  %v4292_v10 = vmax.f32 (!%p5096_p6), %v7647_v47, 1.0 }
 0x4a5   : > { %v5460_v26 = vpop.f32.mrb[173].mxu1  ;;  %v4285_v33 = vld [vmem:[#allocation2 + $0x18] sm:$0xff] (!%p5096_p6) }
 0x4a6   : > { %4275 = vst [vmem:[#allocation2 + $0x28] sm:$0xff] %v4267_v49  ;;  %v5461_v23 = vadd.f32 %v5460_v26, %v5459_v52  ;;  %v5462_v51 = vpop.f32.mrb[174].mxu1  ;;  %v4293_v54 = vmax.f32 (!%p5096_p6), %v4285_v33, 1.0  ;;  %5990 = vrcp.f32 (!%p5096_p6), %v4292_v10 }
 0x4a7   : > { %v5463_v19 = vpop.f32.mrb[175].mxu1 }
 0x4a8   : > { %v4256_v7 = vadd.f32 %v5461_v23, %v5421_v62  ;;  %v5464_v6 = vadd.f32 %v5463_v19, %v5462_v51  ;;  %4281 = sbr.rel (%p5096_p6) target bundleno = 1483 (0x5cb), region = 92  ;;  %v4291_v62 = vmax.f32 (!%p5096_p6), %v4283_v29, 1.0  ;;  %v5989_v32 = vpop.eup (!%p5096_p6), %5988 }
 0x4a9   : > { %4308 = vperm.xlu0 (!%p5096_p6), %5986, %v5989_v32  }
 0x4aa   : > { %v4268_v31 = vadd.f32 %v4256_v7, %v4098_v28  ;;  %v4259_v1 = vadd.f32 %v5464_v6, %v5424_v13  ;;  %v4361_v13 = vld [vmem:[%s7700_s5 + $0x38] sm:$0xff] (!%p5096_p6)  ;;  %5992 = vrcp.f32 (!%p5096_p6), %v4291_v62 }
 0x4ab   : > { %v4286_v43 = vld [vmem:[#allocation2 + $0x20] sm:$0xff] (!%p5096_p6)  ;;  %5936 = vmatmul.mubr.msk.f32.gmra.mrb[2].mxu1 (!%p5096_p6), %vm7925_vm15, %v4361_v13  ;;  %5994 = vrcp.f32 (!%p5096_p6), %v4293_v54 }
 0x4ac   : > { %4276 = vst [vmem:[#allocation2 + $0x30] sm:$0xff] %v4268_v31  ;;  %v4269_v50 = vadd.f32 %v4259_v1, %v4099_v9  ;;  %v4294_v44 = vmax.f32 (!%p5096_p6), %v4286_v43, 1.0 }
 0x4ad   : > { %v4287_v11 = vld [vmem:[#allocation2 + $0x28] sm:$0xff] (!%p5096_p6) }
 0x4ae   : > { %4277 = vst [vmem:[#allocation2 + $0x38] sm:$0xff] %v4269_v50  ;;  %v4295_v22 = vmax.f32 (!%p5096_p6), %v4287_v11, 1.0  ;;  %5996 = vrcp.f32 (!%p5096_p6), %v4294_v44 }
 0x4b0   : > { %5998 = vrcp.f32 %v4295_v22  ;;  %v5991_v56 = vpop.eup %5990 }
 0x4b1   : > { %4318 = vperm.xlu1 %5987, %v5991_v56  }
 0x4b3   : > { %v4288_v53 = vld [vmem:[#allocation2 + $0x30] sm:$0xff] }
 0x4b4   : > { %v4296_v61 = vmax.f32 %v4288_v53, 1.0  ;;  %v5993_v39 = vpop.eup %5992 }
 0x4b5   : > { %v4289_v16 = vld [vmem:[#allocation2 + $0x38] sm:$0xff]  ;;  %v5995_v55 = vpop.eup %5994  ;;  %4313 = vperm.xlu0 %5986, %v5993_v39  }
 0x4b6   : > { %v4297_v15 = vmax.f32 %v4289_v16, 1.0  ;;  %6000 = vrcp.f32 %v4296_v61  ;;  %4323 = vperm.xlu1 %5987, %v5995_v55  }
 0x4b8   : > { %6002 = vrcp.f32 %v4297_v15  ;;  %v5997_v17 = vpop.eup %5996 }
 0x4b9   : > { %4328 = vperm.xlu0 %5986, %v5997_v17  }
 0x4ba   : > { %v5999_v24 = vpop.eup %5998 }
 0x4bb   : > { %4333 = vperm.xlu1 %5987, %v5999_v24  }
 0x4c0   : > { %v6001_v3 = vpop.eup %6000 }
 0x4c1   : > { %4338 = vperm.xlu0 %5986, %v6001_v3  }
 0x4c2   : > { %v6003_v35 = vpop.eup %6002 }
 0x4c3   : > { %4343 = vperm.xlu1 %5987, %v6003_v35  }
 0x528   : > { %v4309_v38 = vpop.permute.xlu0 %4308 }
 0x529   : > { %v4346_v37 = vmul.f32 %v4309_v38, %v4282_v41 }
 0x530   : > { %v4319_v5 = vpop.permute.xlu1 %4318 }
 0x531   : > { %v4348_v4 = vmul.f32 %v4319_v5, %v7647_v47 }
 0x534   : > { %v4314_v20 = vpop.permute.xlu0 %4313 }
 0x535   : > { %v4347_v46 = vmul.f32 %v4314_v20, %v4283_v29  ;;  %v4324_v60 = vpop.permute.xlu1 %4323 }
 0x536   : > { %v4349_v59 = vmul.f32 %v4324_v60, %v4285_v33 }
 0x538   : > { %v4329_v12 = vpop.permute.xlu0 %4328 }
 0x539   : > { %v4350_v28 = vmul.f32 %v4329_v12, %v4286_v43 }
 0x53a   : > { %v4334_v8 = vpop.permute.xlu1 %4333 }
 0x53b   : > { %v4351_v19 = vmul.f32 %v4334_v8, %v4287_v11 }
 0x540   : > { %v4339_v9 = vpop.permute.xlu0 %4338 }
 0x541   : > { %v4352_v18 = vmul.f32 %v4339_v9, %v4288_v53 }
 0x542   : > { %v4344_v31 = vpop.permute.xlu1 %4343 }
 0x543   : > { %v4353_v21 = vmul.f32 %v4344_v31, %v4289_v16 }
 0x56e   : > { %v5928_v2 = vpop.f32.mrb[0].mxu0  ;;  %v5934_v25 = vpop.f32.mrb[0].mxu1 }
 0x56f   : > { %v4496_v0 = vadd.f32 %v5928_v2, %v4347_v46  ;;  %v4456_v58 = vpop.f32.mrb[1].mxu0  ;;  %v4476_v48 = vpop.f32.mrb[1].mxu1  ;;  %v4500_v42 = vadd.f32 %v5934_v25, %v4351_v19  ;;  %v5107_v19 = vld [vmem:[%s7926_s28] ss:$0 sm:$0xff] }
 0x570   : > { %v4495_v27 = vadd.f32 %v4456_v58, %v4346_v37  ;;  %v4499_v1 = vadd.f32 %v4476_v48, %v4350_v28 }
 0x572   : > { %v4535_v45 = vadd.f32 %v4496_v0, %v4495_v27  ;;  %v5931_v49 = vpop.f32.mrb[2].mxu0 }
 0x573   : > { %v4466_v26 = vpop.f32.mrb[3].mxu0  ;;  %v4498_v7 = vadd.f32 %v5931_v49, %v4349_v59 }
 0x574   : > { %v4497_v51 = vadd.f32 %v4466_v26, %v4348_v4  ;;  %v5106_v4 = vld [vmem:[%s7709_s14] ss:$0 sm:$0xff] }
 0x576   : > { %v4536_v6 = vadd.f32 %v4535_v45, %v4497_v51 }
 0x578   : > { %v4537_v50 = vadd.f32 %v4536_v6, %v4498_v7 }
 0x57a   : > { %v4538_v57 = vadd.f32 %v4537_v50, %v4499_v1 }
 0x57c   : > { %v4539_v40 = vadd.f32 %v4538_v57, %v4500_v42 }
 0x57e   : > { %v5937_v52 = vpop.f32.mrb[2].mxu1 }
 0x57f   : > { %v4486_v23 = vpop.f32.mrb[3].mxu1  ;;  %v4502_v34 = vadd.f32 %v5937_v52, %v4353_v21 }
 0x580   : > { %v4501_v14 = vadd.f32 %v4486_v23, %v4352_v18 }
 0x582   : > { %v4540_v41 = vadd.f32 %v4539_v40, %v4501_v14 }
 0x584   : > { %v4541_v47 = vadd.f32 %v4540_v41, %v4502_v34 }
 0x586   : > { %v4542_v29 = vrot.slane %v4541_v47, 4 }
 0x588   : > { %v4543_v63 = vadd.f32 %v4542_v29, %v4541_v47 }
 0x58a   : > { %v4544_v10 = vrot.slane %v4543_v63, 2 }
 0x58c   : > { %v4545_v62 = vadd.f32 %v4544_v10, %v4543_v63 }
 0x58e   : > { %v4546_v33 = vrot.slane %v4545_v62, 1 }
 0x590   : > { %v4547_v36 = vadd.f32 %v4546_v33, %v4545_v62 }
 0x592   : > { %v4548_v13 = vmul.f32 0.015625, %v4547_v36 }
 0x594   : > { %v4549_v54 = vsub.f32 %v4495_v27, %v4548_v13  ;;  %v4550_v43 = vsub.f32 %v4496_v0, %v4548_v13  ;;  %v4551_v30 = vsub.f32 %v4497_v51, %v4548_v13  ;;  %v4552_v11 = vsub.f32 %v4498_v7, %v4548_v13 }
 0x595   : > { %v4553_v44 = vsub.f32 %v4499_v1, %v4548_v13  ;;  %v4554_v22 = vsub.f32 %v4500_v42, %v4548_v13  ;;  %v4555_v53 = vsub.f32 %v4501_v14, %v4548_v13  ;;  %v4556_v16 = vsub.f32 %v4502_v34, %v4548_v13 }
 0x596   : > { %v4557_v61 = vmul.f32 %v4549_v54, %v4549_v54  ;;  %v4558_v15 = vmul.f32 %v4550_v43, %v4550_v43  ;;  %v4559_v32 = vmul.f32 %v4551_v30, %v4551_v30  ;;  %v4560_v39 = vmul.f32 %v4552_v11, %v4552_v11 }
 0x597   : > { %v4561_v17 = vmul.f32 %v4553_v44, %v4553_v44  ;;  %v4562_v3 = vmul.f32 %v4554_v22, %v4554_v22  ;;  %v4563_v38 = vmul.f32 %v4555_v53, %v4555_v53  ;;  %v4564_v20 = vmul.f32 %v4556_v16, %v4556_v16 }
 0x598   : > { %v4573_v56 = vadd.f32 %v4558_v15, %v4557_v61 }
 0x59a   : > { %v4574_v55 = vadd.f32 %v4573_v56, %v4559_v32 }
 0x59c   : > { %v4575_v24 = vadd.f32 %v4574_v55, %v4560_v39 }
 0x59e   : > { %v4576_v35 = vadd.f32 %v4575_v24, %v4561_v17 }
 0x5a0   : > { %v4577_v5 = vadd.f32 %v4576_v35, %v4562_v3 }
 0x5a2   : > { %v4578_v46 = vadd.f32 %v4577_v5, %v4563_v38 }
 0x5a4   : > { %v4579_v60 = vadd.f32 %v4578_v46, %v4564_v20 }
 0x5a6   : > { %v4580_v37 = vrot.slane %v4579_v60, 4 }
 0x5a8   : > { %v4581_v2 = vadd.f32 %v4580_v37, %v4579_v60 }
 0x5aa   : > { %v4582_v25 = vrot.slane %v4581_v2, 2 }
 0x5ac   : > { %v4583_v0 = vadd.f32 %v4582_v25, %v4581_v2 }
 0x5ae   : > { %v4584_v58 = vrot.slane %v4583_v0, 1 }
 0x5b0   : > { %v4585_v48 = vadd.f32 %v4584_v58, %v4583_v0 }
 0x5b2   : > { %v4586_v27 = vmul.f32 0.015625, %v4585_v48 }
 0x5b4   : > { %v4587_v12 = vadd.f32 1e-05, %v4586_v27 }
 0x5b6   : > { %6004 = vrsqrt.f32 %v4587_v12 }
 0x5c0   : > { %v6005_v8 = vpop.eup %6004 }
 0x5c1   : > { %v4589_v59 = vmul.f32 %v6005_v8, %v4549_v54  ;;  %v4590_v45 = vmul.f32 %v6005_v8, %v4550_v43  ;;  %v4591_v49 = vmul.f32 %v6005_v8, %v4551_v30  ;;  %v4592_v52 = vmul.f32 %v6005_v8, %v4552_v11 }
 0x5c2   : > { %v4593_v26 = vmul.f32 %v6005_v8, %v4553_v44  ;;  %v4594_v23 = vmul.f32 %v6005_v8, %v4554_v22  ;;  %v4595_v51 = vmul.f32 %v6005_v8, %v4555_v53  ;;  %v4596_v28 = vmul.f32 %v6005_v8, %v4556_v16 }
 0x5c3   : > { %v4604_v7 = vmul.f32 %v5106_v4, %v4589_v59  ;;  %v4605_v6 = vmul.f32 %v5106_v4, %v4590_v45  ;;  %v4606_v9 = vmul.f32 %v5106_v4, %v4591_v49  ;;  %v4607_v31 = vmul.f32 %v5106_v4, %v4592_v52 }
 0x5c4   : > { %v4608_v1 = vmul.f32 %v5106_v4, %v4593_v26  ;;  %v4609_v50 = vmul.f32 %v5106_v4, %v4594_v23  ;;  %v4610_v18 = vmul.f32 %v5106_v4, %v4595_v51  ;;  %v4611_v42 = vmul.f32 %v5106_v4, %v4596_v28 }
 0x5c5   : > { %v4619_v21 = vadd.f32 %v5107_v19, %v4604_v7  ;;  %v4620_v57 = vadd.f32 %v5107_v19, %v4605_v6  ;;  %v4621_v14 = vadd.f32 %v5107_v19, %v4606_v9  ;;  %v4622_v40 = vadd.f32 %v5107_v19, %v4607_v31 }
 0x5c6   : > { %v4623_v34 = vadd.f32 %v5107_v19, %v4608_v1  ;;  %v4624_v41 = vadd.f32 %v5107_v19, %v4609_v50  ;;  %v4625_v47 = vadd.f32 %v5107_v19, %v4610_v18  ;;  %v4626_v29 = vadd.f32 %v5107_v19, %v4611_v42 }
 0x5c7   : > { %4627 = vst [vmem:[#allocation2] sm:$0xff] %v4619_v21  ;;  %4628 = vst [vmem:[#allocation2 + $0x8] sm:$0xff] %v4620_v57 }
 0x5c8   : > { %4629 = vst [vmem:[#allocation2 + $0x10] sm:$0xff] %v4621_v14  ;;  %4630 = vst [vmem:[#allocation2 + $0x18] sm:$0xff] %v4622_v40 }
 0x5c9   : > { %4631 = vst [vmem:[#allocation2 + $0x20] sm:$0xff] %v4623_v34  ;;  %4632 = vst [vmem:[#allocation2 + $0x28] sm:$0xff] %v4624_v41 }
 0x5ca   : > { %4633 = vst [vmem:[#allocation2 + $0x30] sm:$0xff] %v4625_v47  ;;  %4634 = vst [vmem:[#allocation2 + $0x38] sm:$0xff] %v4626_v29 }
 0x5cb PF: > { %p5954_p7 = scmp.eq.s32.totalorder %s6143_s22, 1  ;;  %s6049_s30 = smov [#allocation2]  }
 0x5cc   : > { %s4641_s0 = sshll.u32 %s6049_s30, 4  ;;  %s4642_s0 = int_to_ptr.vmem [resolvable:$true] %s4641_s0 }
 0x5cd   : > { %s6006_s18 = scalar_lea.vmem %s4642_s0, 1024  ;;  %p6013_p11 = scmp.lt.s32.totalorder %s4642_s0, %s4642_s0 }
 0x5ce   : > { %p6007_p8 = scmp.ne.s32.totalorder %s4642_s0, %s6006_s18  ;;  %p6014_p12 = scmp.lt.s32.totalorder %s6006_s18, %s6006_s18 }
 0x5d0   : > { %p6008_p9 = pnand %p6007_p8, %p5954_p7  ;;  %p6015_p13 = por %p6014_p12, %p6013_p11 }
 0x5d2   : > { %p6009_p10 = pneg %p6008_p9 }
 0x5d4   : > { %p6016_p0 = pnand %p6015_p13, %p6009_p10 }
 0x5d6   : > { %6019 = shalt.err (!%p6016_p0)
}
 0x5d7   : > { %s7927_s23 = sld [smem:[#allocation87_spill]] }
 0x5dd   : > { %s6020_s26 = scalar_lea.hbm %s7927_s23, 1024 }
 0x5de   : > { %p6021_p1 = scmp.ne.s32.totalorder %s7927_s23, %s6020_s26  ;;  %p6026_p4 = scmp.lt.u32.totalorder %s6020_s26, %s7927_s23 }
 0x5e0   : > { %p6022_p2 = pnand %p6021_p1, %p5954_p7 }
 0x5e2   : > { %p6023_p3 = pneg %p6022_p2 }
 0x5e4   : > { %p6028_p5 = pnand %p6026_p4, %p6023_p3 }
 0x5e6   : > { %6031 = shalt.err (!%p6028_p5)
}
 0x5e7   : > { %s6050_s25 = smov 128   ;;  %s6051_s15 = smov 8  }
 0x5e8   : > { %5951 = dma.vmem_to_hbm [thread:$0]  (%p5954_p7), %s4642_s0, 1024, %s7927_s23, [#allocation3], %s6050_s25, %s6050_s25, %s6051_s15  }
 0x5e9   : > { %6037 = dma.done.wait (%p5954_p7), [#allocation3], 1024  }
 0x5ea   : > { %6039 = vsyncadd (%p5954_p7), [#allocation3], 4294966272 }
 0x5eb PF: > { %s7928_s28 = sld [smem:[#allocation5_spill]] }
 0x5f1   : > { %s27_s21 = sadd.s32 1, %s7928_s28  }
 0x5f2   : > { %p24_p6 = scmp.ge.s32.totalorder %s27_s21, 4  }
 0x5f4   :  { %26 = sbr.rel (!%p24_p6) target bundleno = 5 (0x5), region = 128 }
 0x5fb   :  { %4657 = vsyncpa [#allocation3], 1 }
 0x5fc   :  { %4659 = vsyncpa [#allocation3 + $0x1], 1 }

</bundles_post_ra>
